<compile_context>
chip_gen: v7x
topology: tpu7x:2x2x1
jax: 0.10.0
libtpu: 0.0.40
codegen_flags: <defaults>
</compile_context>

<pallas_src>
import jax
import jax.numpy as jnp
import numpy as np
from jax.experimental import pallas as pl
from jax.experimental.pallas import tpu as pltpu

_LANE = 128
_VMEM_LIMIT = 32 * 1024 * 1024  # explicit budget, safe on v5e/v6e/v7x


def _round_up(x, m):
    return ((x + m - 1) // m) * m


# ----------------------------------------------------------------------------
# Pallas kernels
# ----------------------------------------------------------------------------
def _conv_pool_kernel(p0_ref, p1_ref, p2_ref, p3_ref, w_ref, b_ref, o_ref):
    """Fused conv(as matmul) + bias + ReLU + 2x2 max-pool epilogue.

    p{0..3}: (tile_m, K) bf16 im2col rows for the four pooling-window corners.
    w: (K, 128) bf16 (constant index_map -> VMEM-resident across the M grid).
    b: (1, 128) f32.   o: (tile_m, 128) bf16, lane-dense.
    """
    w = w_ref[...]
    a0 = jnp.dot(p0_ref[...], w, preferred_element_type=jnp.float32)
    a1 = jnp.dot(p1_ref[...], w, preferred_element_type=jnp.float32)
    a2 = jnp.dot(p2_ref[...], w, preferred_element_type=jnp.float32)
    a3 = jnp.dot(p3_ref[...], w, preferred_element_type=jnp.float32)
    # 2x2 max-pool commutes with the monotonic bias-add + ReLU epilogue.
    m = jnp.maximum(jnp.maximum(a0, a1), jnp.maximum(a2, a3))
    o_ref[...] = jnp.maximum(m + b_ref[...], 0.0).astype(o_ref.dtype)


def _mlp_kernel(x_ref, w1_ref, b1_ref, w2_ref, b2_ref, o_ref):
    """Fused classification head: relu(x @ W1 + b1) @ W2 + b2."""
    h = jnp.dot(x_ref[...], w1_ref[...], preferred_element_type=jnp.float32)
    h = jnp.maximum(h + b1_ref[...], 0.0)
    o = jnp.dot(h.astype(jnp.bfloat16), w2_ref[...],
                preferred_element_type=jnp.float32)
    o_ref[...] = (o + b2_ref[...]).astype(o_ref.dtype)


# ----------------------------------------------------------------------------
# Layer wrappers (window extraction / padding = host-side XLA glue)
# ----------------------------------------------------------------------------
def _pooled_corner_patches(x_bf16, dh, dw, Hp, Wp):
    """im2col rows for conv outputs at (2*hp+dh, 2*wp+dw): (B*Hp*Wp, 9*Cin)."""
    taps = []
    for kh in range(3):
        for kw in range(3):
            taps.append(x_bf16[:, dh + kh: dh + kh + 2 * Hp: 2,
                               dw + kw: dw + kw + 2 * Wp: 2, :])
    p = jnp.concatenate(taps, axis=-1)            # (B, Hp, Wp, 9*Cin)
    return p.reshape(-1, p.shape[-1])


def conv3x3_relu_pool(x_nhwc, w_oihw, b, *, tile_m=256):
    """VALID 3x3 conv + bias + ReLU + 2x2/2 max-pool, fused in one kernel.

    x: (B, H, W, Cin) bf16/f32 (Cin may carry zero lane-padding from the
    previous stage), w: (Cout, Cin_real, 3, 3), b: (Cout,).
    Returns (B, Hp, Wp, 128) bf16 with channels >= Cout identically 0.
    """
    B, H, W, Cin = x_nhwc.shape
    Cout, Cin_real, _, _ = w_oihw.shape
    assert Cin_real <= Cin
    Ho, Wo = H - 2, W - 2
    Hp, Wp = Ho // 2, Wo // 2
    Np = _round_up(Cout, _LANE)
    K = 9 * Cin

    # (Cout, Cin_real, 3, 3) -> (3, 3, Cin, Np) -> (9*Cin, Np); zero padding on
    # both the carried input channels and the lane-padded output channels.
    wt = jnp.transpose(w_oihw, (2, 3, 1, 0))
    wt = jnp.pad(wt, ((0, 0), (0, 0), (0, Cin - Cin_real), (0, Np - Cout)))
    wm = wt.reshape(K, Np).astype(jnp.bfloat16)
    bp = jnp.pad(b, (0, Np - Cout)).reshape(1, Np).astype(jnp.float32)

    xb = x_nhwc.astype(jnp.bfloat16)
    # TODO(synk): window extraction stays in XLA; an in-kernel shifted-matmul
    # formulation (no materialized patches) is not safely lowerable for these
    # odd spatial sizes, so the patch matrices are built host-side.
    corners = [_pooled_corner_patches(xb, dh, dw, Hp, Wp)
               for dh in (0, 1) for dw in (0, 1)]

    M = B * Hp * Wp
    tm = min(tile_m, _round_up(M, 8))
    M_pad = _round_up(M, tm)
    corners = [jnp.pad(p, ((0, M_pad - M), (0, 0))) for p in corners]

    row_spec = pl.BlockSpec((tm, K), lambda i: (i, 0))
    out = pl.pallas_call(
        _conv_pool_kernel,
        out_shape=jax.ShapeDtypeStruct((M_pad, Np), jnp.bfloat16),
        grid=(M_pad // tm,),
        in_specs=[row_spec, row_spec, row_spec, row_spec,
                  pl.BlockSpec((K, Np), lambda i: (0, 0)),   # resident weights
                  pl.BlockSpec((1, Np), lambda i: (0, 0))],  # resident bias
        out_specs=pl.BlockSpec((tm, Np), lambda i: (i, 0)),
        compiler_params=pltpu.CompilerParams(
            dimension_semantics=("parallel",),
            vmem_limit_bytes=_VMEM_LIMIT),
    )(*corners, wm, bp)
    return out[:M].reshape(B, Hp, Wp, Np)


def mlp_head(feats, w1, b1, w2, b2):
    """relu(feats @ W1 + b1) @ W2 + b2 fused in one lane-dense kernel."""
    B, K = feats.shape
    N1, N2 = w1.shape[1], w2.shape[1]
    Np = _LANE
    Mp = _round_up(B, 8)
    x = jnp.pad(feats.astype(jnp.bfloat16), ((0, Mp - B), (0, 0)))
    w1p = jnp.pad(w1, ((0, 0), (0, Np - N1))).astype(jnp.bfloat16)
    b1p = jnp.pad(b1, (0, Np - N1)).reshape(1, Np).astype(jnp.float32)
    w2p = jnp.pad(w2, ((0, Np - w2.shape[0]), (0, Np - N2))).astype(jnp.bfloat16)
    b2p = jnp.pad(b2, (0, Np - N2)).reshape(1, Np).astype(jnp.float32)
    out = pl.pallas_call(
        _mlp_kernel,
        out_shape=jax.ShapeDtypeStruct((Mp, Np), jnp.float32),
        grid=(1,),
        in_specs=[pl.BlockSpec((Mp, K), lambda i: (0, 0)),
                  pl.BlockSpec((K, Np), lambda i: (0, 0)),
                  pl.BlockSpec((1, Np), lambda i: (0, 0)),
                  pl.BlockSpec((Np, Np), lambda i: (0, 0)),
                  pl.BlockSpec((1, Np), lambda i: (0, 0))],
        out_specs=pl.BlockSpec((Mp, Np), lambda i: (0, 0)),
        compiler_params=pltpu.CompilerParams(
            dimension_semantics=("arbitrary",),
            vmem_limit_bytes=_VMEM_LIMIT),
    )(x, w1p, b1p, w2p, b2p)
    return out[:B, :N2]


# ----------------------------------------------------------------------------
# Full forward pass (matches CNNClassifier.forward semantics)
# ----------------------------------------------------------------------------
def cnn_forward(params, x_nchw):
    x = jnp.transpose(x_nchw, (0, 2, 3, 1))                  # NCHW -> NHWC
    # TODO(synk): the three conv stages could share a single pallas_call with
    # all weights VMEM-resident; kept as three fused calls for lowering safety.
    y = conv3x3_relu_pool(x, params["w1"], params["b1"])     # (B,13,13,128)
    y = conv3x3_relu_pool(y, params["w2"], params["b2"])     # (B, 5, 5,128)
    y = conv3x3_relu_pool(y, params["w3"], params["b3"])     # (B, 1, 1,128)
    feats = y.reshape(y.shape[0], -1)[:, :64]                # == reshape(-1,64)
    return mlp_head(feats, params["fc1_w"], params["fc1_b"],
                    params["fc2_w"], params["fc2_b"])        # (B, 10) f32


# Pure-JAX reference with matching bf16-operand / f32-accumulate numerics.
def reference_forward(params, x_nchw):
    f32 = jnp.float32

    def conv_relu(x, w, b):
        y = jax.lax.conv_general_dilated(
            x.astype(jnp.bfloat16), w.astype(jnp.bfloat16), (1, 1), "VALID",
            dimension_numbers=("NCHW", "OIHW", "NCHW"),
            preferred_element_type=f32)
        return jnp.maximum(y + b[None, :, None, None].astype(f32), 0.0)

    def pool(x):
        return jax.lax.reduce_window(
            x, -jnp.inf, jax.lax.max, (1, 1, 2, 2), (1, 1, 2, 2), "VALID")

    y = pool(conv_relu(x_nchw, params["w1"], params["b1"])).astype(jnp.bfloat16)
    y = pool(conv_relu(y, params["w2"], params["b2"])).astype(jnp.bfloat16)
    y = pool(conv_relu(y, params["w3"], params["b3"])).astype(jnp.bfloat16)
    f = y.reshape(-1, 64)
    h = jnp.dot(f, params["fc1_w"].astype(jnp.bfloat16),
                preferred_element_type=f32) + params["fc1_b"]
    h = jnp.maximum(h, 0.0).astype(jnp.bfloat16)
    return jnp.dot(h, params["fc2_w"].astype(jnp.bfloat16),
                   preferred_element_type=f32) + params["fc2_b"]


def init_params(key):
    ks = jax.random.split(key, 10)
    return {
        "w1": 0.1 * jax.random.normal(ks[0], (64, 1, 3, 3), jnp.float32),
        "b1": 0.1 * jax.random.normal(ks[1], (64,), jnp.float32),
        "w2": 0.05 * jax.random.normal(ks[2], (128, 64, 3, 3), jnp.float32),
        "b2": 0.1 * jax.random.normal(ks[3], (128,), jnp.float32),
        "w3": 0.05 * jax.random.normal(ks[4], (64, 128, 3, 3), jnp.float32),
        "b3": 0.1 * jax.random.normal(ks[5], (64,), jnp.float32),
        "fc1_w": 0.1 * jax.random.normal(ks[6], (64, 20), jnp.float32),
        "fc1_b": 0.1 * jax.random.normal(ks[7], (20,), jnp.float32),
        "fc2_w": 0.1 * jax.random.normal(ks[8], (20, 10), jnp.float32),
        "fc2_b": 0.1 * jax.random.normal(ks[9], (10,), jnp.float32),
    }


if __name__ == "__main__":
    key = jax.random.PRNGKey(0)
    pkey, xkey = jax.random.split(key)
    params = init_params(pkey)

    # 28x28 single-channel input (MNIST-style): the spatial size family for
    # which the module's reshape(-1, 64) yields one row per image.
    x = jax.random.normal(xkey, (2, 1, 28, 28), jnp.float32)

    fwd = jax.jit(cnn_forward)
    out = jax.block_until_ready(fwd(params, x))
    ref = jax.block_until_ready(reference_forward(params, x))

    assert out.shape == (2, 10), out.shape
    np.testing.assert_allclose(np.asarray(out), np.asarray(ref),
                               rtol=1e-2, atol=1e-2)
    print("KERNEL_OK")
</pallas_src>

<mosaic_0001>
module attributes {stable_mosaic.version = 11 : i64} {
  func.func @_conv_pool_kernel(%arg0: i32, %arg1: memref<256x9xbf16, #tpu.memory_space<vmem>>, %arg2: memref<256x9xbf16, #tpu.memory_space<vmem>>, %arg3: memref<256x9xbf16, #tpu.memory_space<vmem>>, %arg4: memref<256x9xbf16, #tpu.memory_space<vmem>>, %arg5: memref<9x128xbf16, #tpu.memory_space<vmem>>, %arg6: memref<1x128xf32, #tpu.memory_space<vmem>>, %arg7: memref<256x128xbf16, #tpu.memory_space<vmem>>) attributes {dimension_semantics = [#tpu.dimension_semantics<parallel>], iteration_bounds = array<i64: 2>, scalar_prefetch = 0 : i64, scratch_operands = 0 : i64, tpu.core_type = #tpu.core_type<tc>, window_params = [{transform_indices = @transform_0, window_bounds = array<i64: 256, 9>}, {transform_indices = @transform_1, window_bounds = array<i64: 256, 9>}, {transform_indices = @transform_2, window_bounds = array<i64: 256, 9>}, {transform_indices = @transform_3, window_bounds = array<i64: 256, 9>}, {pipeline_mode = #tpu.pipeline_mode<synchronous>, transform_indices = @transform_4, window_bounds = array<i64: 9, 128>}, {pipeline_mode = #tpu.pipeline_mode<synchronous>, transform_indices = @transform_5, window_bounds = array<i64: 1, 128>}, {transform_indices = @transform_6, window_bounds = array<i64: 256, 128>}]} {
    %c0 = arith.constant 0 : index
    %c0_0 = arith.constant 0 : index
    %0 = vector.load %arg5[%c0, %c0_0] : memref<9x128xbf16, #tpu.memory_space<vmem>>, vector<9x128xbf16>
    %c0_1 = arith.constant 0 : index
    %c0_2 = arith.constant 0 : index
    %1 = vector.load %arg1[%c0_1, %c0_2] : memref<256x9xbf16, #tpu.memory_space<vmem>>, vector<256x9xbf16>
    %cst = arith.constant dense<0.000000e+00> : vector<256x128xf32>
    %2 = tpu.matmul %1, %0, %cst {dimension_numbers = #tpu.dot_dimension_numbers<[1], [0], [0], [1], [0, 0, 1, 1], [], []>} : vector<256x9xbf16>, vector<9x128xbf16>, vector<256x128xf32> -> vector<256x128xf32>
    %c0_3 = arith.constant 0 : index
    %c0_4 = arith.constant 0 : index
    %3 = vector.load %arg2[%c0_3, %c0_4] : memref<256x9xbf16, #tpu.memory_space<vmem>>, vector<256x9xbf16>
    %cst_5 = arith.constant dense<0.000000e+00> : vector<256x128xf32>
    %4 = tpu.matmul %3, %0, %cst_5 {dimension_numbers = #tpu.dot_dimension_numbers<[1], [0], [0], [1], [0, 0, 1, 1], [], []>} : vector<256x9xbf16>, vector<9x128xbf16>, vector<256x128xf32> -> vector<256x128xf32>
    %c0_6 = arith.constant 0 : index
    %c0_7 = arith.constant 0 : index
    %5 = vector.load %arg3[%c0_6, %c0_7] : memref<256x9xbf16, #tpu.memory_space<vmem>>, vector<256x9xbf16>
    %cst_8 = arith.constant dense<0.000000e+00> : vector<256x128xf32>
    %6 = tpu.matmul %5, %0, %cst_8 {dimension_numbers = #tpu.dot_dimension_numbers<[1], [0], [0], [1], [0, 0, 1, 1], [], []>} : vector<256x9xbf16>, vector<9x128xbf16>, vector<256x128xf32> -> vector<256x128xf32>
    %c0_9 = arith.constant 0 : index
    %c0_10 = arith.constant 0 : index
    %7 = vector.load %arg4[%c0_9, %c0_10] : memref<256x9xbf16, #tpu.memory_space<vmem>>, vector<256x9xbf16>
    %cst_11 = arith.constant dense<0.000000e+00> : vector<256x128xf32>
    %8 = tpu.matmul %7, %0, %cst_11 {dimension_numbers = #tpu.dot_dimension_numbers<[1], [0], [0], [1], [0, 0, 1, 1], [], []>} : vector<256x9xbf16>, vector<9x128xbf16>, vector<256x128xf32> -> vector<256x128xf32>
    %9 = arith.maximumf %2, %4 : vector<256x128xf32>
    %10 = arith.maximumf %6, %8 : vector<256x128xf32>
    %11 = arith.maximumf %9, %10 : vector<256x128xf32>
    %c0_12 = arith.constant 0 : index
    %c0_13 = arith.constant 0 : index
    %12 = vector.load %arg6[%c0_12, %c0_13] : memref<1x128xf32, #tpu.memory_space<vmem>>, vector<1x128xf32>
    %13 = vector.broadcast %12 : vector<1x128xf32> to vector<256x128xf32>
    %14 = arith.addf %11, %13 : vector<256x128xf32>
    %cst_14 = arith.constant 0.000000e+00 : f32
    %15 = vector.broadcast %cst_14 : f32 to vector<256x128xf32>
    %16 = arith.maximumf %14, %15 : vector<256x128xf32>
    %17 = arith.truncf %16 : vector<256x128xf32> to vector<256x128xbf16>
    %c0_15 = arith.constant 0 : index
    %c0_16 = arith.constant 0 : index
    %18 = vector.load %arg7[%c0_15, %c0_16] : memref<256x128xbf16, #tpu.memory_space<vmem>>, vector<256x128xbf16>
    tpu.vector_store %arg7[%c0_15, %c0_16], %17 {strides = array<i32>} : memref<256x128xbf16, #tpu.memory_space<vmem>>, vector<256x128xbf16>,
    return
  }
  func.func @transform_0(%arg0: i32) -> (i32, i32) {
    %c0_i32 = arith.constant 0 : i32
    %c0_i32_0 = arith.constant 0 : i32
    return %arg0, %c0_i32 : i32, i32
  }
  func.func @transform_1(%arg0: i32) -> (i32, i32) {
    %c0_i32 = arith.constant 0 : i32
    %c0_i32_0 = arith.constant 0 : i32
    return %arg0, %c0_i32 : i32, i32
  }
  func.func @transform_2(%arg0: i32) -> (i32, i32) {
    %c0_i32 = arith.constant 0 : i32
    %c0_i32_0 = arith.constant 0 : i32
    return %arg0, %c0_i32 : i32, i32
  }
  func.func @transform_3(%arg0: i32) -> (i32, i32) {
    %c0_i32 = arith.constant 0 : i32
    %c0_i32_0 = arith.constant 0 : i32
    return %arg0, %c0_i32 : i32, i32
  }
  func.func @transform_4(%arg0: i32) -> (i32, i32) {
    %c0_i32 = arith.constant 0 : i32
    %c0_i32_0 = arith.constant 0 : i32
    %c0_i32_1 = arith.constant 0 : i32
    return %c0_i32, %c0_i32_0 : i32, i32
  }
  func.func @transform_5(%arg0: i32) -> (i32, i32) {
    %c0_i32 = arith.constant 0 : i32
    %c0_i32_0 = arith.constant 0 : i32
    %c0_i32_1 = arith.constant 0 : i32
    return %c0_i32, %c0_i32_0 : i32, i32
  }
  func.func @transform_6(%arg0: i32) -> (i32, i32) {
    %c0_i32 = arith.constant 0 : i32
    %c0_i32_0 = arith.constant 0 : i32
    return %arg0, %c0_i32 : i32, i32
  }
}

module attributes {stable_mosaic.version = 11 : i64} {
  func.func @_conv_pool_kernel(%arg0: i32, %arg1: memref<56x1152xbf16, #tpu.memory_space<vmem>>, %arg2: memref<56x1152xbf16, #tpu.memory_space<vmem>>, %arg3: memref<56x1152xbf16, #tpu.memory_space<vmem>>, %arg4: memref<56x1152xbf16, #tpu.memory_space<vmem>>, %arg5: memref<1152x128xbf16, #tpu.memory_space<vmem>>, %arg6: memref<1x128xf32, #tpu.memory_space<vmem>>, %arg7: memref<56x128xbf16, #tpu.memory_space<vmem>>) attributes {dimension_semantics = [#tpu.dimension_semantics<parallel>], iteration_bounds = array<i64: 1>, scalar_prefetch = 0 : i64, scratch_operands = 0 : i64, tpu.core_type = #tpu.core_type<tc>, window_params = [{transform_indices = @transform_0, window_bounds = array<i64: 56, 1152>}, {transform_indices = @transform_1, window_bounds = array<i64: 56, 1152>}, {transform_indices = @transform_2, window_bounds = array<i64: 56, 1152>}, {transform_indices = @transform_3, window_bounds = array<i64: 56, 1152>}, {pipeline_mode = #tpu.pipeline_mode<synchronous>, transform_indices = @transform_4, window_bounds = array<i64: 1152, 128>}, {pipeline_mode = #tpu.pipeline_mode<synchronous>, transform_indices = @transform_5, window_bounds = array<i64: 1, 128>}, {transform_indices = @transform_6, window_bounds = array<i64: 56, 128>}]} {
    %c0 = arith.constant 0 : index
    %c0_0 = arith.constant 0 : index
    %0 = vector.load %arg5[%c0, %c0_0] : memref<1152x128xbf16, #tpu.memory_space<vmem>>, vector<1152x128xbf16>
    %c0_1 = arith.constant 0 : index
    %c0_2 = arith.constant 0 : index
    %1 = vector.load %arg1[%c0_1, %c0_2] : memref<56x1152xbf16, #tpu.memory_space<vmem>>, vector<56x1152xbf16>
    %cst = arith.constant dense<0.000000e+00> : vector<56x128xf32>
    %2 = tpu.matmul %1, %0, %cst {dimension_numbers = #tpu.dot_dimension_numbers<[1], [0], [0], [1], [0, 0, 1, 1], [], []>} : vector<56x1152xbf16>, vector<1152x128xbf16>, vector<56x128xf32> -> vector<56x128xf32>
    %c0_3 = arith.constant 0 : index
    %c0_4 = arith.constant 0 : index
    %3 = vector.load %arg2[%c0_3, %c0_4] : memref<56x1152xbf16, #tpu.memory_space<vmem>>, vector<56x1152xbf16>
    %cst_5 = arith.constant dense<0.000000e+00> : vector<56x128xf32>
    %4 = tpu.matmul %3, %0, %cst_5 {dimension_numbers = #tpu.dot_dimension_numbers<[1], [0], [0], [1], [0, 0, 1, 1], [], []>} : vector<56x1152xbf16>, vector<1152x128xbf16>, vector<56x128xf32> -> vector<56x128xf32>
    %c0_6 = arith.constant 0 : index
    %c0_7 = arith.constant 0 : index
    %5 = vector.load %arg3[%c0_6, %c0_7] : memref<56x1152xbf16, #tpu.memory_space<vmem>>, vector<56x1152xbf16>
    %cst_8 = arith.constant dense<0.000000e+00> : vector<56x128xf32>
    %6 = tpu.matmul %5, %0, %cst_8 {dimension_numbers = #tpu.dot_dimension_numbers<[1], [0], [0], [1], [0, 0, 1, 1], [], []>} : vector<56x1152xbf16>, vector<1152x128xbf16>, vector<56x128xf32> -> vector<56x128xf32>
    %c0_9 = arith.constant 0 : index
    %c0_10 = arith.constant 0 : index
    %7 = vector.load %arg4[%c0_9, %c0_10] : memref<56x1152xbf16, #tpu.memory_space<vmem>>, vector<56x1152xbf16>
    %cst_11 = arith.constant dense<0.000000e+00> : vector<56x128xf32>
    %8 = tpu.matmul %7, %0, %cst_11 {dimension_numbers = #tpu.dot_dimension_numbers<[1], [0], [0], [1], [0, 0, 1, 1], [], []>} : vector<56x1152xbf16>, vector<1152x128xbf16>, vector<56x128xf32> -> vector<56x128xf32>
    %9 = arith.maximumf %2, %4 : vector<56x128xf32>
    %10 = arith.maximumf %6, %8 : vector<56x128xf32>
    %11 = arith.maximumf %9, %10 : vector<56x128xf32>
    %c0_12 = arith.constant 0 : index
    %c0_13 = arith.constant 0 : index
    %12 = vector.load %arg6[%c0_12, %c0_13] : memref<1x128xf32, #tpu.memory_space<vmem>>, vector<1x128xf32>
    %13 = vector.broadcast %12 : vector<1x128xf32> to vector<56x128xf32>
    %14 = arith.addf %11, %13 : vector<56x128xf32>
    %cst_14 = arith.constant 0.000000e+00 : f32
    %15 = vector.broadcast %cst_14 : f32 to vector<56x128xf32>
    %16 = arith.maximumf %14, %15 : vector<56x128xf32>
    %17 = arith.truncf %16 : vector<56x128xf32> to vector<56x128xbf16>
    %c0_15 = arith.constant 0 : index
    %c0_16 = arith.constant 0 : index
    %18 = vector.load %arg7[%c0_15, %c0_16] : memref<56x128xbf16, #tpu.memory_space<vmem>>, vector<56x128xbf16>
    tpu.vector_store %arg7[%c0_15, %c0_16], %17 {strides = array<i32>} : memref<56x128xbf16, #tpu.memory_space<vmem>>, vector<56x128xbf16>,
    return
  }
  func.func @transform_0(%arg0: i32) -> (i32, i32) {
    %c0_i32 = arith.constant 0 : i32
    %c0_i32_0 = arith.constant 0 : i32
    return %arg0, %c0_i32 : i32, i32
  }
  func.func @transform_1(%arg0: i32) -> (i32, i32) {
    %c0_i32 = arith.constant 0 : i32
    %c0_i32_0 = arith.constant 0 : i32
    return %arg0, %c0_i32 : i32, i32
  }
  func.func @transform_2(%arg0: i32) -> (i32, i32) {
    %c0_i32 = arith.constant 0 : i32
    %c0_i32_0 = arith.constant 0 : i32
    return %arg0, %c0_i32 : i32, i32
  }
  func.func @transform_3(%arg0: i32) -> (i32, i32) {
    %c0_i32 = arith.constant 0 : i32
    %c0_i32_0 = arith.constant 0 : i32
    return %arg0, %c0_i32 : i32, i32
  }
  func.func @transform_4(%arg0: i32) -> (i32, i32) {
    %c0_i32 = arith.constant 0 : i32
    %c0_i32_0 = arith.constant 0 : i32
    %c0_i32_1 = arith.constant 0 : i32
    return %c0_i32, %c0_i32_0 : i32, i32
  }
  func.func @transform_5(%arg0: i32) -> (i32, i32) {
    %c0_i32 = arith.constant 0 : i32
    %c0_i32_0 = arith.constant 0 : i32
    %c0_i32_1 = arith.constant 0 : i32
    return %c0_i32, %c0_i32_0 : i32, i32
  }
  func.func @transform_6(%arg0: i32) -> (i32, i32) {
    %c0_i32 = arith.constant 0 : i32
    %c0_i32_0 = arith.constant 0 : i32
    return %arg0, %c0_i32 : i32, i32
  }
}

module attributes {stable_mosaic.version = 11 : i64} {
  func.func @_conv_pool_kernel(%arg0: i32, %arg1: memref<8x1152xbf16, #tpu.memory_space<vmem>>, %arg2: memref<8x1152xbf16, #tpu.memory_space<vmem>>, %arg3: memref<8x1152xbf16, #tpu.memory_space<vmem>>, %arg4: memref<8x1152xbf16, #tpu.memory_space<vmem>>, %arg5: memref<1152x128xbf16, #tpu.memory_space<vmem>>, %arg6: memref<1x128xf32, #tpu.memory_space<vmem>>, %arg7: memref<8x128xbf16, #tpu.memory_space<vmem>>) attributes {dimension_semantics = [#tpu.dimension_semantics<parallel>], iteration_bounds = array<i64: 1>, scalar_prefetch = 0 : i64, scratch_operands = 0 : i64, tpu.core_type = #tpu.core_type<tc>, window_params = [{transform_indices = @transform_0, window_bounds = array<i64: 8, 1152>}, {transform_indices = @transform_1, window_bounds = array<i64: 8, 1152>}, {transform_indices = @transform_2, window_bounds = array<i64: 8, 1152>}, {transform_indices = @transform_3, window_bounds = array<i64: 8, 1152>}, {pipeline_mode = #tpu.pipeline_mode<synchronous>, transform_indices = @transform_4, window_bounds = array<i64: 1152, 128>}, {pipeline_mode = #tpu.pipeline_mode<synchronous>, transform_indices = @transform_5, window_bounds = array<i64: 1, 128>}, {transform_indices = @transform_6, window_bounds = array<i64: 8, 128>}]} {
    %c0 = arith.constant 0 : index
    %c0_0 = arith.constant 0 : index
    %0 = vector.load %arg5[%c0, %c0_0] : memref<1152x128xbf16, #tpu.memory_space<vmem>>, vector<1152x128xbf16>
    %c0_1 = arith.constant 0 : index
    %c0_2 = arith.constant 0 : index
    %1 = vector.load %arg1[%c0_1, %c0_2] : memref<8x1152xbf16, #tpu.memory_space<vmem>>, vector<8x1152xbf16>
    %cst = arith.constant dense<0.000000e+00> : vector<8x128xf32>
    %2 = tpu.matmul %1, %0, %cst {dimension_numbers = #tpu.dot_dimension_numbers<[1], [0], [0], [1], [0, 0, 1, 1], [], []>} : vector<8x1152xbf16>, vector<1152x128xbf16>, vector<8x128xf32> -> vector<8x128xf32>
    %c0_3 = arith.constant 0 : index
    %c0_4 = arith.constant 0 : index
    %3 = vector.load %arg2[%c0_3, %c0_4] : memref<8x1152xbf16, #tpu.memory_space<vmem>>, vector<8x1152xbf16>
    %cst_5 = arith.constant dense<0.000000e+00> : vector<8x128xf32>
    %4 = tpu.matmul %3, %0, %cst_5 {dimension_numbers = #tpu.dot_dimension_numbers<[1], [0], [0], [1], [0, 0, 1, 1], [], []>} : vector<8x1152xbf16>, vector<1152x128xbf16>, vector<8x128xf32> -> vector<8x128xf32>
    %c0_6 = arith.constant 0 : index
    %c0_7 = arith.constant 0 : index
    %5 = vector.load %arg3[%c0_6, %c0_7] : memref<8x1152xbf16, #tpu.memory_space<vmem>>, vector<8x1152xbf16>
    %cst_8 = arith.constant dense<0.000000e+00> : vector<8x128xf32>
    %6 = tpu.matmul %5, %0, %cst_8 {dimension_numbers = #tpu.dot_dimension_numbers<[1], [0], [0], [1], [0, 0, 1, 1], [], []>} : vector<8x1152xbf16>, vector<1152x128xbf16>, vector<8x128xf32> -> vector<8x128xf32>
    %c0_9 = arith.constant 0 : index
    %c0_10 = arith.constant 0 : index
    %7 = vector.load %arg4[%c0_9, %c0_10] : memref<8x1152xbf16, #tpu.memory_space<vmem>>, vector<8x1152xbf16>
    %cst_11 = arith.constant dense<0.000000e+00> : vector<8x128xf32>
    %8 = tpu.matmul %7, %0, %cst_11 {dimension_numbers = #tpu.dot_dimension_numbers<[1], [0], [0], [1], [0, 0, 1, 1], [], []>} : vector<8x1152xbf16>, vector<1152x128xbf16>, vector<8x128xf32> -> vector<8x128xf32>
    %9 = arith.maximumf %2, %4 : vector<8x128xf32>
    %10 = arith.maximumf %6, %8 : vector<8x128xf32>
    %11 = arith.maximumf %9, %10 : vector<8x128xf32>
    %c0_12 = arith.constant 0 : index
    %c0_13 = arith.constant 0 : index
    %12 = vector.load %arg6[%c0_12, %c0_13] : memref<1x128xf32, #tpu.memory_space<vmem>>, vector<1x128xf32>
    %13 = vector.broadcast %12 : vector<1x128xf32> to vector<8x128xf32>
    %14 = arith.addf %11, %13 : vector<8x128xf32>
    %cst_14 = arith.constant 0.000000e+00 : f32
    %15 = vector.broadcast %cst_14 : f32 to vector<8x128xf32>
    %16 = arith.maximumf %14, %15 : vector<8x128xf32>
    %17 = arith.truncf %16 : vector<8x128xf32> to vector<8x128xbf16>
    %c0_15 = arith.constant 0 : index
    %c0_16 = arith.constant 0 : index
    %18 = vector.load %arg7[%c0_15, %c0_16] : memref<8x128xbf16, #tpu.memory_space<vmem>>, vector<8x128xbf16>
    tpu.vector_store %arg7[%c0_15, %c0_16], %17 {strides = array<i32>} : memref<8x128xbf16, #tpu.memory_space<vmem>>, vector<8x128xbf16>,
    return
  }
  func.func @transform_0(%arg0: i32) -> (i32, i32) {
    %c0_i32 = arith.constant 0 : i32
    %c0_i32_0 = arith.constant 0 : i32
    return %arg0, %c0_i32 : i32, i32
  }
  func.func @transform_1(%arg0: i32) -> (i32, i32) {
    %c0_i32 = arith.constant 0 : i32
    %c0_i32_0 = arith.constant 0 : i32
    return %arg0, %c0_i32 : i32, i32
  }
  func.func @transform_2(%arg0: i32) -> (i32, i32) {
    %c0_i32 = arith.constant 0 : i32
    %c0_i32_0 = arith.constant 0 : i32
    return %arg0, %c0_i32 : i32, i32
  }
  func.func @transform_3(%arg0: i32) -> (i32, i32) {
    %c0_i32 = arith.constant 0 : i32
    %c0_i32_0 = arith.constant 0 : i32
    return %arg0, %c0_i32 : i32, i32
  }
  func.func @transform_4(%arg0: i32) -> (i32, i32) {
    %c0_i32 = arith.constant 0 : i32
    %c0_i32_0 = arith.constant 0 : i32
    %c0_i32_1 = arith.constant 0 : i32
    return %c0_i32, %c0_i32_0 : i32, i32
  }
  func.func @transform_5(%arg0: i32) -> (i32, i32) {
    %c0_i32 = arith.constant 0 : i32
    %c0_i32_0 = arith.constant 0 : i32
    %c0_i32_1 = arith.constant 0 : i32
    return %c0_i32, %c0_i32_0 : i32, i32
  }
  func.func @transform_6(%arg0: i32) -> (i32, i32) {
    %c0_i32 = arith.constant 0 : i32
    %c0_i32_0 = arith.constant 0 : i32
    return %arg0, %c0_i32 : i32, i32
  }
}

module attributes {stable_mosaic.version = 11 : i64} {
  func.func @_mlp_kernel(%arg0: i32, %arg1: memref<8x64xbf16, #tpu.memory_space<vmem>>, %arg2: memref<64x128xbf16, #tpu.memory_space<vmem>>, %arg3: memref<1x128xf32, #tpu.memory_space<vmem>>, %arg4: memref<128x128xbf16, #tpu.memory_space<vmem>>, %arg5: memref<1x128xf32, #tpu.memory_space<vmem>>, %arg6: memref<8x128xf32, #tpu.memory_space<vmem>>) attributes {dimension_semantics = [#tpu.dimension_semantics<arbitrary>], iteration_bounds = array<i64: 1>, scalar_prefetch = 0 : i64, scratch_operands = 0 : i64, tpu.core_type = #tpu.core_type<tc>, window_params = [{pipeline_mode = #tpu.pipeline_mode<synchronous>, transform_indices = @transform_0, window_bounds = array<i64: 8, 64>}, {pipeline_mode = #tpu.pipeline_mode<synchronous>, transform_indices = @transform_1, window_bounds = array<i64: 64, 128>}, {pipeline_mode = #tpu.pipeline_mode<synchronous>, transform_indices = @transform_2, window_bounds = array<i64: 1, 128>}, {pipeline_mode = #tpu.pipeline_mode<synchronous>, transform_indices = @transform_3, window_bounds = array<i64: 128, 128>}, {pipeline_mode = #tpu.pipeline_mode<synchronous>, transform_indices = @transform_4, window_bounds = array<i64: 1, 128>}, {pipeline_mode = #tpu.pipeline_mode<synchronous>, transform_indices = @transform_5, window_bounds = array<i64: 8, 128>}]} {
    %c0 = arith.constant 0 : index
    %c0_0 = arith.constant 0 : index
    %0 = vector.load %arg1[%c0, %c0_0] : memref<8x64xbf16, #tpu.memory_space<vmem>>, vector<8x64xbf16>
    %c0_1 = arith.constant 0 : index
    %c0_2 = arith.constant 0 : index
    %1 = vector.load %arg2[%c0_1, %c0_2] : memref<64x128xbf16, #tpu.memory_space<vmem>>, vector<64x128xbf16>
    %cst = arith.constant dense<0.000000e+00> : vector<8x128xf32>
    %2 = tpu.matmul %0, %1, %cst {dimension_numbers = #tpu.dot_dimension_numbers<[1], [0], [0], [1], [0, 0, 1, 1], [], []>} : vector<8x64xbf16>, vector<64x128xbf16>, vector<8x128xf32> -> vector<8x128xf32>
    %c0_3 = arith.constant 0 : index
    %c0_4 = arith.constant 0 : index
    %3 = vector.load %arg3[%c0_3, %c0_4] : memref<1x128xf32, #tpu.memory_space<vmem>>, vector<1x128xf32>
    %4 = vector.broadcast %3 : vector<1x128xf32> to vector<8x128xf32>
    %5 = arith.addf %2, %4 : vector<8x128xf32>
    %cst_5 = arith.constant 0.000000e+00 : f32
    %6 = vector.broadcast %cst_5 : f32 to vector<8x128xf32>
    %7 = arith.maximumf %5, %6 : vector<8x128xf32>
    %8 = arith.truncf %7 : vector<8x128xf32> to vector<8x128xbf16>
    %c0_6 = arith.constant 0 : index
    %c0_7 = arith.constant 0 : index
    %9 = vector.load %arg4[%c0_6, %c0_7] : memref<128x128xbf16, #tpu.memory_space<vmem>>, vector<128x128xbf16>
    %cst_8 = arith.constant dense<0.000000e+00> : vector<8x128xf32>
    %10 = tpu.matmul %8, %9, %cst_8 {dimension_numbers = #tpu.dot_dimension_numbers<[1], [0], [0], [1], [0, 0, 1, 1], [], []>} : vector<8x128xbf16>, vector<128x128xbf16>, vector<8x128xf32> -> vector<8x128xf32>
    %c0_9 = arith.constant 0 : index
    %c0_10 = arith.constant 0 : index
    %11 = vector.load %arg5[%c0_9, %c0_10] : memref<1x128xf32, #tpu.memory_space<vmem>>, vector<1x128xf32>
    %12 = vector.broadcast %11 : vector<1x128xf32> to vector<8x128xf32>
    %13 = arith.addf %10, %12 : vector<8x128xf32>
    %c0_11 = arith.constant 0 : index
    %c0_12 = arith.constant 0 : index
    %14 = vector.load %arg6[%c0_11, %c0_12] : memref<8x128xf32, #tpu.memory_space<vmem>>, vector<8x128xf32>
    tpu.vector_store %arg6[%c0_11, %c0_12], %13 {strides = array<i32>} : memref<8x128xf32, #tpu.memory_space<vmem>>, vector<8x128xf32>,
    return
  }
  func.func @transform_0(%arg0: i32) -> (i32, i32) {
    %c0_i32 = arith.constant 0 : i32
    %c0_i32_0 = arith.constant 0 : i32
    %c0_i32_1 = arith.constant 0 : i32
    return %c0_i32, %c0_i32_0 : i32, i32
  }
  func.func @transform_1(%arg0: i32) -> (i32, i32) {
    %c0_i32 = arith.constant 0 : i32
    %c0_i32_0 = arith.constant 0 : i32
    %c0_i32_1 = arith.constant 0 : i32
    return %c0_i32, %c0_i32_0 : i32, i32
  }
  func.func @transform_2(%arg0: i32) -> (i32, i32) {
    %c0_i32 = arith.constant 0 : i32
    %c0_i32_0 = arith.constant 0 : i32
    %c0_i32_1 = arith.constant 0 : i32
    return %c0_i32, %c0_i32_0 : i32, i32
  }
  func.func @transform_3(%arg0: i32) -> (i32, i32) {
    %c0_i32 = arith.constant 0 : i32
    %c0_i32_0 = arith.constant 0 : i32
    %c0_i32_1 = arith.constant 0 : i32
    return %c0_i32, %c0_i32_0 : i32, i32
  }
  func.func @transform_4(%arg0: i32) -> (i32, i32) {
    %c0_i32 = arith.constant 0 : i32
    %c0_i32_0 = arith.constant 0 : i32
    %c0_i32_1 = arith.constant 0 : i32
    return %c0_i32, %c0_i32_0 : i32, i32
  }
  func.func @transform_5(%arg0: i32) -> (i32, i32) {
    %c0_i32 = arith.constant 0 : i32
    %c0_i32_0 = arith.constant 0 : i32
    %c0_i32_1 = arith.constant 0 : i32
    return %c0_i32, %c0_i32_0 : i32, i32
  }
}

</mosaic_0001>

<bundles_post_ra>
// kernel: cnn_forward.4
= control target key start
LH: loop header
LB: loop body
LE: loop exit
PB: predicated region body
PF: predicated region fallthrough
CT: control target
= control target key end

     0   :  { %s2668_s21 = smov 0   ;;  %s3183_s0 = inlined_call_operand.vmem [shape: bf16[512,9], index: 0, kind: input, shape index: {}]   ;;  %s3184_s1 = inlined_call_operand.vmem [shape: bf16[512,9], index: 1, kind: input, shape index: {}]   ;;  %s3185_s2 = inlined_call_operand.vmem [shape: bf16[512,9], index: 2, kind: input, shape index: {}]   ;;  %s3186_s3 = inlined_call_operand.vmem [shape: bf16[512,9], index: 3, kind: input, shape index: {}]   ;;  %s3187_s4 = inlined_call_operand.vmem [shape: bf16[9,128], index: 4, kind: input, shape index: {}]   ;;  %s3188_s5 = inlined_call_operand.vmem [shape: f32[1,128], index: 5, kind: input, shape index: {}]   ;;  %s3189_s6 = inlined_call_operand.vmem [shape: bf16[512,128], index: 6, kind: output, shape index: {}]  }
   0x1 LB: > { %s2040_s22 = sadd.s32 4294967295, %s2630_s21   ;;  %p2044_p0 = scmp.ge.s32.totalorder %s2630_s21, 1  ;;  %s2630_s21 = sphi %s2668_s21, %s16_s21  }
   0x2   : > { %p246_p1 = scmp.lt.s32.totalorder %s2630_s21, 3 }
   0x4   : > { %p247_p2 = pnand %p2044_p0, %p246_p1 }
   0x6   : > { %250 = sbr.rel (%p247_p2) target bundleno = 368 (0x170), region = 44 }
   0xd   : > { %v2559_v0 = vld [vmem:[%s3187_s4] sm:$0x1f]   ;;  %vm490_vm0 = vcmask 1043456   ;;  %vm491_vm1 = vcmask 1044480   ;;  %s2045_s25 = sshll.u32 %s2040_s22, 5  ;;  %v2632_v1 = vmov 65535  }
   0xe   : > { %v492_v2 = vsel %vm490_vm0, 4294967295, %v2632_v1  ;;  %p292_p3 = scmp.lt.s32.totalorder %s2045_s25, 63  ;;  %vm441_vm2 = vcmask 72704  }
   0xf   : > { %v493_v3 = vsel %vm491_vm1, %v492_v2, 0 }
  0x10   : > { %v495_v4 = vand.u32 %v2559_v0, %v493_v3  ;;  %s3274_s25 = smov (!%p292_p3, %s2045_s25), 63 }
  0x11   : > { %s2679_s26 = sshll.u32 %s3274_s25, 2 }
  0x12   : > { %2414 = vmatprep.subr.bf16.mxu0 %v495_v4  ;;  %2448 = vmatprep.subr.bf16.mxu1 %v495_v4  ;;  %s2685_s29 = scalar_lea.vmem %s3183_s0, %s2679_s26  ;;  %s2691_s8 = scalar_lea.vmem %s3184_s1, %s2679_s26 }
  0x13   : > { %2415 = vmatpush3.bf16.msra.mxu0 %v495_v4  ;;  %2449 = vmatpush3.bf16.msra.mxu1 %v495_v4  ;;  %v2560_v5 = vld [vmem:[%s2685_s29] sm:$0xff]   ;;  %v2562_v7 = vld [vmem:[%s2685_s29 + $0x8] sm:$0xff]   ;;  %v2564_v9 = vld [vmem:[%s2685_s29 + $0x10] sm:$0xff]   ;;  %s2734_s11 = scalar_lea.vmem %s3185_s2, %s2679_s26  ;;  %s2741_s14 = scalar_lea.vmem %s3186_s3, %s2679_s26 }
  0x14   : > { %2482 = vmatprep.subr.bf16.mxu0 %v495_v4  ;;  %2516 = vmatprep.subr.bf16.mxu1 %v495_v4  ;;  %v2561_v6 = vld [vmem:[%s2691_s8] sm:$0xff]   ;;  %v2563_v8 = vld [vmem:[%s2691_s8 + $0x8] sm:$0xff]   ;;  %v2565_v10 = vld [vmem:[%s2691_s8 + $0x10] sm:$0xff]   ;;  %s3050_s19 = scalar_lea.vmem %s3189_s6, %s2679_s26 }
  0x15   : > { %2416 = vmatprep.mubr.msk.bf16.mxu0 %vm441_vm2, %v2560_v5  ;;  %2450 = vmatprep.mubr.msk.bf16.mxu1 %vm441_vm2, %v2561_v6  ;;  %v2566_v11 = vld [vmem:[%s2685_s29 + $0x18] sm:$0xff]   ;;  %v2568_v13 = vld [vmem:[%s2685_s29 + $0x20] sm:$0xff]   ;;  %v2570_v15 = vld [vmem:[%s2685_s29 + $0x28] sm:$0xff]  }
  0x16   : > { %2417 = vmatmul.mubr.msk.bf16.vlgmr.msra.gmra.mrb[0].mxu0 %vm441_vm2, %v2562_v7  ;;  %2451 = vmatmul.mubr.msk.bf16.vlgmr.msra.gmra.mrb[0].mxu1 %vm441_vm2, %v2563_v8  ;;  %v2567_v12 = vld [vmem:[%s2691_s8 + $0x18] sm:$0xff]   ;;  %v2569_v14 = vld [vmem:[%s2691_s8 + $0x20] sm:$0xff]   ;;  %v2571_v16 = vld [vmem:[%s2691_s8 + $0x28] sm:$0xff]  }
  0x17   : > { %2483 = vmatpush3.bf16.msra.mxu0 %v495_v4  ;;  %2517 = vmatpush3.bf16.msra.mxu1 %v495_v4  ;;  %v2572_v17 = vld [vmem:[%s2685_s29 + $0x30] sm:$0xff]   ;;  %v2574_v19 = vld [vmem:[%s2685_s29 + $0x38] sm:$0xff]   ;;  %v2576_v21 = vld [vmem:[%s2685_s29 + $0x40] sm:$0xff]  }
  0x18   : > { %2420 = vmatprep.mubr.msk.bf16.mxu0 %vm441_vm2, %v2564_v9  ;;  %2454 = vmatprep.mubr.msk.bf16.mxu1 %vm441_vm2, %v2565_v10  ;;  %v2573_v18 = vld [vmem:[%s2691_s8 + $0x30] sm:$0xff]   ;;  %v2575_v20 = vld [vmem:[%s2691_s8 + $0x38] sm:$0xff]   ;;  %v2577_v22 = vld [vmem:[%s2691_s8 + $0x40] sm:$0xff]  }
  0x19   : > { %v2578_v23 = vld [vmem:[%s2685_s29 + $0x48] sm:$0xff]   ;;  %v2580_v25 = vld [vmem:[%s2685_s29 + $0x50] sm:$0xff]   ;;  %v2582_v27 = vld [vmem:[%s2685_s29 + $0x58] sm:$0xff]  }
  0x1a   : > { %v2579_v24 = vld [vmem:[%s2691_s8 + $0x48] sm:$0xff]   ;;  %v2581_v26 = vld [vmem:[%s2691_s8 + $0x50] sm:$0xff]   ;;  %v2583_v28 = vld [vmem:[%s2691_s8 + $0x58] sm:$0xff]  }
  0x1b   : > { %v2584_v29 = vld [vmem:[%s2685_s29 + $0x60] sm:$0xff]   ;;  %v2586_v31 = vld [vmem:[%s2685_s29 + $0x68] sm:$0xff]   ;;  %v2588_v33 = vld [vmem:[%s2685_s29 + $0x70] sm:$0xff]  }
  0x1c   : > { %v2585_v30 = vld [vmem:[%s2691_s8 + $0x60] sm:$0xff]   ;;  %v2587_v32 = vld [vmem:[%s2691_s8 + $0x68] sm:$0xff]   ;;  %v2589_v34 = vld [vmem:[%s2691_s8 + $0x70] sm:$0xff]  }
  0x1d   : > { %v2590_v35 = vld [vmem:[%s2685_s29 + $0x78] sm:$0xff]   ;;  %v2592_v37 = vld [vmem:[%s2734_s11] sm:$0xff]   ;;  %v2594_v39 = vld [vmem:[%s2734_s11 + $0x8] sm:$0xff]  }
  0x1e   : > { %2421 = vmatmul.mubr.msk.bf16.gmra.mrb[4].mxu0 %vm441_vm2, %v2566_v11  ;;  %2455 = vmatmul.mubr.msk.bf16.gmra.mrb[4].mxu1 %vm441_vm2, %v2567_v12  ;;  %v2591_v36 = vld [vmem:[%s2691_s8 + $0x78] sm:$0xff]   ;;  %v2593_v38 = vld [vmem:[%s2741_s14] sm:$0xff]   ;;  %v2595_v40 = vld [vmem:[%s2741_s14 + $0x8] sm:$0xff]  }
  0x1f   : > { %2424 = vmatprep.mubr.msk.bf16.mxu0 %vm441_vm2, %v2568_v13  ;;  %2458 = vmatprep.mubr.msk.bf16.mxu1 %vm441_vm2, %v2569_v14  ;;  %v2596_v41 = vld [vmem:[%s2734_s11 + $0x10] sm:$0xff]   ;;  %v2598_v43 = vld [vmem:[%s2734_s11 + $0x18] sm:$0xff]   ;;  %v2600_v45 = vld [vmem:[%s2734_s11 + $0x20] sm:$0xff]  }
  0x20   : > { %v2597_v42 = vld [vmem:[%s2741_s14 + $0x10] sm:$0xff]   ;;  %v2599_v44 = vld [vmem:[%s2741_s14 + $0x18] sm:$0xff]   ;;  %v2601_v46 = vld [vmem:[%s2741_s14 + $0x20] sm:$0xff]  }
  0x21   : > { %v2602_v47 = vld [vmem:[%s2734_s11 + $0x28] sm:$0xff]   ;;  %v2604_v49 = vld [vmem:[%s2734_s11 + $0x30] sm:$0xff]   ;;  %v2606_v51 = vld [vmem:[%s2734_s11 + $0x38] sm:$0xff]  }
  0x22   : > { %v2603_v48 = vld [vmem:[%s2741_s14 + $0x28] sm:$0xff]   ;;  %v2605_v50 = vld [vmem:[%s2741_s14 + $0x30] sm:$0xff]   ;;  %v2607_v52 = vld [vmem:[%s2741_s14 + $0x38] sm:$0xff]  }
  0x23   : > { %v2608_v53 = vld [vmem:[%s2734_s11 + $0x40] sm:$0xff]   ;;  %v2610_v55 = vld [vmem:[%s2734_s11 + $0x48] sm:$0xff]   ;;  %v2612_v57 = vld [vmem:[%s2734_s11 + $0x50] sm:$0xff]  }
  0x24   : > { %v2609_v54 = vld [vmem:[%s2741_s14 + $0x40] sm:$0xff]   ;;  %v2611_v56 = vld [vmem:[%s2741_s14 + $0x48] sm:$0xff]   ;;  %v2613_v58 = vld [vmem:[%s2741_s14 + $0x50] sm:$0xff]  }
  0x25   : > { %v2614_v59 = vld [vmem:[%s2734_s11 + $0x58] sm:$0xff]   ;;  %v2616_v61 = vld [vmem:[%s2734_s11 + $0x60] sm:$0xff]   ;;  %v2618_v63 = vld [vmem:[%s2734_s11 + $0x68] sm:$0xff]  }
  0x26   : > { %2425 = vmatmul.mubr.msk.bf16.gmra.mrb[8].mxu0 %vm441_vm2, %v2570_v15  ;;  %2459 = vmatmul.mubr.msk.bf16.gmra.mrb[8].mxu1 %vm441_vm2, %v2571_v16  ;;  %v2615_v60 = vld [vmem:[%s2741_s14 + $0x58] sm:$0xff]   ;;  %v2617_v62 = vld [vmem:[%s2741_s14 + $0x60] sm:$0xff]   ;;  %v2619_v0 = vld [vmem:[%s2741_s14 + $0x68] sm:$0xff]  }
  0x27   : > { %2428 = vmatprep.mubr.msk.bf16.mxu0 %vm441_vm2, %v2572_v17  ;;  %2462 = vmatprep.mubr.msk.bf16.mxu1 %vm441_vm2, %v2573_v18  ;;  %v2620_v1 = vld [vmem:[%s2734_s11 + $0x70] sm:$0xff]   ;;  %v2622_v3 = vld [vmem:[%s2734_s11 + $0x78] sm:$0xff]  }
  0x28   : > { %v2621_v2 = vld [vmem:[%s2741_s14 + $0x70] sm:$0xff]   ;;  %v2623_v4 = vld [vmem:[%s2741_s14 + $0x78] sm:$0xff]  }
  0x2e   : > { %2429 = vmatmul.mubr.msk.bf16.gmra.mrb[12].mxu0 %vm441_vm2, %v2574_v19  ;;  %2463 = vmatmul.mubr.msk.bf16.gmra.mrb[12].mxu1 %vm441_vm2, %v2575_v20 }
  0x2f   : > { %2432 = vmatprep.mubr.msk.bf16.mxu0 %vm441_vm2, %v2576_v21  ;;  %2466 = vmatprep.mubr.msk.bf16.mxu1 %vm441_vm2, %v2577_v22 }
  0x36   : > { %2433 = vmatmul.mubr.msk.bf16.gmra.mrb[16].mxu0 %vm441_vm2, %v2578_v23  ;;  %2467 = vmatmul.mubr.msk.bf16.gmra.mrb[16].mxu1 %vm441_vm2, %v2579_v24 }
  0x37   : > { %2436 = vmatprep.mubr.msk.bf16.mxu0 %vm441_vm2, %v2580_v25  ;;  %2470 = vmatprep.mubr.msk.bf16.mxu1 %vm441_vm2, %v2581_v26 }
  0x3e   : > { %2437 = vmatmul.mubr.msk.bf16.gmra.mrb[20].mxu0 %vm441_vm2, %v2582_v27  ;;  %2471 = vmatmul.mubr.msk.bf16.gmra.mrb[20].mxu1 %vm441_vm2, %v2583_v28 }
  0x3f   : > { %2440 = vmatprep.mubr.msk.bf16.mxu0 %vm441_vm2, %v2584_v29  ;;  %2474 = vmatprep.mubr.msk.bf16.mxu1 %vm441_vm2, %v2585_v30 }
  0x46   : > { %2441 = vmatmul.mubr.msk.bf16.gmra.mrb[24].mxu0 %vm441_vm2, %v2586_v31  ;;  %2475 = vmatmul.mubr.msk.bf16.gmra.mrb[24].mxu1 %vm441_vm2, %v2587_v32 }
  0x47   : > { %2444 = vmatprep.mubr.msk.bf16.mxu0 %vm441_vm2, %v2588_v33  ;;  %2478 = vmatprep.mubr.msk.bf16.mxu1 %vm441_vm2, %v2589_v34 }
  0x4e   : > { %2445 = vmatmul.mubr.msk.bf16.gmra.mrb[28].mxu0 %vm441_vm2, %v2590_v35  ;;  %2479 = vmatmul.mubr.msk.bf16.gmra.mrb[28].mxu1 %vm441_vm2, %v2591_v36 }
  0x4f   : > { %2484 = vmatprep.mubr.msk.bf16.mxu0 %vm441_vm2, %v2592_v37  ;;  %2518 = vmatprep.mubr.msk.bf16.mxu1 %vm441_vm2, %v2593_v38 }
  0x56   : > { %2485 = vmatmul.mubr.msk.bf16.vlgmr.msra.gmra.mrb[32].mxu0 %vm441_vm2, %v2594_v39  ;;  %2519 = vmatmul.mubr.msk.bf16.vlgmr.msra.gmra.mrb[32].mxu1 %vm441_vm2, %v2595_v40 }
  0x57   : > { %2488 = vmatprep.mubr.msk.bf16.mxu0 %vm441_vm2, %v2596_v41  ;;  %2522 = vmatprep.mubr.msk.bf16.mxu1 %vm441_vm2, %v2597_v42 }
  0x5e   : > { %2489 = vmatmul.mubr.msk.bf16.gmra.mrb[36].mxu0 %vm441_vm2, %v2598_v43  ;;  %2523 = vmatmul.mubr.msk.bf16.gmra.mrb[36].mxu1 %vm441_vm2, %v2599_v44  ;;  %v3028_v44 = vld [vmem:[%s3188_s5] ss:$0 sm:$0xff] }
  0x5f   : > { %2492 = vmatprep.mubr.msk.bf16.mxu0 %vm441_vm2, %v2600_v45  ;;  %2526 = vmatprep.mubr.msk.bf16.mxu1 %vm441_vm2, %v2601_v46 }
  0x66   : > { %2493 = vmatmul.mubr.msk.bf16.gmra.mrb[40].mxu0 %vm441_vm2, %v2602_v47  ;;  %2527 = vmatmul.mubr.msk.bf16.gmra.mrb[40].mxu1 %vm441_vm2, %v2603_v48 }
  0x67   : > { %2496 = vmatprep.mubr.msk.bf16.mxu0 %vm441_vm2, %v2604_v49  ;;  %2530 = vmatprep.mubr.msk.bf16.mxu1 %vm441_vm2, %v2605_v50 }
  0x6e   : > { %2497 = vmatmul.mubr.msk.bf16.gmra.mrb[44].mxu0 %vm441_vm2, %v2606_v51  ;;  %2531 = vmatmul.mubr.msk.bf16.gmra.mrb[44].mxu1 %vm441_vm2, %v2607_v52 }
  0x6f   : > { %2500 = vmatprep.mubr.msk.bf16.mxu0 %vm441_vm2, %v2608_v53  ;;  %2534 = vmatprep.mubr.msk.bf16.mxu1 %vm441_vm2, %v2609_v54 }
  0x76   : > { %2501 = vmatmul.mubr.msk.bf16.gmra.mrb[48].mxu0 %vm441_vm2, %v2610_v55  ;;  %2535 = vmatmul.mubr.msk.bf16.gmra.mrb[48].mxu1 %vm441_vm2, %v2611_v56 }
  0x77   : > { %2504 = vmatprep.mubr.msk.bf16.mxu0 %vm441_vm2, %v2612_v57  ;;  %2538 = vmatprep.mubr.msk.bf16.mxu1 %vm441_vm2, %v2613_v58 }
  0x7e   : > { %2505 = vmatmul.mubr.msk.bf16.gmra.mrb[52].mxu0 %vm441_vm2, %v2614_v59  ;;  %2539 = vmatmul.mubr.msk.bf16.gmra.mrb[52].mxu1 %vm441_vm2, %v2615_v60 }
  0x7f   : > { %2508 = vmatprep.mubr.msk.bf16.mxu0 %vm441_vm2, %v2616_v61  ;;  %2542 = vmatprep.mubr.msk.bf16.mxu1 %vm441_vm2, %v2617_v62 }
  0x86   : > { %2509 = vmatmul.mubr.msk.bf16.gmra.mrb[56].mxu0 %vm441_vm2, %v2618_v63  ;;  %2543 = vmatmul.mubr.msk.bf16.gmra.mrb[56].mxu1 %vm441_vm2, %v2619_v0 }
  0x87   : > { %2512 = vmatprep.mubr.msk.bf16.mxu0 %vm441_vm2, %v2620_v1  ;;  %2546 = vmatprep.mubr.msk.bf16.mxu1 %vm441_vm2, %v2621_v2 }
  0x8e   : > { %2513 = vmatmul.mubr.msk.bf16.gmra.mrb[60].mxu0 %vm441_vm2, %v2622_v3  ;;  %2547 = vmatmul.mubr.msk.bf16.gmra.mrb[60].mxu1 %vm441_vm2, %v2623_v4 }
  0xe9   : > { %v2833_v5 = vpop.f32.mrb[0].mxu0  ;;  %v2835_v6 = vpop.f32.mrb[0].mxu1 }
  0xea   : > { %v2837_v7 = vpop.f32.mrb[1].mxu0  ;;  %v2841_v9 = vpop.f32.mrb[1].mxu1  ;;  %v3224_v20 = vmax.f32 %v2833_v5, %v2835_v6 }
  0xeb   : > { %v2843_v10 = vpop.f32.mrb[2].mxu0  ;;  %v2847_v12 = vpop.f32.mrb[2].mxu1 }
  0xec   : > { %v2849_v13 = vpop.f32.mrb[3].mxu0  ;;  %v2853_v15 = vpop.f32.mrb[3].mxu1 }
  0xed   : > { %v3227_v5 = vmax.f32 %v2849_v13, %v2853_v15 }
  0xf1   : > { %v2857_v17 = vpop.f32.mrb[4].mxu0  ;;  %v2859_v18 = vpop.f32.mrb[4].mxu1 }
  0xf2   : > { %v2861_v19 = vpop.f32.mrb[5].mxu0  ;;  %v2865_v21 = vpop.f32.mrb[5].mxu1 }
  0xf3   : > { %v2867_v22 = vpop.f32.mrb[6].mxu0  ;;  %v2871_v24 = vpop.f32.mrb[6].mxu1 }
  0xf4   : > { %v2873_v25 = vpop.f32.mrb[7].mxu0  ;;  %v2877_v27 = vpop.f32.mrb[7].mxu1 }
  0xf9   : > { %v2881_v29 = vpop.f32.mrb[8].mxu0  ;;  %v2883_v30 = vpop.f32.mrb[8].mxu1 }
  0xfa   : > { %v2885_v31 = vpop.f32.mrb[9].mxu0  ;;  %v2889_v33 = vpop.f32.mrb[9].mxu1 }
  0xfb   : > { %v2891_v34 = vpop.f32.mrb[10].mxu0  ;;  %v2895_v36 = vpop.f32.mrb[10].mxu1 }
  0xfc   : > { %v2897_v37 = vpop.f32.mrb[11].mxu0  ;;  %v2901_v39 = vpop.f32.mrb[11].mxu1 }
 0x101   : > { %v2905_v41 = vpop.f32.mrb[12].mxu0  ;;  %v2907_v42 = vpop.f32.mrb[12].mxu1 }
 0x102   : > { %v2909_v43 = vpop.f32.mrb[13].mxu0  ;;  %v2913_v45 = vpop.f32.mrb[13].mxu1 }
 0x103   : > { %v2915_v46 = vpop.f32.mrb[14].mxu0  ;;  %v2919_v48 = vpop.f32.mrb[14].mxu1 }
 0x104   : > { %v2921_v49 = vpop.f32.mrb[15].mxu0  ;;  %v2925_v51 = vpop.f32.mrb[15].mxu1 }
 0x109   : > { %v2929_v53 = vpop.f32.mrb[16].mxu0  ;;  %v2931_v54 = vpop.f32.mrb[16].mxu1 }
 0x10a   : > { %v2933_v55 = vpop.f32.mrb[17].mxu0  ;;  %v2937_v57 = vpop.f32.mrb[17].mxu1 }
 0x10b   : > { %v2939_v58 = vpop.f32.mrb[18].mxu0  ;;  %v2943_v60 = vpop.f32.mrb[18].mxu1 }
 0x10c   : > { %v2945_v61 = vpop.f32.mrb[19].mxu0  ;;  %v2949_v63 = vpop.f32.mrb[19].mxu1 }
 0x111   : > { %v2953_v1 = vpop.f32.mrb[20].mxu0  ;;  %v2955_v2 = vpop.f32.mrb[20].mxu1 }
 0x112   : > { %v2957_v3 = vpop.f32.mrb[21].mxu0  ;;  %v2961_v59 = vpop.f32.mrb[21].mxu1 }
 0x113   : > { %v2963_v56 = vpop.f32.mrb[22].mxu0  ;;  %v2967_v52 = vpop.f32.mrb[22].mxu1 }
 0x114   : > { %v2969_v50 = vpop.f32.mrb[23].mxu0  ;;  %v2973_v47 = vpop.f32.mrb[23].mxu1 }
 0x115   : > { %3207 = vst [vmem:[#allocation2_spill] sm:$0xff] %v2973_v47  ;;  %v3226_v47 = vmax.f32 %v2843_v10, %v2847_v12 }
 0x119   : > { %v2977_v4 = vpop.f32.mrb[24].mxu0  ;;  %v2979_v40 = vpop.f32.mrb[24].mxu1 }
 0x11a   : > { %3208 = vst [vmem:[#allocation3_spill] sm:$0xff] %v2977_v4  ;;  %3209 = vst [vmem:[#allocation4_spill] sm:$0xff] %v2979_v40  ;;  %v2981_v38 = vpop.f32.mrb[25].mxu0  ;;  %v2985_v35 = vpop.f32.mrb[25].mxu1 }
 0x11b   : > { %3210 = vst [vmem:[#allocation5_spill] sm:$0xff] %v2981_v38  ;;  %3211 = vst [vmem:[#allocation6_spill] sm:$0xff] %v2985_v35  ;;  %v2987_v32 = vpop.f32.mrb[26].mxu0  ;;  %v2991_v28 = vpop.f32.mrb[26].mxu1 }
 0x11c   : > { %3212 = vst [vmem:[#allocation7_spill] sm:$0xff] %v2987_v32  ;;  %3213 = vst [vmem:[#allocation8_spill] sm:$0xff] %v2991_v28  ;;  %v2993_v26 = vpop.f32.mrb[27].mxu0  ;;  %v2997_v23 = vpop.f32.mrb[27].mxu1 }
 0x11d   : > { %3214 = vst [vmem:[#allocation9_spill] sm:$0xff] %v2993_v26  ;;  %3215 = vst [vmem:[#allocation10_spill] sm:$0xff] %v2997_v23 }
 0x121   : > { %v3001_v62 = vpop.f32.mrb[28].mxu0  ;;  %v3003_v16 = vpop.f32.mrb[28].mxu1 }
 0x122   : > { %3216 = vst [vmem:[#allocation11_spill] sm:$0xff] %v3001_v62  ;;  %3217 = vst [vmem:[#allocation12_spill] sm:$0xff] %v3003_v16  ;;  %v3005_v14 = vpop.f32.mrb[29].mxu0  ;;  %v3009_v11 = vpop.f32.mrb[29].mxu1 }
 0x123   : > { %3218 = vst [vmem:[#allocation13_spill] sm:$0xff] %v3005_v14  ;;  %3219 = vst [vmem:[#allocation14_spill] sm:$0xff] %v3009_v11  ;;  %v3011_v8 = vpop.f32.mrb[30].mxu0  ;;  %v3015_v28 = vpop.f32.mrb[30].mxu1 }
 0x124   : > { %3220 = vst [vmem:[#allocation15_spill] sm:$0xff] %v3011_v8  ;;  %3221 = vst [vmem:[#allocation16_spill] sm:$0xff] %v3015_v28  ;;  %v3017_v32 = vpop.f32.mrb[31].mxu0  ;;  %v3021_v23 = vpop.f32.mrb[31].mxu1 }
 0x125   : > { %3222 = vst [vmem:[#allocation17_spill] sm:$0xff] %v3017_v32  ;;  %3223 = vst [vmem:[#allocation18_spill] sm:$0xff] %v3021_v23  ;;  %v3225_v23 = vmax.f32 %v2837_v7, %v2841_v9 }
 0x129   : > { %v2486_v0 = vpop.f32.mrb[32].mxu0  ;;  %v2520_v16 = vpop.f32.mrb[32].mxu1 }
 0x12a   : > { %v1173_v62 = vpop.f32.mrb[33].mxu0  ;;  %v1655_v35 = vmax.f32 %v2486_v0, %v2520_v16  ;;  %v1494_v38 = vpop.f32.mrb[33].mxu1 }
 0x12b   : > { %v2487_v40 = vpop.f32.mrb[34].mxu0  ;;  %v1653_v11 = vmax.f32 %v1173_v62, %v1494_v38  ;;  %v2521_v14 = vpop.f32.mrb[34].mxu1 }
 0x12c   : > { %v1176_v4 = vpop.f32.mrb[35].mxu0  ;;  %v1687_v28 = vmax.f32 %v3224_v20, %v1655_v35  ;;  %v1656_v8 = vmax.f32 %v2487_v40, %v2521_v14  ;;  %v1497_v26 = vpop.f32.mrb[35].mxu1 }
 0x12d   : > { %v1685_v16 = vmax.f32 %v3225_v23, %v1653_v11  ;;  %v1654_v0 = vmax.f32 %v1176_v4, %v1497_v26 }
 0x12e   : > { %v1726_v32 = vadd.f32 %v3028_v44, %v1687_v28  ;;  %v1688_v38 = vmax.f32 %v3226_v47, %v1656_v8 }
 0x12f   : > { %v1724_v62 = vadd.f32 %v3028_v44, %v1685_v16  ;;  %v1686_v6 = vmax.f32 %v3227_v5, %v1654_v0 }
 0x130   : > { %v1727_v14 = vadd.f32 %v3028_v44, %v1688_v38  ;;  %v1758_v23 = vmax.f32 %v1726_v32, 0.0  ;;  %v3228_v32 = vmax.f32 %v2857_v17, %v2859_v18  ;;  %v3231_v17 = vmax.f32 %v2873_v25, %v2877_v27 }
 0x131   : > { %v2490_v20 = vpop.f32.mrb[36].mxu0  ;;  %v1725_v7 = vadd.f32 %v3028_v44, %v1686_v6  ;;  %v2524_v9 = vpop.f32.mrb[36].mxu1  ;;  %v1756_v10 = vmax.f32 %v1724_v62, 0.0  ;;  %v3229_v62 = vmax.f32 %v2861_v19, %v2865_v21 }
 0x132   : > { %v1189_v11 = vpop.f32.mrb[37].mxu0  ;;  %v1759_v26 = vmax.f32 %v1727_v14, 0.0  ;;  %v1659_v28 = vmax.f32 %v2490_v20, %v2524_v9  ;;  %v1510_v35 = vpop.f32.mrb[37].mxu1  ;;  %v3230_v20 = vmax.f32 %v2867_v22, %v2871_v24 }
 0x133   : > { %v2491_v40 = vpop.f32.mrb[38].mxu0  ;;  %v1757_v8 = vmax.f32 %v1725_v7, 0.0  ;;  %v1657_v12 = vmax.f32 %v1189_v11, %v1510_v35  ;;  %v2525_v13 = vpop.f32.mrb[38].mxu1 }
 0x134   : > { %v1192_v15 = vpop.f32.mrb[39].mxu0  ;;  %v2259_v47 = vpack.c.bf16 %v1759_v26, %v1758_v23  ;;  %v1691_v4 = vmax.f32 %v3228_v32, %v1659_v28  ;;  %v1660_v16 = vmax.f32 %v2491_v40, %v2525_v13  ;;  %v1513_v0 = vpop.f32.mrb[39].mxu1 }
 0x135   : > { %v2254_v38 = vpack.c.bf16 %v1757_v8, %v1756_v10  ;;  %v1689_v5 = vmax.f32 %v3229_v62, %v1657_v12  ;;  %v1658_v6 = vmax.f32 %v1192_v15, %v1513_v0  ;;  %v3232_v15 = vmax.f32 %v2881_v29, %v2883_v30 }
 0x136   : > { %2331 = vst [vmem:[%s3050_s19 + $0x8] sm:$0xff] %v2259_v47   ;;  %v1730_v14 = vadd.f32 %v3028_v44, %v1691_v4  ;;  %v1692_v7 = vmax.f32 %v3230_v20, %v1660_v16  ;;  %v3233_v0 = vmax.f32 %v2885_v31, %v2889_v33  ;;  %v3235_v29 = vmax.f32 %v2897_v37, %v2901_v39 }
 0x137   : > { %2255 = vst [vmem:[%s3050_s19] sm:$0xff] %v2254_v38   ;;  %v1728_v9 = vadd.f32 %v3028_v44, %v1689_v5  ;;  %v1690_v18 = vmax.f32 %v3231_v17, %v1658_v6  ;;  %v3234_v6 = vmax.f32 %v2891_v34, %v2895_v36 }
 0x138   : > { %v1731_v11 = vadd.f32 %v3028_v44, %v1692_v7  ;;  %v1762_v28 = vmax.f32 %v1730_v14, 0.0 }
 0x139   : > { %v2494_v23 = vpop.f32.mrb[40].mxu0  ;;  %v1729_v19 = vadd.f32 %v3028_v44, %v1690_v18  ;;  %v2528_v21 = vpop.f32.mrb[40].mxu1  ;;  %v1760_v10 = vmax.f32 %v1728_v9, 0.0 }
 0x13a   : > { %v1205_v26 = vpop.f32.mrb[41].mxu0  ;;  %v1763_v35 = vmax.f32 %v1731_v11, 0.0  ;;  %v1663_v40 = vmax.f32 %v2494_v23, %v2528_v21  ;;  %v1526_v22 = vpop.f32.mrb[41].mxu1 }
 0x13b   : > { %v2495_v24 = vpop.f32.mrb[42].mxu0  ;;  %v1761_v8 = vmax.f32 %v1729_v19, 0.0  ;;  %v1661_v12 = vmax.f32 %v1205_v26, %v1526_v22  ;;  %v2529_v13 = vpop.f32.mrb[42].mxu1 }
 0x13c   : > { %v1208_v25 = vpop.f32.mrb[43].mxu0  ;;  %v2269_v27 = vpack.c.bf16 %v1763_v35, %v1762_v28  ;;  %v1695_v47 = vmax.f32 %v3232_v15, %v1663_v40  ;;  %v1664_v32 = vmax.f32 %v2495_v24, %v2529_v13  ;;  %v1529_v4 = vpop.f32.mrb[43].mxu1  ;;  %v3236_v35 = vmax.f32 %v2905_v41, %v2907_v42 }
 0x13d   : > { %v2264_v16 = vpack.c.bf16 %v1761_v8, %v1760_v10  ;;  %v1693_v38 = vmax.f32 %v3233_v0, %v1661_v12  ;;  %v1662_v62 = vmax.f32 %v1208_v25, %v1529_v4  ;;  %v3237_v8 = vmax.f32 %v2909_v43, %v2913_v45 }
 0x13e   : > { %2333 = vst [vmem:[%s3050_s19 + $0x18] sm:$0xff] %v2269_v27   ;;  %v1734_v5 = vadd.f32 %v3028_v44, %v1695_v47  ;;  %v1696_v14 = vmax.f32 %v3234_v6, %v1664_v32  ;;  %v3238_v27 = vmax.f32 %v2915_v46, %v2919_v48  ;;  %v3239_v41 = vmax.f32 %v2921_v49, %v2925_v51 }
 0x13f   : > { %2332 = vst [vmem:[%s3050_s19 + $0x10] sm:$0xff] %v2264_v16   ;;  %v1732_v20 = vadd.f32 %v3028_v44, %v1693_v38  ;;  %v1694_v30 = vmax.f32 %v3235_v29, %v1662_v62  ;;  %v3240_v29 = vmax.f32 %v2929_v53, %v2931_v54  ;;  %v3243_v53 = vmax.f32 %v2945_v61, %v2949_v63 }
 0x140   : > { %v1735_v7 = vadd.f32 %v3028_v44, %v1696_v14  ;;  %v1766_v18 = vmax.f32 %v1734_v5, 0.0 }
 0x141   : > { %v2498_v9 = vpop.f32.mrb[44].mxu0  ;;  %v1733_v31 = vadd.f32 %v3028_v44, %v1694_v30  ;;  %v2532_v33 = vpop.f32.mrb[44].mxu1  ;;  %v1764_v19 = vmax.f32 %v1732_v20, 0.0 }
 0x142   : > { %v1221_v17 = vpop.f32.mrb[45].mxu0  ;;  %v1767_v11 = vmax.f32 %v1735_v7, 0.0  ;;  %v1667_v23 = vmax.f32 %v2498_v9, %v2532_v33  ;;  %v1542_v34 = vpop.f32.mrb[45].mxu1  ;;  %v3241_v33 = vmax.f32 %v2933_v55, %v2937_v57 }
 0x143   : > { %v2499_v36 = vpop.f32.mrb[46].mxu0  ;;  %v1765_v21 = vmax.f32 %v1733_v31, 0.0  ;;  %v1665_v26 = vmax.f32 %v1221_v17, %v1542_v34  ;;  %v2533_v28 = vpop.f32.mrb[46].mxu1 }
 0x144   : > { %v1224_v37 = vpop.f32.mrb[47].mxu0  ;;  %v2279_v39 = vpack.c.bf16 %v1767_v11, %v1766_v18  ;;  %v1699_v40 = vmax.f32 %v3236_v35, %v1667_v23  ;;  %v1668_v22 = vmax.f32 %v2499_v36, %v2533_v28  ;;  %v1545_v24 = vpop.f32.mrb[47].mxu1  ;;  %v3242_v23 = vmax.f32 %v2939_v58, %v2943_v60 }
 0x145   : > { %v2274_v10 = vpack.c.bf16 %v1765_v21, %v1764_v19  ;;  %v1697_v12 = vmax.f32 %v3237_v8, %v1665_v26  ;;  %v1666_v13 = vmax.f32 %v1224_v37, %v1545_v24 }
 0x146   : > { %2335 = vst [vmem:[%s3050_s19 + $0x28] sm:$0xff] %v2279_v39   ;;  %v1738_v25 = vadd.f32 %v3028_v44, %v1699_v40  ;;  %v1700_v15 = vmax.f32 %v3238_v27, %v1668_v22  ;;  %v3245_v27 = vmax.f32 %v2957_v3, %v2961_v59 }
 0x147   : > { %2334 = vst [vmem:[%s3050_s19 + $0x20] sm:$0xff] %v2274_v10   ;;  %v1736_v47 = vadd.f32 %v3028_v44, %v1697_v12  ;;  %v1698_v42 = vmax.f32 %v3239_v41, %v1666_v13  ;;  %v3244_v10 = vmax.f32 %v2953_v1, %v2955_v2  ;;  %v3247_v1 = vld [vmem:[#allocation2_spill] sm:$0xff] }
 0x148   : > { %v1739_v32 = vadd.f32 %v3028_v44, %v1700_v15  ;;  %v1770_v0 = vmax.f32 %v1738_v25, 0.0  ;;  %v3248_v2 = vmax.f32 %v2969_v50, %v3247_v1 }
 0x149   : > { %v2502_v4 = vpop.f32.mrb[48].mxu0  ;;  %v1737_v43 = vadd.f32 %v3028_v44, %v1698_v42  ;;  %v2536_v45 = vpop.f32.mrb[48].mxu1  ;;  %v1768_v5 = vmax.f32 %v1736_v47, 0.0  ;;  %v3246_v42 = vmax.f32 %v2963_v56, %v2967_v52 }
 0x14a   : > { %v1237_v16 = vpop.f32.mrb[49].mxu0  ;;  %v1771_v38 = vmax.f32 %v1739_v32, 0.0  ;;  %v1671_v62 = vmax.f32 %v2502_v4, %v2536_v45  ;;  %v1558_v46 = vpop.f32.mrb[49].mxu1 }
 0x14b   : > { %v2503_v48 = vpop.f32.mrb[50].mxu0  ;;  %v1769_v6 = vmax.f32 %v1737_v43, 0.0  ;;  %v1669_v14 = vmax.f32 %v1237_v16, %v1558_v46  ;;  %v2537_v20 = vpop.f32.mrb[50].mxu1 }
 0x14c   : > { %v1240_v49 = vpop.f32.mrb[51].mxu0  ;;  %v2289_v51 = vpack.c.bf16 %v1771_v38, %v1770_v0  ;;  %v1703_v30 = vmax.f32 %v3240_v29, %v1671_v62  ;;  %v1672_v7 = vmax.f32 %v2503_v48, %v2537_v20  ;;  %v1561_v9 = vpop.f32.mrb[51].mxu1 }
 0x14d   : > { %v2284_v31 = vpack.c.bf16 %v1769_v6, %v1768_v5  ;;  %v1701_v17 = vmax.f32 %v3241_v33, %v1669_v14  ;;  %v1670_v18 = vmax.f32 %v1240_v49, %v1561_v9  ;;  %v3249_v49 = vld [vmem:[#allocation3_spill] sm:$0xff]  ;;  %v3252_v33 = vld [vmem:[#allocation5_spill] sm:$0xff] }
 0x14e   : > { %2337 = vst [vmem:[%s3050_s19 + $0x38] sm:$0xff] %v2289_v51   ;;  %v1742_v11 = vadd.f32 %v3028_v44, %v1703_v30  ;;  %v1704_v34 = vmax.f32 %v3242_v23, %v1672_v7  ;;  %v3250_v51 = vld [vmem:[#allocation4_spill] sm:$0xff] }
 0x14f   : > { %2336 = vst [vmem:[%s3050_s19 + $0x30] sm:$0xff] %v2284_v31   ;;  %v1740_v36 = vadd.f32 %v3028_v44, %v1701_v17  ;;  %v1702_v54 = vmax.f32 %v3243_v53, %v1670_v18  ;;  %v3251_v29 = vmax.f32 %v3249_v49, %v3250_v51  ;;  %v3253_v17 = vld [vmem:[#allocation6_spill] sm:$0xff]  ;;  %v3256_v53 = vld [vmem:[#allocation8_spill] sm:$0xff] }
 0x150   : > { %v1743_v19 = vadd.f32 %v3028_v44, %v1704_v34  ;;  %v1774_v28 = vmax.f32 %v1742_v11, 0.0  ;;  %v3254_v18 = vmax.f32 %v3252_v33, %v3253_v17 }
 0x151   : > { %v2506_v21 = vpop.f32.mrb[52].mxu0  ;;  %v1741_v55 = vadd.f32 %v3028_v44, %v1702_v54  ;;  %v2540_v57 = vpop.f32.mrb[52].mxu1  ;;  %v1772_v35 = vmax.f32 %v1740_v36, 0.0  ;;  %v3255_v36 = vld [vmem:[#allocation7_spill] sm:$0xff] }
 0x152   : > { %v1253_v26 = vpop.f32.mrb[53].mxu0  ;;  %v1775_v37 = vmax.f32 %v1743_v19, 0.0  ;;  %v1675_v39 = vmax.f32 %v2506_v21, %v2540_v57  ;;  %v1574_v58 = vpop.f32.mrb[53].mxu1  ;;  %v3257_v54 = vmax.f32 %v3255_v36, %v3256_v53  ;;  %v3259_v57 = vld [vmem:[#allocation10_spill] sm:$0xff] }
 0x153   : > { %v2507_v60 = vpop.f32.mrb[54].mxu0  ;;  %v1773_v40 = vmax.f32 %v1741_v55, 0.0  ;;  %v1673_v22 = vmax.f32 %v1253_v26, %v1574_v58  ;;  %v2541_v24 = vpop.f32.mrb[54].mxu1  ;;  %v3258_v55 = vld [vmem:[#allocation9_spill] sm:$0xff] }
 0x154   : > { %v1256_v61 = vpop.f32.mrb[55].mxu0  ;;  %v2299_v63 = vpack.c.bf16 %v1775_v37, %v1774_v28  ;;  %v1707_v8 = vmax.f32 %v3244_v10, %v1675_v39  ;;  %v1676_v12 = vmax.f32 %v2507_v60, %v2541_v24  ;;  %v1577_v13 = vpop.f32.mrb[55].mxu1  ;;  %v3260_v26 = vmax.f32 %v3258_v55, %v3259_v57 }
 0x155   : > { %v2294_v25 = vpack.c.bf16 %v1773_v40, %v1772_v35  ;;  %v1705_v15 = vmax.f32 %v3245_v27, %v1673_v22  ;;  %v1674_v47 = vmax.f32 %v1256_v61, %v1577_v13 }
 0x156   : > { %2339 = vst [vmem:[%s3050_s19 + $0x48] sm:$0xff] %v2299_v63   ;;  %v1746_v41 = vadd.f32 %v3028_v44, %v1707_v8  ;;  %v1708_v32 = vmax.f32 %v3246_v42, %v1676_v12 }
 0x157   : > { %2338 = vst [vmem:[%s3050_s19 + $0x40] sm:$0xff] %v2294_v25   ;;  %v1744_v4 = vadd.f32 %v3028_v44, %v1705_v15  ;;  %v1706_v43 = vmax.f32 %v3248_v2, %v1674_v47  ;;  %v3261_v15 = vld [vmem:[#allocation11_spill] sm:$0xff]  ;;  %v3262_v47 = vld [vmem:[#allocation12_spill] sm:$0xff]  ;;  %v3264_v2 = vld [vmem:[#allocation13_spill] sm:$0xff] }
 0x158   : > { %v1747_v45 = vadd.f32 %v3028_v44, %v1708_v32  ;;  %v1778_v38 = vmax.f32 %v1746_v41, 0.0  ;;  %v3263_v41 = vmax.f32 %v3261_v15, %v3262_v47 }
 0x159   : > { %v2510_v16 = vpop.f32.mrb[56].mxu0  ;;  %v1745_v59 = vadd.f32 %v3028_v44, %v1706_v43  ;;  %v2544_v3 = vpop.f32.mrb[56].mxu1  ;;  %v1776_v48 = vmax.f32 %v1744_v4, 0.0  ;;  %v3265_v43 = vld [vmem:[#allocation14_spill] sm:$0xff] }
 0x15a   : > { %v1269_v0 = vpop.f32.mrb[57].mxu0  ;;  %v1779_v62 = vmax.f32 %v1747_v45, 0.0  ;;  %v1679_v46 = vmax.f32 %v2510_v16, %v2544_v3  ;;  %v1590_v52 = vpop.f32.mrb[57].mxu1  ;;  %v3266_v45 = vmax.f32 %v3264_v2, %v3265_v43 }
 0x15b   : > { %v2511_v56 = vpop.f32.mrb[58].mxu0  ;;  %v1777_v5 = vmax.f32 %v1745_v59, 0.0  ;;  %v1677_v6 = vmax.f32 %v1269_v0, %v1590_v52  ;;  %v2545_v14 = vpop.f32.mrb[58].mxu1  ;;  %v3267_v0 = vld [vmem:[#allocation15_spill] sm:$0xff] }
 0x15c   : > { %v1272_v50 = vpop.f32.mrb[59].mxu0  ;;  %v2309_v20 = vpack.c.bf16 %v1779_v62, %v1778_v38  ;;  %v1711_v30 = vmax.f32 %v3251_v29, %v1679_v46  ;;  %v1680_v7 = vmax.f32 %v2511_v56, %v2545_v14  ;;  %v1593_v9 = vpop.f32.mrb[59].mxu1  ;;  %v3268_v38 = vld [vmem:[#allocation16_spill] sm:$0xff]  ;;  %v3270_v56 = vld [vmem:[#allocation17_spill] sm:$0xff] }
 0x15d   : > { %v2304_v31 = vpack.c.bf16 %v1777_v5, %v1776_v48  ;;  %v1709_v11 = vmax.f32 %v3254_v18, %v1677_v6  ;;  %v1678_v23 = vmax.f32 %v1272_v50, %v1593_v9  ;;  %v3269_v62 = vmax.f32 %v3267_v0, %v3268_v38  ;;  %v3271_v48 = vld [vmem:[#allocation18_spill] sm:$0xff] }
 0x15e   : > { %2341 = vst [vmem:[%s3050_s19 + $0x58] sm:$0xff] %v2309_v20   ;;  %v1750_v34 = vadd.f32 %v3028_v44, %v1711_v30  ;;  %v1712_v19 = vmax.f32 %v3257_v54, %v1680_v7  ;;  %v3272_v5 = vmax.f32 %v3270_v56, %v3271_v48 }
 0x15f   : > { %2340 = vst [vmem:[%s3050_s19 + $0x50] sm:$0xff] %v2304_v31   ;;  %v1748_v21 = vadd.f32 %v3028_v44, %v1709_v11  ;;  %v1710_v28 = vmax.f32 %v3260_v26, %v1678_v23 }
 0x160   : > { %v1751_v37 = vadd.f32 %v3028_v44, %v1712_v19  ;;  %v1782_v40 = vmax.f32 %v1750_v34, 0.0 }
 0x161   : > { %v2514_v39 = vpop.f32.mrb[60].mxu0  ;;  %v1749_v58 = vadd.f32 %v3028_v44, %v1710_v28  ;;  %v2548_v60 = vpop.f32.mrb[60].mxu1  ;;  %v1780_v10 = vmax.f32 %v1748_v21, 0.0 }
 0x162   : > { %v1285_v35 = vpop.f32.mrb[61].mxu0  ;;  %v1783_v22 = vmax.f32 %v1751_v37, 0.0  ;;  %v1683_v24 = vmax.f32 %v2514_v39, %v2548_v60  ;;  %v1606_v61 = vpop.f32.mrb[61].mxu1 }
 0x163   : > { %v2515_v63 = vpop.f32.mrb[62].mxu0  ;;  %v1781_v8 = vmax.f32 %v1749_v58, 0.0  ;;  %v1681_v12 = vmax.f32 %v1285_v35, %v1606_v61  ;;  %v2549_v13 = vpop.f32.mrb[62].mxu1 }
 0x164   : > { %v1288_v25 = vpop.f32.mrb[63].mxu0  ;;  %v2319_v27 = vpack.c.bf16 %v1783_v22, %v1782_v40  ;;  %v1715_v42 = vmax.f32 %v3263_v41, %v1683_v24  ;;  %v1684_v32 = vmax.f32 %v2515_v63, %v2549_v13  ;;  %v1609_v4 = vpop.f32.mrb[63].mxu1 }
 0x165   : > { %v2314_v1 = vpack.c.bf16 %v1781_v8, %v1780_v10  ;;  %v1713_v16 = vmax.f32 %v3266_v45, %v1681_v12  ;;  %v1682_v59 = vmax.f32 %v1288_v25, %v1609_v4 }
 0x166   : > { %2343 = vst [vmem:[%s3050_s19 + $0x68] sm:$0xff] %v2319_v27   ;;  %v1754_v3 = vadd.f32 %v3028_v44, %v1715_v42  ;;  %v1716_v46 = vmax.f32 %v3269_v62, %v1684_v32 }
 0x167   : > { %2342 = vst [vmem:[%s3050_s19 + $0x60] sm:$0xff] %v2314_v1   ;;  %v1752_v52 = vadd.f32 %v3028_v44, %v1713_v16  ;;  %v1714_v6 = vmax.f32 %v3272_v5, %v1682_v59 }
 0x168   : > { %v1755_v14 = vadd.f32 %v3028_v44, %v1716_v46  ;;  %v1786_v20 = vmax.f32 %v1754_v3, 0.0 }
 0x169   : > { %v1753_v50 = vadd.f32 %v3028_v44, %v1714_v6  ;;  %v1784_v51 = vmax.f32 %v1752_v52, 0.0 }
 0x16a   : > { %v1787_v49 = vmax.f32 %v1755_v14, 0.0 }
 0x16b   : > { %v1785_v29 = vmax.f32 %v1753_v50, 0.0 }
 0x16c   : > { %v2329_v30 = vpack.c.bf16 %v1787_v49, %v1786_v20 }
 0x16d   : > { %v2324_v7 = vpack.c.bf16 %v1785_v29, %v1784_v51 }
 0x16e   : > { %2345 = vst [vmem:[%s3050_s19 + $0x78] sm:$0xff] %v2329_v30  }
 0x16f   : > { %2344 = vst [vmem:[%s3050_s19 + $0x70] sm:$0xff] %v2324_v7  }
 0x170 PF: > { %s16_s21 = sadd.s32 1, %s2630_s21  }
 0x171   : > { %p13_p4 = scmp.ge.s32.totalorder %s16_s21, 4  }
 0x173   :  { %15 = sbr.rel (!%p13_p4) target bundleno = 1 (0x1), region = 83 }

// kernel: cnn_forward.5
= control target key start
LH: loop header
LB: loop body
LE: loop exit
PB: predicated region body
PF: predicated region fallthrough
CT: control target
= control target key end

     0   :  { %s5688_s4 = inlined_call_operand.vmem [shape: bf16[1152,128], index: 4, kind: input, shape index: {}]   ;;  %s5689_s0 = inlined_call_operand.vmem [shape: bf16[56,1152], index: 0, kind: input, shape index: {}]   ;;  %s5690_s1 = inlined_call_operand.vmem [shape: bf16[56,1152], index: 1, kind: input, shape index: {}]   ;;  %s5691_s2 = inlined_call_operand.vmem [shape: bf16[56,1152], index: 2, kind: input, shape index: {}]   ;;  %s5692_s3 = inlined_call_operand.vmem [shape: bf16[56,1152], index: 3, kind: input, shape index: {}]   ;;  %s5693_s5 = inlined_call_operand.vmem [shape: f32[1,128], index: 5, kind: input, shape index: {}]   ;;  %s5694_s6 = inlined_call_operand.vmem [shape: bf16[56,128], index: 6, kind: output, shape index: {}]  }
   0x1   :  { %v4188_v0 = vld [vmem:[%s5688_s4 + $0x40] sm:$0xff]   ;;  %v4211_v4 = vld [vmem:[%s5688_s4 + $0x48] sm:$0xff]   ;;  %v4235_v8 = vld [vmem:[%s5688_s4 + $0x50] sm:$0xff]  }
   0x2   :  { %v4193_v1 = vld [vmem:[%s5688_s4 + $0xc0] sm:$0xff]   ;;  %3030 = vmatprep.subr.bf16.mxu0 %v4188_v0  ;;  %v4217_v5 = vld [vmem:[%s5688_s4 + $0xc8] sm:$0xff]   ;;  %v4241_v9 = vld [vmem:[%s5688_s4 + $0xd0] sm:$0xff]  }
   0x3   :  { %v4199_v2 = vld [vmem:[%s5688_s4] sm:$0xff]   ;;  %3070 = vmatprep.subr.bf16.mxu1 %v4193_v1  ;;  %v4223_v6 = vld [vmem:[%s5688_s4 + $0x8] sm:$0xff]   ;;  %v4247_v10 = vld [vmem:[%s5688_s4 + $0x10] sm:$0xff]  }
   0x4   :  { %v4205_v3 = vld [vmem:[%s5688_s4 + $0x80] sm:$0xff]   ;;  %3031 = vmatpush3.bf16.msra.mxu0 %v4199_v2  ;;  %v4229_v7 = vld [vmem:[%s5688_s4 + $0x88] sm:$0xff]   ;;  %v4253_v11 = vld [vmem:[%s5688_s4 + $0x90] sm:$0xff]  }
   0x5   :  { %3071 = vmatpush3.bf16.msra.mxu1 %v4205_v3  ;;  %3032 = vmatprep.subr.bf16.mxu0 %v4211_v4  ;;  %v4259_v12 = vld [vmem:[%s5688_s4 + $0x58] sm:$0xff]   ;;  %v4283_v16 = vld [vmem:[%s5688_s4 + $0x60] sm:$0xff]   ;;  %v4307_v20 = vld [vmem:[%s5688_s4 + $0x68] sm:$0xff]  }
   0x6   :  { %3072 = vmatprep.subr.bf16.mxu1 %v4217_v5  ;;  %v4265_v13 = vld [vmem:[%s5688_s4 + $0xd8] sm:$0xff]   ;;  %v4289_v17 = vld [vmem:[%s5688_s4 + $0xe0] sm:$0xff]   ;;  %v4313_v21 = vld [vmem:[%s5688_s4 + $0xe8] sm:$0xff]  }
   0x7   :  { %v4271_v14 = vld [vmem:[%s5688_s4 + $0x18] sm:$0xff]   ;;  %v4295_v18 = vld [vmem:[%s5688_s4 + $0x20] sm:$0xff]   ;;  %v4319_v22 = vld [vmem:[%s5688_s4 + $0x28] sm:$0xff]  }
   0x8   :  { %3033 = vmatpush3.bf16.msra.mxu0 %v4223_v6  ;;  %v4277_v15 = vld [vmem:[%s5688_s4 + $0x98] sm:$0xff]   ;;  %v4301_v19 = vld [vmem:[%s5688_s4 + $0xa0] sm:$0xff]   ;;  %v4325_v23 = vld [vmem:[%s5688_s4 + $0xa8] sm:$0xff]  }
   0x9   :  { %3073 = vmatpush3.bf16.msra.mxu1 %v4229_v7  ;;  %3034 = vmatprep.subr.bf16.mxu0 %v4235_v8  ;;  %v4331_v24 = vld [vmem:[%s5688_s4 + $0x70] sm:$0xff]   ;;  %v4355_v28 = vld [vmem:[%s5688_s4 + $0x78] sm:$0xff]   ;;  %v3846_v32 = vld [vmem:[%s5689_s0] ss:$36 sps:$4 sm:$0xff]  }
   0xa   :  { %3074 = vmatprep.subr.bf16.mxu1 %v4241_v9  ;;  %v4337_v25 = vld [vmem:[%s5688_s4 + $0xf0] sm:$0xff]   ;;  %v4361_v29 = vld [vmem:[%s5688_s4 + $0xf8] sm:$0xff]   ;;  %v3848_v33 = vld [vmem:[%s5689_s0 + $0x4] ss:$36 sps:$4 sm:$0xff]  }
   0xb   :  { %v4343_v26 = vld [vmem:[%s5688_s4 + $0x30] sm:$0xff]   ;;  %v4367_v30 = vld [vmem:[%s5688_s4 + $0x38] sm:$0xff]   ;;  %v3849_v34 = vld [vmem:[%s5689_s0 + $0x8] ss:$36 sps:$4 sm:$0xff]   ;;  %837 = vmatprep.mubr.bf16.mxu0 %v3848_v33 }
   0xc   :  { %3035 = vmatpush3.bf16.msra.mxu0 %v4247_v10  ;;  %v4349_v27 = vld [vmem:[%s5688_s4 + $0xb0] sm:$0xff]   ;;  %v4373_v31 = vld [vmem:[%s5688_s4 + $0xb8] sm:$0xff]   ;;  %v4392_v36 = vld [vmem:[%s5688_s4 + $0x140] sm:$0xff]  }
   0xd   :  { %3075 = vmatpush3.bf16.msra.mxu1 %v4253_v11  ;;  %3036 = vmatprep.subr.bf16.mxu0 %v4259_v12  ;;  %v3851_v35 = vld [vmem:[%s5689_s0 + $0xc] ss:$36 sps:$4 sm:$0xff]   ;;  %v4397_v37 = vld [vmem:[%s5688_s4 + $0x1c0] sm:$0xff]   ;;  %v3862_v45 = vld [vmem:[%s5689_s0 + $0x54] ss:$36 sps:$4 sm:$0xff]  }
   0xe   :  { %3076 = vmatprep.subr.bf16.mxu1 %v4265_v13  ;;  %901 = vmatprep.mubr.bf16.mxu1 %v3851_v35  ;;  %v4403_v38 = vld [vmem:[%s5688_s4 + $0x100] sm:$0xff]   ;;  %v4415_v40 = vld [vmem:[%s5688_s4 + $0x148] sm:$0xff]   ;;  %v3865_v47 = vld [vmem:[%s5689_s0 + $0x50] ss:$36 sps:$4 sm:$0xff]  }
   0xf   :  { %v4409_v39 = vld [vmem:[%s5688_s4 + $0x180] sm:$0xff]   ;;  %v4421_v41 = vld [vmem:[%s5688_s4 + $0x1c8] sm:$0xff]   ;;  %v4452_v48 = vld [vmem:[%s5688_s4 + $0x150] sm:$0xff]  }
  0x10   :  { %3037 = vmatpush3.bf16.msra.mxu0 %v4271_v14  ;;  %v4427_v42 = vld [vmem:[%s5688_s4 + $0x108] sm:$0xff]   ;;  %v4457_v49 = vld [vmem:[%s5688_s4 + $0x1d0] sm:$0xff]   ;;  %v4475_v52 = vld [vmem:[%s5688_s4 + $0x158] sm:$0xff]  }
  0x11   :  { %3077 = vmatpush3.bf16.msra.mxu1 %v4277_v15  ;;  %3038 = vmatprep.subr.bf16.mxu0 %v4283_v16  ;;  %v4433_v43 = vld [vmem:[%s5688_s4 + $0x188] sm:$0xff]   ;;  %v4463_v50 = vld [vmem:[%s5688_s4 + $0x110] sm:$0xff]   ;;  %v4481_v53 = vld [vmem:[%s5688_s4 + $0x1d8] sm:$0xff]  }
  0x12   :  { %3078 = vmatprep.subr.bf16.mxu1 %v4289_v17  ;;  %v3860_v44 = vld [vmem:[%s5689_s0 + $0x4c] ss:$36 sps:$4 sm:$0xff]   ;;  %v4487_v54 = vld [vmem:[%s5688_s4 + $0x118] sm:$0xff]   ;;  %v4512_v60 = vld [vmem:[%s5688_s4 + $0x160] sm:$0xff]  }
  0x13   :  { %v3864_v46 = vld [vmem:[%s5689_s0 + $0x48] ss:$36 sps:$4 sm:$0xff]   ;;  %v4469_v51 = vld [vmem:[%s5688_s4 + $0x190] sm:$0xff]   ;;  %v4493_v55 = vld [vmem:[%s5688_s4 + $0x198] sm:$0xff]  }
  0x14   :  { %3039 = vmatpush3.bf16.msra.mxu0 %v4295_v18  ;;  %v3874_v56 = vld [vmem:[%s5689_s0 + $0x94] ss:$36 sps:$4 sm:$0xff]   ;;  %v3876_v57 = vld [vmem:[%s5689_s0 + $0x9c] ss:$36 sps:$4 sm:$0xff]   ;;  %v4541_v33 = vld [vmem:[%s5688_s4 + $0x1e8] sm:$0xff]  }
  0x15   :  { %3079 = vmatpush3.bf16.msra.mxu1 %v4301_v19  ;;  %3040 = vmatprep.subr.bf16.mxu0 %v4307_v20  ;;  %v3878_v58 = vld [vmem:[%s5689_s0 + $0x90] ss:$36 sps:$4 sm:$0xff]   ;;  %v3879_v59 = vld [vmem:[%s5689_s0 + $0x98] ss:$36 sps:$4 sm:$0xff]   ;;  %v4517_v61 = vld [vmem:[%s5688_s4 + $0x1e0] sm:$0xff]   ;;  %5723 = vst [vmem:[#allocation2_spill] sm:$0xff] %v4541_v33 }
  0x16   :  { %3080 = vmatprep.subr.bf16.mxu1 %v4313_v21  ;;  %v4523_v62 = vld [vmem:[%s5688_s4 + $0x120] sm:$0xff]   ;;  %v4553_v35 = vld [vmem:[%s5688_s4 + $0x1a8] sm:$0xff]  }
  0x17   :  { %v4529_v63 = vld [vmem:[%s5688_s4 + $0x1a0] sm:$0xff]   ;;  %5724 = vst [vmem:[#allocation3_spill] sm:$0xff] %v4553_v35 }
  0x18   :  { %3041 = vmatpush3.bf16.msra.mxu0 %v4319_v22 }
  0x19   :  { %3081 = vmatpush3.bf16.msra.mxu1 %v4325_v23  ;;  %3042 = vmatprep.subr.bf16.mxu0 %v4331_v24 }
  0x1a   :  { %3082 = vmatprep.subr.bf16.mxu1 %v4337_v25 }
  0x1c   :  { %3043 = vmatpush3.bf16.msra.mxu0 %v4343_v26 }
  0x1d   :  { %3083 = vmatpush3.bf16.msra.mxu1 %v4349_v27  ;;  %3044 = vmatprep.subr.bf16.mxu0 %v4355_v28 }
  0x1e   :  { %3084 = vmatprep.subr.bf16.mxu1 %v4361_v29 }
  0x20   :  { %3045 = vmatpush3.bf16.msra.mxu0 %v4367_v30 }
  0x21   :  { %3085 = vmatpush3.bf16.msra.mxu1 %v4373_v31  ;;  %3110 = vmatprep.subr.bf16.mxu0 %v4392_v36 }
  0x22   :  { %3150 = vmatprep.subr.bf16.mxu1 %v4397_v37 }
  0x23   :  { %838 = vmatmul.mubr.bf16.vlgmr.msra.gmra.mrb[0].mxu0 %v3846_v32  ;;  %v4535_v32 = vld [vmem:[%s5688_s4 + $0x168] sm:$0xff]  }
  0x24   :  { %902 = vmatmul.mubr.bf16.vlgmr.msra.gmra.mrb[0].mxu1 %v3849_v34  ;;  %3111 = vmatpush3.bf16.msra.mxu0 %v4403_v38  ;;  %v4547_v34 = vld [vmem:[%s5688_s4 + $0x128] sm:$0xff]  }
  0x25   :  { %3151 = vmatpush3.bf16.msra.mxu1 %v4409_v39  ;;  %3112 = vmatprep.subr.bf16.mxu0 %v4415_v40 }
  0x26   :  { %3152 = vmatprep.subr.bf16.mxu1 %v4421_v41  ;;  %845 = vmatprep.mubr.bf16.mxu0 %v3860_v44  ;;  %v198_v44 = vld [vmem:[%s5689_s0 + $0xd8] sm:$0xff] }
  0x27   :  { %909 = vmatprep.mubr.bf16.mxu1 %v3862_v45  ;;  %v199_v45 = vld [vmem:[%s5689_s0 + $0xe0] sm:$0xff] }
  0x28   :  { %3113 = vmatpush3.bf16.msra.mxu0 %v4427_v42 }
  0x29   :  { %3153 = vmatpush3.bf16.msra.mxu1 %v4433_v43  ;;  %3114 = vmatprep.subr.bf16.mxu0 %v4452_v48 }
  0x2a   :  { %3154 = vmatprep.subr.bf16.mxu1 %v4457_v49 }
  0x2b   :  { %846 = vmatmul.mubr.bf16.gmra.mrb[4].mxu0 %v3864_v46  ;;  %v2810_v46 = vcombine.high %v198_v44, %v198_v44 }
  0x2c   :  { %910 = vmatmul.mubr.bf16.gmra.mrb[4].mxu1 %v3865_v47  ;;  %3115 = vmatpush3.bf16.msra.mxu0 %v4463_v50  ;;  %v2812_v47 = vcombine.high %v199_v45, %v199_v45 }
  0x2d   :  { %3155 = vmatpush3.bf16.msra.mxu1 %v4469_v51  ;;  %3116 = vmatprep.subr.bf16.mxu0 %v4475_v52 }
  0x2e   :  { %3156 = vmatprep.subr.bf16.mxu1 %v4481_v53  ;;  %853 = vmatprep.mubr.bf16.mxu0 %v3874_v56  ;;  %v2809_v56 = vcombine.low %v198_v44, %v198_v44  ;;  %v4581_v44 = vld [vmem:[%s5688_s4 + $0x1b0] sm:$0xff]  }
  0x2f   :  { %917 = vmatprep.mubr.bf16.mxu1 %v3876_v57  ;;  %v2811_v57 = vcombine.low %v199_v45, %v199_v45  ;;  %5726 = vst [vmem:[#allocation5_spill] sm:$0xff] %v4581_v44  ;;  %v4588_v45 = vld [vmem:[%s5688_s4 + $0x178] sm:$0xff]  }
  0x30   :  { %3117 = vmatpush3.bf16.msra.mxu0 %v4487_v54 }
  0x31   :  { %3157 = vmatpush3.bf16.msra.mxu1 %v4493_v55  ;;  %3118 = vmatprep.subr.bf16.mxu0 %v4512_v60 }
  0x32   :  { %3158 = vmatprep.subr.bf16.mxu1 %v4517_v61 }
  0x33   :  { %854 = vmatmul.mubr.bf16.gmra.mrb[8].mxu0 %v3878_v58  ;;  %v4566_v58 = vld [vmem:[%s5688_s4 + $0x170] sm:$0xff]  }
  0x34   :  { %918 = vmatmul.mubr.bf16.gmra.mrb[8].mxu1 %v3879_v59  ;;  %3119 = vmatpush3.bf16.msra.mxu0 %v4523_v62  ;;  %v4571_v59 = vld [vmem:[%s5688_s4 + $0x1f0] sm:$0xff]  }
  0x35   :  { %3159 = vmatpush3.bf16.msra.mxu1 %v4529_v63  ;;  %3120 = vmatprep.subr.bf16.mxu0 %v4535_v32  ;;  %5725 = vst [vmem:[#allocation4_spill] sm:$0xff] %v4571_v59 }
  0x36   :  { %3160 = vmatprep.subr.bf16.mxu1 %v4541_v33  ;;  %861 = vmatprep.mubr.bf16.mxu0 %v2810_v46  ;;  %v4595_v46 = vld [vmem:[%s5688_s4 + $0x1f8] sm:$0xff]   ;;  %v4627_v33 = vld [vmem:[%s5688_s4 + $0x200] sm:$0xff]  }
  0x37   :  { %925 = vmatprep.mubr.bf16.mxu1 %v2812_v47  ;;  %5727 = vst [vmem:[#allocation6_spill] sm:$0xff] %v4595_v46  ;;  %v4601_v47 = vld [vmem:[%s5688_s4 + $0x138] sm:$0xff]  }
  0x38   :  { %3121 = vmatpush3.bf16.msra.mxu0 %v4547_v34 }
  0x39   :  { %3161 = vmatpush3.bf16.msra.mxu1 %v4553_v35  ;;  %v4576_v35 = vld [vmem:[%s5688_s4 + $0x130] sm:$0xff]   ;;  %3122 = vmatprep.subr.bf16.mxu0 %v4566_v58 }
  0x3a   :  { %3162 = vmatprep.subr.bf16.mxu1 %v4571_v59  ;;  %v3905_v59 = vld [vmem:[%s5689_s0 + $0x1c] ss:$36 sps:$4 sm:$0xff]  }
  0x3b   :  { %862 = vmatmul.mubr.bf16.gmra.mrb[12].mxu0 %v2809_v56  ;;  %v4607_v56 = vld [vmem:[%s5688_s4 + $0x1b8] sm:$0xff]  }
  0x3c   :  { %926 = vmatmul.mubr.bf16.gmra.mrb[12].mxu1 %v2811_v57  ;;  %3123 = vmatpush3.bf16.msra.mxu0 %v4576_v35  ;;  %5728 = vst [vmem:[#allocation7_spill] sm:$0xff] %v4607_v56  ;;  %v3900_v57 = vld [vmem:[%s5689_s0 + $0x10] ss:$36 sps:$4 sm:$0xff]  }
  0x3d   :  { %3163 = vmatpush3.bf16.msra.mxu1 %v4581_v44  ;;  %3124 = vmatprep.subr.bf16.mxu0 %v4588_v45  ;;  %v3902_v44 = vld [vmem:[%s5689_s0 + $0x14] ss:$36 sps:$4 sm:$0xff]  }
  0x3e   :  { %3164 = vmatprep.subr.bf16.mxu1 %v4595_v46  ;;  %v3903_v46 = vld [vmem:[%s5689_s0 + $0x18] ss:$36 sps:$4 sm:$0xff]   ;;  %965 = vmatprep.mubr.bf16.mxu0 %v3902_v44 }
  0x3f   :  { %1029 = vmatprep.mubr.bf16.mxu1 %v3905_v59  ;;  %v3908_v44 = vld [vmem:[%s5689_s0 + $0x5c] ss:$36 sps:$4 sm:$0xff]  }
  0x40   :  { %3125 = vmatpush3.bf16.msra.mxu0 %v4601_v47  ;;  %v3910_v59 = vld [vmem:[%s5689_s0 + $0x58] ss:$36 sps:$4 sm:$0xff]  }
  0x41   :  { %3165 = vmatpush3.bf16.msra.mxu1 %v4607_v56  ;;  %v4632_v56 = vld [vmem:[%s5688_s4 + $0x208] sm:$0xff]   ;;  %3718 = vmatprep.subr.bf16.mxu0 %v4627_v33 }
  0x42   :  { %3202 = vmatprep.subr.bf16.mxu1 %v4188_v0  ;;  %v3911_v0 = vld [vmem:[%s5689_s0 + $0x64] ss:$36 sps:$4 sm:$0xff]  }
  0x43   :  { %966 = vmatmul.mubr.bf16.vlgmr.msra.gmra.mrb[16].mxu0 %v3900_v57  ;;  %v3916_v57 = vld [vmem:[%s5689_s0 + $0xa4] ss:$36 sps:$4 sm:$0xff]  }
  0x44   :  { %1030 = vmatmul.mubr.bf16.vlgmr.msra.gmra.mrb[16].mxu1 %v3903_v46  ;;  %3719 = vmatpush3.bf16.msra.mxu0 %v4627_v33  ;;  %v4651_v46 = vld [vmem:[%s5688_s4 + $0x210] sm:$0xff]  }
  0x45   :  { %3203 = vmatpush3.bf16.msra.mxu1 %v4199_v2  ;;  %3720 = vmatprep.subr.bf16.mxu0 %v4632_v56  ;;  %v3914_v2 = vld [vmem:[%s5689_s0 + $0x60] ss:$36 sps:$4 sm:$0xff]  }
  0x46   :  { %3204 = vmatprep.subr.bf16.mxu1 %v4211_v4  ;;  %973 = vmatprep.mubr.bf16.mxu0 %v3908_v44  ;;  %v4666_v4 = vld [vmem:[%s5688_s4 + $0x218] sm:$0xff]   ;;  %v3919_v44 = vld [vmem:[%s5689_s0 + $0xac] ss:$36 sps:$4 sm:$0xff]  }
  0x47   :  { %1037 = vmatprep.mubr.bf16.mxu1 %v3911_v0  ;;  %v4684_v0 = vld [vmem:[%s5688_s4 + $0x220] sm:$0xff]  }
  0x48   :  { %3721 = vmatpush3.bf16.msra.mxu0 %v4632_v56 }
  0x49   :  { %3205 = vmatpush3.bf16.msra.mxu1 %v4223_v6  ;;  %3722 = vmatprep.subr.bf16.mxu0 %v4651_v46  ;;  %v3918_v6 = vld [vmem:[%s5689_s0 + $0xa0] ss:$36 sps:$4 sm:$0xff]  }
  0x4a   :  { %3206 = vmatprep.subr.bf16.mxu1 %v4235_v8  ;;  %v200_v8 = vld [vmem:[%s5689_s0 + $0xe8] sm:$0xff] }
  0x4b   :  { %974 = vmatmul.mubr.bf16.gmra.mrb[20].mxu0 %v3910_v59  ;;  %v2814_v59 = vcombine.high %v200_v8, %v200_v8 }
  0x4c   :  { %1038 = vmatmul.mubr.bf16.gmra.mrb[20].mxu1 %v3914_v2  ;;  %981 = vmatprep.mubr.bf16.mxu0 %v3916_v57  ;;  %v201_v2 = vld [vmem:[%s5689_s0 + $0xf0] sm:$0xff] }
  0x4d   :  { %3723 = vmatpush3.bf16.msra.mxu0 %v4651_v46  ;;  %3207 = vmatpush3.bf16.msra.mxu1 %v4247_v10  ;;  %v3922_v10 = vld [vmem:[%s5689_s0 + $0xa8] ss:$36 sps:$4 sm:$0xff]   ;;  %v2816_v57 = vcombine.high %v201_v2, %v201_v2 }
  0x4e   :  { %3724 = vmatprep.subr.bf16.mxu0 %v4666_v4  ;;  %3208 = vmatprep.subr.bf16.mxu1 %v4259_v12  ;;  %v4699_v12 = vld [vmem:[%s5688_s4 + $0x228] sm:$0xff]  }
  0x4f   :  { %1045 = vmatprep.mubr.bf16.mxu1 %v3919_v44  ;;  %v2815_v44 = vcombine.low %v201_v2, %v201_v2  ;;  %v4885_v2 = vld [vmem:[%s5688_s4 + $0xc0] sm:$0xff]  }
  0x51   :  { %3725 = vmatpush3.bf16.msra.mxu0 %v4666_v4  ;;  %3209 = vmatpush3.bf16.msra.mxu1 %v4271_v14  ;;  %v4708_v14 = vld [vmem:[%s5688_s4 + $0x230] sm:$0xff]  }
  0x52   :  { %3726 = vmatprep.subr.bf16.mxu0 %v4684_v0  ;;  %3210 = vmatprep.subr.bf16.mxu1 %v4283_v16  ;;  %v2813_v16 = vcombine.low %v200_v8, %v200_v8  ;;  %v3971_v8 = vld [vmem:[%s5690_s1 + $0x68] ss:$36 sps:$4 sm:$0xff]  }
  0x53   :  { %982 = vmatmul.mubr.bf16.gmra.mrb[24].mxu0 %v3918_v6  ;;  %v3930_v6 = vld [vmem:[%s5689_s0 + $0x20] ss:$36 sps:$4 sm:$0xff]  }
  0x54   :  { %1046 = vmatmul.mubr.bf16.gmra.mrb[24].mxu1 %v3922_v10  ;;  %989 = vmatprep.mubr.bf16.mxu0 %v2814_v59  ;;  %v5734_v10 = vld [vmem:[#allocation7_spill] sm:$0xff]  ;;  %v4879_v59 = vld [vmem:[%s5688_s4 + $0x40] sm:$0xff]  }
  0x55   :  { %3727 = vmatpush3.bf16.msra.mxu0 %v4684_v0  ;;  %3211 = vmatpush3.bf16.msra.mxu1 %v4295_v18  ;;  %v4720_v18 = vld [vmem:[%s5688_s4 + $0x238] sm:$0xff]  }
  0x56   :  { %3728 = vmatprep.subr.bf16.mxu0 %v4699_v12  ;;  %3212 = vmatprep.subr.bf16.mxu1 %v4307_v20  ;;  %v3934_v20 = vld [vmem:[%s5690_s1 + $0x4] ss:$36 sps:$4 sm:$0xff]  }
  0x57   :  { %1053 = vmatprep.mubr.bf16.mxu1 %v2816_v57  ;;  %v3972_v57 = vld [vmem:[%s5690_s1 + $0x64] ss:$36 sps:$4 sm:$0xff]  }
  0x59   :  { %3729 = vmatpush3.bf16.msra.mxu0 %v4699_v12  ;;  %3213 = vmatpush3.bf16.msra.mxu1 %v4319_v22  ;;  %v3931_v22 = vld [vmem:[%s5689_s0 + $0x68] ss:$36 sps:$4 sm:$0xff]  }
  0x5a   :  { %3730 = vmatprep.subr.bf16.mxu0 %v4708_v14  ;;  %3214 = vmatprep.subr.bf16.mxu1 %v4331_v24  ;;  %v3932_v24 = vld [vmem:[%s5690_s1] ss:$36 sps:$4 sm:$0xff]  }
  0x5b   :  { %990 = vmatmul.mubr.bf16.gmra.mrb[28].mxu0 %v2813_v16  ;;  %v3978_v16 = vld [vmem:[%s5690_s1 + $0xb0] ss:$36 sps:$4 sm:$0xff]  }
  0x5c   :  { %1054 = vmatmul.mubr.bf16.gmra.mrb[28].mxu1 %v2815_v44  ;;  %3734 = vmatprep.mubr.bf16.mxu0 %v3930_v6  ;;  %v4897_v44 = vld [vmem:[%s5688_s4] sm:$0xff]  }
  0x5d   :  { %3731 = vmatpush3.bf16.msra.mxu0 %v4708_v14  ;;  %3215 = vmatpush3.bf16.msra.mxu1 %v4343_v26  ;;  %v3935_v26 = vld [vmem:[%s5689_s0 + $0xb0] ss:$36 sps:$4 sm:$0xff]   ;;  %v4903_v6 = vld [vmem:[%s5688_s4 + $0x80] sm:$0xff]  }
  0x5e   :  { %3732 = vmatprep.subr.bf16.mxu0 %v4720_v18  ;;  %3216 = vmatprep.subr.bf16.mxu1 %v4355_v28  ;;  %v3937_v28 = vld [vmem:[%s5690_s1 + $0x4c] ss:$36 sps:$4 sm:$0xff]  }
  0x5f   :  { %1362 = vmatprep.mubr.bf16.mxu1 %v3934_v20  ;;  %v4909_v20 = vld [vmem:[%s5688_s4 + $0x48] sm:$0xff]  }
  0x61   :  { %3733 = vmatpush3.bf16.msra.mxu0 %v4720_v18  ;;  %3217 = vmatpush3.bf16.msra.mxu1 %v4367_v30  ;;  %v3939_v30 = vld [vmem:[%s5690_s1 + $0x48] ss:$36 sps:$4 sm:$0xff]  }
  0x62   :  { %3242 = vmatprep.subr.bf16.mxu0 %v4193_v1  ;;  %3282 = vmatprep.subr.bf16.mxu1 %v4392_v36  ;;  %v3936_v1 = vld [vmem:[%s5689_s0 + $0xf8] ss:$0 sps:$4 sm:$0xff]  }
  0x63   :  { %v3959_v36 = vld [vmem:[%s5690_s1 + $0x98] ss:$36 sps:$4 sm:$0xff]  }
  0x64   :  { %3735 = vmatmul.mubr.bf16.vlgmr.msra.gmra.mrb[32].mxu0 %v3931_v22  ;;  %1363 = vmatmul.mubr.bf16.vlgmr.msra.gmra.mrb[32].mxu1 %v3932_v24  ;;  %v4915_v22 = vld [vmem:[%s5688_s4 + $0xc8] sm:$0xff]   ;;  %v3974_v24 = vld [vmem:[%s5690_s1 + $0x60] ss:$36 sps:$4 sm:$0xff]  }
  0x65   :  { %3243 = vmatpush3.bf16.msra.mxu0 %v4205_v3  ;;  %3283 = vmatpush3.bf16.msra.mxu1 %v4403_v38  ;;  %v3940_v3 = vld [vmem:[%s5690_s1 + $0x94] ss:$36 sps:$4 sm:$0xff]   ;;  %v1156_v38 = vld [vmem:[%s5690_s1 + $0xe0] sm:$0xff] }
  0x66   :  { %3244 = vmatprep.subr.bf16.mxu0 %v4217_v5  ;;  %3284 = vmatprep.subr.bf16.mxu1 %v4415_v40  ;;  %v3947_v5 = vld [vmem:[%s5690_s1 + $0xc] ss:$36 sps:$4 sm:$0xff]   ;;  %v2920_v40 = vcombine.high %v1156_v38, %v1156_v38 }
  0x67   :  { %3738 = vmatprep.mubr.bf16.mxu0 %v3935_v26  ;;  %1370 = vmatprep.mubr.bf16.mxu1 %v3937_v28  ;;  %v3979_v26 = vld [vmem:[%s5690_s1 + $0xf8] ss:$0 sps:$4 sm:$0xff]   ;;  %v4927_v28 = vld [vmem:[%s5688_s4 + $0x8] sm:$0xff]  }
  0x69   :  { %3245 = vmatpush3.bf16.msra.mxu0 %v4229_v7  ;;  %3285 = vmatpush3.bf16.msra.mxu1 %v4427_v42  ;;  %v3942_v7 = vld [vmem:[%s5690_s1 + $0x90] ss:$36 sps:$4 sm:$0xff]   ;;  %v5729_v42 = vld [vmem:[#allocation2_spill] sm:$0xff] }
  0x6a   :  { %3246 = vmatprep.subr.bf16.mxu0 %v4241_v9  ;;  %3286 = vmatprep.subr.bf16.mxu1 %v4452_v48  ;;  %v1155_v9 = vld [vmem:[%s5690_s1 + $0xd8] sm:$0xff] }
  0x6c   :  { %3739 = vmatmul.mubr.bf16.gmra.mrb[36].mxu0 %v3936_v1  ;;  %1371 = vmatmul.mubr.bf16.gmra.mrb[36].mxu1 %v3939_v30  ;;  %v4933_v1 = vld [vmem:[%s5688_s4 + $0x88] sm:$0xff]   ;;  %v4939_v30 = vld [vmem:[%s5688_s4 + $0x50] sm:$0xff]  }
  0x6d   :  { %3247 = vmatpush3.bf16.msra.mxu0 %v4253_v11  ;;  %3287 = vmatpush3.bf16.msra.mxu1 %v4463_v50  ;;  %v2918_v11 = vcombine.high %v1155_v9, %v1155_v9  ;;  %v5731_v50 = vld [vmem:[#allocation4_spill] sm:$0xff] }
  0x6e   :  { %3248 = vmatprep.subr.bf16.mxu0 %v4265_v13  ;;  %3288 = vmatprep.subr.bf16.mxu1 %v4475_v52  ;;  %v2917_v13 = vcombine.low %v1155_v9, %v1155_v9  ;;  %v3970_v52 = vld [vmem:[%s5690_s1 + $0x20] ss:$36 sps:$4 sm:$0xff]   ;;  %v4957_v9 = vld [vmem:[%s5688_s4 + $0x10] sm:$0xff]  }
  0x6f   :  { %1378 = vmatprep.mubr.bf16.mxu1 %v3940_v3  ;;  %1426 = vmatprep.mubr.bf16.mxu0 %v3947_v5  ;;  %v4945_v3 = vld [vmem:[%s5688_s4 + $0xd0] sm:$0xff]  }
  0x70   :  { %v3975_v5 = vld [vmem:[%s5690_s1 + $0xac] ss:$36 sps:$4 sm:$0xff]  }
  0x71   :  { %3249 = vmatpush3.bf16.msra.mxu0 %v4277_v15  ;;  %3289 = vmatpush3.bf16.msra.mxu1 %v4487_v54  ;;  %v3950_v15 = vld [vmem:[%s5690_s1 + $0x14] ss:$36 sps:$4 sm:$0xff]   ;;  %v5733_v54 = vld [vmem:[#allocation6_spill] sm:$0xff] }
  0x72   :  { %3250 = vmatprep.subr.bf16.mxu0 %v4289_v17  ;;  %3290 = vmatprep.subr.bf16.mxu1 %v4512_v60  ;;  %v3945_v17 = vld [vmem:[%s5690_s1 + $0x8] ss:$36 sps:$4 sm:$0xff]  }
  0x74   :  { %1379 = vmatmul.mubr.bf16.gmra.mrb[40].mxu1 %v3942_v7  ;;  %v3987_v7 = vld [vmem:[%s5691_s2 + $0xc] ss:$36 sps:$4 sm:$0xff]  }
  0x75   :  { %3251 = vmatpush3.bf16.msra.mxu0 %v4301_v19  ;;  %3291 = vmatpush3.bf16.msra.mxu1 %v4523_v62  ;;  %v3948_v19 = vld [vmem:[%s5690_s1 + $0x10] ss:$36 sps:$4 sm:$0xff]  }
  0x76   :  { %3252 = vmatprep.subr.bf16.mxu0 %v4313_v21  ;;  %3292 = vmatprep.subr.bf16.mxu1 %v4535_v32  ;;  %v3951_v21 = vld [vmem:[%s5690_s1 + $0x54] ss:$36 sps:$4 sm:$0xff]  }
  0x77   :  { %1386 = vmatprep.mubr.bf16.mxu1 %v2918_v11  ;;  %v4963_v11 = vld [vmem:[%s5688_s4 + $0x90] sm:$0xff]  }
  0x79   :  { %3253 = vmatpush3.bf16.msra.mxu0 %v4325_v23  ;;  %3293 = vmatpush3.bf16.msra.mxu1 %v4547_v34  ;;  %v3954_v23 = vld [vmem:[%s5690_s1 + $0x5c] ss:$36 sps:$4 sm:$0xff]  }
  0x7a   :  { %3254 = vmatprep.subr.bf16.mxu0 %v4337_v25  ;;  %3294 = vmatprep.subr.bf16.mxu1 %v4566_v58  ;;  %v3953_v25 = vld [vmem:[%s5690_s1 + $0x50] ss:$36 sps:$4 sm:$0xff]  }
  0x7c   :  { %1387 = vmatmul.mubr.bf16.gmra.mrb[44].mxu1 %v2917_v13  ;;  %v4969_v13 = vld [vmem:[%s5688_s4 + $0x58] sm:$0xff]  }
  0x7d   :  { %3255 = vmatpush3.bf16.msra.mxu0 %v4349_v27  ;;  %3295 = vmatpush3.bf16.msra.mxu1 %v4576_v35  ;;  %v3956_v27 = vld [vmem:[%s5690_s1 + $0x58] ss:$36 sps:$4 sm:$0xff]  }
  0x7e   :  { %3256 = vmatprep.subr.bf16.mxu0 %v4361_v29  ;;  %3296 = vmatprep.subr.bf16.mxu1 %v4588_v45  ;;  %v3957_v29 = vld [vmem:[%s5690_s1 + $0x9c] ss:$36 sps:$4 sm:$0xff]  }
  0x7f   :  { %1490 = vmatprep.mubr.bf16.mxu1 %v3950_v15  ;;  %v4975_v15 = vld [vmem:[%s5688_s4 + $0xd8] sm:$0xff]  }
  0x81   :  { %3257 = vmatpush3.bf16.msra.mxu0 %v4373_v31  ;;  %3297 = vmatpush3.bf16.msra.mxu1 %v4601_v47  ;;  %v3960_v31 = vld [vmem:[%s5690_s1 + $0xa4] ss:$36 sps:$4 sm:$0xff]  }
  0x82   :  { %3322 = vmatprep.subr.bf16.mxu0 %v4397_v37  ;;  %3742 = vmatprep.subr.bf16.mxu1 %v4627_v33  ;;  %v3962_v37 = vld [vmem:[%s5690_s1 + $0xa0] ss:$36 sps:$4 sm:$0xff]  }
  0x84   :  { %1427 = vmatmul.mubr.bf16.vlgmr.msra.gmra.mrb[40].mxu0 %v3945_v17  ;;  %1491 = vmatmul.mubr.bf16.vlgmr.msra.gmra.mrb[48].mxu1 %v3948_v19  ;;  %v3977_v17 = vld [vmem:[%s5690_s1 + $0xa8] ss:$36 sps:$4 sm:$0xff]   ;;  %v1158_v19 = vld [vmem:[%s5690_s1 + $0xf0] sm:$0xff] }
  0x85   :  { %3323 = vmatpush3.bf16.msra.mxu0 %v4409_v39  ;;  %3743 = vmatpush3.bf16.msra.mxu1 %v4627_v33  ;;  %v1157_v39 = vld [vmem:[%s5690_s1 + $0xe8] sm:$0xff] }
  0x86   :  { %3324 = vmatprep.subr.bf16.mxu0 %v4421_v41  ;;  %3744 = vmatprep.subr.bf16.mxu1 %v4632_v56  ;;  %v2922_v41 = vcombine.high %v1157_v39, %v1157_v39  ;;  %v2921_v48 = vcombine.low %v1157_v39, %v1157_v39  ;;  %v2923_v39 = vcombine.low %v1158_v19, %v1158_v19 }
  0x87   :  { %1434 = vmatprep.mubr.bf16.mxu0 %v3951_v21  ;;  %1498 = vmatprep.mubr.bf16.mxu1 %v3954_v23  ;;  %v4987_v21 = vld [vmem:[%s5688_s4 + $0x18] sm:$0xff]  }
  0x88   :  { %v4993_v23 = vld [vmem:[%s5688_s4 + $0x98] sm:$0xff]  }
  0x89   :  { %3325 = vmatpush3.bf16.msra.mxu0 %v4433_v43  ;;  %3745 = vmatpush3.bf16.msra.mxu1 %v4632_v56  ;;  %v2919_v43 = vcombine.low %v1156_v38, %v1156_v38  ;;  %v5029_v38 = vld [vmem:[%s5688_s4 + $0xe8] sm:$0xff]  }
  0x8a   :  { %3326 = vmatprep.subr.bf16.mxu0 %v4457_v49  ;;  %3746 = vmatprep.subr.bf16.mxu1 %v4651_v46  ;;  %v5730_v49 = vld [vmem:[#allocation3_spill] sm:$0xff]  ;;  %5737 = vst [vmem:[#allocation4_spill] sm:$0xff] %v5029_v38 }
  0x8c   :  { %1435 = vmatmul.mubr.bf16.gmra.mrb[44].mxu0 %v3953_v25  ;;  %1499 = vmatmul.mubr.bf16.gmra.mrb[52].mxu1 %v3956_v27  ;;  %v4999_v25 = vld [vmem:[%s5688_s4 + $0x60] sm:$0xff]  }
  0x8d   :  { %3327 = vmatpush3.bf16.msra.mxu0 %v4469_v51  ;;  %3747 = vmatpush3.bf16.msra.mxu1 %v4651_v46  ;;  %v3969_v51 = vld [vmem:[%s5690_s1 + $0x1c] ss:$36 sps:$4 sm:$0xff]  }
  0x8e   :  { %3328 = vmatprep.subr.bf16.mxu0 %v4481_v53  ;;  %3748 = vmatprep.subr.bf16.mxu1 %v4666_v4  ;;  %v5732_v53 = vld [vmem:[#allocation5_spill] sm:$0xff]  ;;  %v5005_v27 = vld [vmem:[%s5688_s4 + $0xe0] sm:$0xff]  }
  0x8f   :  { %1442 = vmatprep.mubr.bf16.mxu0 %v3957_v29  ;;  %1506 = vmatprep.mubr.bf16.mxu1 %v3960_v31  ;;  %5735 = vst [vmem:[#allocation2_spill] sm:$0xff] %v5005_v27  ;;  %v2924_v29 = vcombine.high %v1158_v19, %v1158_v19  ;;  %v5011_v31 = vld [vmem:[%s5688_s4 + $0x20] sm:$0xff]   ;;  %v3988_v19 = vld [vmem:[%s5691_s2 + $0x4c] ss:$36 sps:$4 sm:$0xff]  }
  0x91   :  { %3329 = vmatpush3.bf16.msra.mxu0 %v4493_v55  ;;  %3749 = vmatpush3.bf16.msra.mxu1 %v4666_v4  ;;  %v3967_v55 = vld [vmem:[%s5690_s1 + $0x18] ss:$36 sps:$4 sm:$0xff]  }
  0x92   :  { %3330 = vmatprep.subr.bf16.mxu0 %v4517_v61  ;;  %3750 = vmatprep.subr.bf16.mxu1 %v4684_v0 }
  0x94   :  { %1443 = vmatmul.mubr.bf16.gmra.mrb[48].mxu0 %v3959_v36  ;;  %1507 = vmatmul.mubr.bf16.gmra.mrb[56].mxu1 %v3962_v37  ;;  %v5017_v36 = vld [vmem:[%s5688_s4 + $0xa0] sm:$0xff]   ;;  %v5023_v37 = vld [vmem:[%s5688_s4 + $0x68] sm:$0xff]  }
  0x95   :  { %3331 = vmatpush3.bf16.msra.mxu0 %v4529_v63  ;;  %3751 = vmatpush3.bf16.msra.mxu1 %v4684_v0  ;;  %5736 = vst [vmem:[#allocation3_spill] sm:$0xff] %v5017_v36 }
  0x96   :  { %3332 = vmatprep.subr.bf16.mxu0 %v5729_v42  ;;  %3752 = vmatprep.subr.bf16.mxu1 %v4699_v12 }
  0x97   :  { %1450 = vmatprep.mubr.bf16.mxu0 %v2920_v40  ;;  %1514 = vmatprep.mubr.bf16.mxu1 %v2922_v41  ;;  %v5035_v40 = vld [vmem:[%s5688_s4 + $0x28] sm:$0xff]  }
  0x98   :  { %v5041_v41 = vld [vmem:[%s5688_s4 + $0xa8] sm:$0xff]  }
  0x99   :  { %3333 = vmatpush3.bf16.msra.mxu0 %v5730_v49  ;;  %3753 = vmatpush3.bf16.msra.mxu1 %v4699_v12  ;;  %5738 = vst [vmem:[#allocation5_spill] sm:$0xff] %v5041_v41 }
  0x9a   :  { %3334 = vmatprep.subr.bf16.mxu0 %v5731_v50  ;;  %3754 = vmatprep.subr.bf16.mxu1 %v4708_v14 }
  0x9c   :  { %1451 = vmatmul.mubr.bf16.gmra.mrb[52].mxu0 %v2919_v43  ;;  %1515 = vmatmul.mubr.bf16.gmra.mrb[60].mxu1 %v2921_v48  ;;  %v5047_v43 = vld [vmem:[%s5688_s4 + $0x70] sm:$0xff]  }
  0x9d   :  { %3335 = vmatpush3.bf16.msra.mxu0 %v5732_v53  ;;  %3755 = vmatpush3.bf16.msra.mxu1 %v4708_v14  ;;  %v5053_v48 = vld [vmem:[%s5688_s4 + $0xf0] sm:$0xff]  }
  0x9e   :  { %3336 = vmatprep.subr.bf16.mxu0 %v5733_v54  ;;  %3756 = vmatprep.subr.bf16.mxu1 %v4720_v18  ;;  %5739 = vst [vmem:[#allocation6_spill] sm:$0xff] %v5053_v48 }
  0x9f   :  { %1554 = vmatprep.mubr.bf16.mxu0 %v3969_v51  ;;  %3758 = vmatprep.mubr.bf16.mxu1 %v3970_v52  ;;  %v3984_v51 = vld [vmem:[%s5691_s2 + $0x4] ss:$36 sps:$4 sm:$0xff]   ;;  %v5062_v52 = vld [vmem:[%s5688_s4 + $0x30] sm:$0xff]  }
  0xa1   :  { %3337 = vmatpush3.bf16.msra.mxu0 %v5734_v10  ;;  %3757 = vmatpush3.bf16.msra.mxu1 %v4720_v18 }
  0xa2   :  { %3374 = vmatprep.subr.bf16.mxu0 %v4879_v59  ;;  %3414 = vmatprep.subr.bf16.mxu1 %v4885_v2 }
  0xa4   :  { %1555 = vmatmul.mubr.bf16.vlgmr.msra.gmra.mrb[56].mxu0 %v3967_v55  ;;  %3759 = vmatmul.mubr.bf16.vlgmr.msra.gmra.mrb[64].mxu1 %v3971_v8  ;;  %v5068_v55 = vld [vmem:[%s5688_s4 + $0xb0] sm:$0xff]   ;;  %v5074_v8 = vld [vmem:[%s5688_s4 + $0x78] sm:$0xff]  }
  0xa5   :  { %3375 = vmatpush3.bf16.msra.mxu0 %v4897_v44  ;;  %3415 = vmatpush3.bf16.msra.mxu1 %v4903_v6  ;;  %5740 = vst [vmem:[#allocation7_spill] sm:$0xff] %v5068_v55 }
  0xa6   :  { %3376 = vmatprep.subr.bf16.mxu0 %v4909_v20  ;;  %3416 = vmatprep.subr.bf16.mxu1 %v4915_v22 }
  0xa7   :  { %1562 = vmatprep.mubr.bf16.mxu0 %v3972_v57  ;;  %3762 = vmatprep.mubr.bf16.mxu1 %v3978_v16  ;;  %v5080_v57 = vld [vmem:[%s5688_s4 + $0xf8] sm:$0xff]   ;;  %v3982_v16 = vld [vmem:[%s5691_s2] ss:$36 sps:$4 sm:$0xff]  }
  0xa8   :  { %5741 = vst [vmem:[#allocation8_spill] sm:$0xff] %v5080_v57 }
  0xa9   :  { %3377 = vmatpush3.bf16.msra.mxu0 %v4927_v28  ;;  %3417 = vmatpush3.bf16.msra.mxu1 %v4933_v1 }
  0xaa   :  { %3378 = vmatprep.subr.bf16.mxu0 %v4939_v30  ;;  %3418 = vmatprep.subr.bf16.mxu1 %v4945_v3 }
  0xac   :  { %1563 = vmatmul.mubr.bf16.gmra.mrb[60].mxu0 %v3974_v24  ;;  %3763 = vmatmul.mubr.bf16.gmra.mrb[68].mxu1 %v3979_v26  ;;  %v3985_v24 = vld [vmem:[%s5691_s2 + $0x8] ss:$36 sps:$4 sm:$0xff]   ;;  %v5092_v26 = vld [vmem:[%s5688_s4 + $0x38] sm:$0xff]  }
  0xad   :  { %3379 = vmatpush3.bf16.msra.mxu0 %v4957_v9  ;;  %3419 = vmatpush3.bf16.msra.mxu1 %v4963_v11 }
  0xae   :  { %3380 = vmatprep.subr.bf16.mxu0 %v4969_v13  ;;  %3420 = vmatprep.subr.bf16.mxu1 %v4975_v15 }
  0xaf   :  { %1570 = vmatprep.mubr.bf16.mxu0 %v3975_v5  ;;  %1951 = vmatprep.mubr.bf16.mxu1 %v3987_v7  ;;  %v5098_v5 = vld [vmem:[%s5688_s4 + $0xb8] sm:$0xff]   ;;  %v5104_v7 = vld [vmem:[%s5688_s4 + $0x140] sm:$0xff]  }
  0xb0   :  { %5742 = vst [vmem:[#allocation9_spill] sm:$0xff] %v5098_v5 }
  0xb1   :  { %3381 = vmatpush3.bf16.msra.mxu0 %v4987_v21  ;;  %3421 = vmatpush3.bf16.msra.mxu1 %v4993_v23 }
  0xb2   :  { %3382 = vmatprep.subr.bf16.mxu0 %v4999_v25  ;;  %3422 = vmatprep.subr.bf16.mxu1 %v5005_v27 }
  0xb4   :  { %1571 = vmatmul.mubr.bf16.gmra.mrb[64].mxu0 %v3977_v17  ;;  %v5110_v17 = vld [vmem:[%s5688_s4 + $0x1c0] sm:$0xff]  }
  0xb5   :  { %3383 = vmatpush3.bf16.msra.mxu0 %v5011_v31  ;;  %3423 = vmatpush3.bf16.msra.mxu1 %v5017_v36  ;;  %5743 = vst [vmem:[#allocation10_spill] sm:$0xff] %v5110_v17 }
  0xb6   :  { %3384 = vmatprep.subr.bf16.mxu0 %v5023_v37  ;;  %3424 = vmatprep.subr.bf16.mxu1 %v5029_v38  ;;  %v1681_v38 = vld [vmem:[%s5691_s2 + $0xe0] sm:$0xff] }
  0xb7   :  { %1578 = vmatprep.mubr.bf16.mxu0 %v2924_v29  ;;  %v3990_v29 = vld [vmem:[%s5691_s2 + $0x54] ss:$36 sps:$4 sm:$0xff]   ;;  %v2956_v36 = vcombine.high %v1681_v38, %v1681_v38 }
  0xb9   :  { %3385 = vmatpush3.bf16.msra.mxu0 %v5035_v40  ;;  %3425 = vmatpush3.bf16.msra.mxu1 %v5041_v41  ;;  %v1680_v41 = vld [vmem:[%s5691_s2 + $0xd8] sm:$0xff] }
  0xba   :  { %3386 = vmatprep.subr.bf16.mxu0 %v5047_v43  ;;  %3426 = vmatprep.subr.bf16.mxu1 %v5053_v48  ;;  %v5194_v48 = vld [vmem:[%s5688_s4 + $0x158] sm:$0xff]   ;;  %v2953_v27 = vcombine.low %v1680_v41, %v1680_v41 }
  0xbc   :  { %1579 = vmatmul.mubr.bf16.gmra.mrb[68].mxu0 %v2923_v39  ;;  %v5122_v39 = vld [vmem:[%s5688_s4 + $0x100] sm:$0xff]  }
  0xbd   :  { %3387 = vmatpush3.bf16.msra.mxu0 %v5062_v52  ;;  %3427 = vmatpush3.bf16.msra.mxu1 %v5068_v55  ;;  %v5182_v55 = vld [vmem:[%s5688_s4 + $0x110] sm:$0xff]  }
  0xbe   :  { %3388 = vmatprep.subr.bf16.mxu0 %v5074_v8  ;;  %3428 = vmatprep.subr.bf16.mxu1 %v5080_v57  ;;  %v3994_v57 = vld [vmem:[%s5691_s2 + $0x94] ss:$36 sps:$4 sm:$0xff]  }
  0xbf   :  { %1887 = vmatprep.mubr.bf16.mxu0 %v3984_v51  ;;  %v5128_v51 = vld [vmem:[%s5688_s4 + $0x180] sm:$0xff]  }
  0xc0   :  { %5744 = vst [vmem:[#allocation11_spill] sm:$0xff] %v5128_v51 }
  0xc1   :  { %3389 = vmatpush3.bf16.msra.mxu0 %v5092_v26  ;;  %3429 = vmatpush3.bf16.msra.mxu1 %v5098_v5  ;;  %v5152_v5 = vld [vmem:[%s5688_s4 + $0x108] sm:$0xff]  }
  0xc2   :  { %3454 = vmatprep.subr.bf16.mxu0 %v5104_v7  ;;  %3494 = vmatprep.subr.bf16.mxu1 %v5110_v17  ;;  %v5134_v17 = vld [vmem:[%s5688_s4 + $0x148] sm:$0xff]  }
  0xc4   :  { %1888 = vmatmul.mubr.bf16.vlgmr.msra.gmra.mrb[72].mxu0 %v3982_v16  ;;  %1952 = vmatmul.mubr.bf16.vlgmr.msra.gmra.mrb[72].mxu1 %v3985_v24  ;;  %v5140_v16 = vld [vmem:[%s5688_s4 + $0x1c8] sm:$0xff]  }
  0xc5   :  { %3455 = vmatpush3.bf16.msra.mxu0 %v5122_v39  ;;  %3495 = vmatpush3.bf16.msra.mxu1 %v5128_v51  ;;  %5745 = vst [vmem:[#allocation12_spill] sm:$0xff] %v5140_v16  ;;  %v3992_v24 = vld [vmem:[%s5691_s2 + $0x48] ss:$36 sps:$4 sm:$0xff]   ;;  %v3993_v51 = vld [vmem:[%s5691_s2 + $0x50] ss:$36 sps:$4 sm:$0xff]  }
  0xc6   :  { %3456 = vmatprep.subr.bf16.mxu0 %v5134_v17  ;;  %3496 = vmatprep.subr.bf16.mxu1 %v5140_v16  ;;  %v5170_v16 = vld [vmem:[%s5688_s4 + $0x1d0] sm:$0xff]  }
  0xc7   :  { %1895 = vmatprep.mubr.bf16.mxu0 %v3988_v19  ;;  %1959 = vmatprep.mubr.bf16.mxu1 %v3990_v29  ;;  %v5158_v19 = vld [vmem:[%s5688_s4 + $0x188] sm:$0xff]   ;;  %v5164_v29 = vld [vmem:[%s5688_s4 + $0x150] sm:$0xff]   ;;  %5747 = vst [vmem:[#allocation14_spill] sm:$0xff] %v5170_v16 }
  0xc8   :  { %5746 = vst [vmem:[#allocation13_spill] sm:$0xff] %v5158_v19 }
  0xc9   :  { %3457 = vmatpush3.bf16.msra.mxu0 %v5152_v5  ;;  %3497 = vmatpush3.bf16.msra.mxu1 %v5158_v19  ;;  %v3996_v19 = vld [vmem:[%s5691_s2 + $0x9c] ss:$36 sps:$4 sm:$0xff]  }
  0xca   :  { %3458 = vmatprep.subr.bf16.mxu0 %v5164_v29  ;;  %3498 = vmatprep.subr.bf16.mxu1 %v5170_v16  ;;  %v5188_v16 = vld [vmem:[%s5688_s4 + $0x190] sm:$0xff]  }
  0xcb   :  { %5748 = vst [vmem:[#allocation15_spill] sm:$0xff] %v5188_v16 }
  0xcc   :  { %1896 = vmatmul.mubr.bf16.gmra.mrb[76].mxu0 %v3992_v24  ;;  %1960 = vmatmul.mubr.bf16.gmra.mrb[76].mxu1 %v3993_v51  ;;  %v5200_v51 = vld [vmem:[%s5688_s4 + $0x1d8] sm:$0xff]   ;;  %v3998_v24 = vld [vmem:[%s5691_s2 + $0x90] ss:$36 sps:$4 sm:$0xff]  }
  0xcd   :  { %3459 = vmatpush3.bf16.msra.mxu0 %v5182_v55  ;;  %3499 = vmatpush3.bf16.msra.mxu1 %v5188_v16  ;;  %5749 = vst [vmem:[#allocation16_spill] sm:$0xff] %v5200_v51  ;;  %v3999_v16 = vld [vmem:[%s5691_s2 + $0x98] ss:$36 sps:$4 sm:$0xff]  }
  0xce   :  { %3460 = vmatprep.subr.bf16.mxu0 %v5194_v48  ;;  %3500 = vmatprep.subr.bf16.mxu1 %v5200_v51  ;;  %v2954_v51 = vcombine.high %v1680_v41, %v1680_v41 }
  0xcf   :  { %1903 = vmatprep.mubr.bf16.mxu0 %v3994_v57  ;;  %1967 = vmatprep.mubr.bf16.mxu1 %v3996_v19  ;;  %v5218_v57 = vld [vmem:[%s5688_s4 + $0x118] sm:$0xff]  }
  0xd0   :  { %v5224_v19 = vld [vmem:[%s5688_s4 + $0x198] sm:$0xff]  }
  0xd1   :  { %3461 = vmatpush3.bf16.msra.mxu0 %v5218_v57  ;;  %5750 = vst [vmem:[#allocation17_spill] sm:$0xff] %v5224_v19  ;;  %3501 = vmatpush3.bf16.msra.mxu1 %v5224_v19  ;;  %v2955_v19 = vcombine.low %v1681_v38, %v1681_v38 }
  0xd2   :  { %3462 = vmatprep.subr.bf16.mxu0 %v4512_v60  ;;  %3502 = vmatprep.subr.bf16.mxu1 %v4517_v61  ;;  %v4006_v60 = vld [vmem:[%s5691_s2 + $0x14] ss:$36 sps:$4 sm:$0xff]   ;;  %v4009_v61 = vld [vmem:[%s5691_s2 + $0x1c] ss:$36 sps:$4 sm:$0xff]  }
  0xd4   :  { %1904 = vmatmul.mubr.bf16.gmra.mrb[80].mxu0 %v3998_v24  ;;  %1968 = vmatmul.mubr.bf16.gmra.mrb[80].mxu1 %v3999_v16 }
  0xd5   :  { %3463 = vmatpush3.bf16.msra.mxu0 %v4523_v62  ;;  %3503 = vmatpush3.bf16.msra.mxu1 %v4529_v63  ;;  %v4004_v62 = vld [vmem:[%s5691_s2 + $0x10] ss:$36 sps:$4 sm:$0xff]   ;;  %v4007_v63 = vld [vmem:[%s5691_s2 + $0x18] ss:$36 sps:$4 sm:$0xff]  }
  0xd6   :  { %3464 = vmatprep.subr.bf16.mxu0 %v4535_v32  ;;  %3504 = vmatprep.subr.bf16.mxu1 %v5729_v42  ;;  %v4010_v32 = vld [vmem:[%s5691_s2 + $0x5c] ss:$36 sps:$4 sm:$0xff]  }
  0xd7   :  { %1911 = vmatprep.mubr.bf16.mxu0 %v2954_v51  ;;  %1975 = vmatprep.mubr.bf16.mxu1 %v2956_v36 }
  0xd9   :  { %3465 = vmatpush3.bf16.msra.mxu0 %v4547_v34  ;;  %3505 = vmatpush3.bf16.msra.mxu1 %v5730_v49  ;;  %v4013_v34 = vld [vmem:[%s5691_s2 + $0x64] ss:$36 sps:$4 sm:$0xff]  }
  0xda   :  { %3466 = vmatprep.subr.bf16.mxu0 %v4566_v58  ;;  %3506 = vmatprep.subr.bf16.mxu1 %v5731_v50  ;;  %v4015_v58 = vld [vmem:[%s5691_s2 + $0x60] ss:$36 sps:$4 sm:$0xff]  }
  0xdb   :  { %v4018_v49 = vld [vmem:[%s5691_s2 + $0xa0] ss:$36 sps:$4 sm:$0xff]  }
  0xdc   :  { %1912 = vmatmul.mubr.bf16.gmra.mrb[84].mxu0 %v2953_v27  ;;  %1976 = vmatmul.mubr.bf16.gmra.mrb[84].mxu1 %v2955_v19 }
  0xdd   :  { %3467 = vmatpush3.bf16.msra.mxu0 %v4576_v35  ;;  %3507 = vmatpush3.bf16.msra.mxu1 %v5732_v53  ;;  %v4012_v35 = vld [vmem:[%s5691_s2 + $0x58] ss:$36 sps:$4 sm:$0xff]  }
  0xde   :  { %3468 = vmatprep.subr.bf16.mxu0 %v4588_v45  ;;  %3508 = vmatprep.subr.bf16.mxu1 %v5733_v54  ;;  %v4019_v45 = vld [vmem:[%s5691_s2 + $0xac] ss:$36 sps:$4 sm:$0xff]  }
  0xdf   :  { %2015 = vmatprep.mubr.bf16.mxu0 %v4006_v60  ;;  %2079 = vmatprep.mubr.bf16.mxu1 %v4009_v61 }
  0xe1   :  { %3469 = vmatpush3.bf16.msra.mxu0 %v4601_v47  ;;  %3509 = vmatpush3.bf16.msra.mxu1 %v5734_v10 }
  0xe2   :  { %3766 = vmatprep.subr.bf16.mxu0 %v4627_v33  ;;  %3546 = vmatprep.subr.bf16.mxu1 %v4879_v59 }
  0xe4   :  { %2016 = vmatmul.mubr.bf16.vlgmr.msra.gmra.mrb[88].mxu0 %v4004_v62  ;;  %2080 = vmatmul.mubr.bf16.vlgmr.msra.gmra.mrb[88].mxu1 %v4007_v63  ;;  %v4026_v63 = vld [vmem:[%s5691_s2 + $0x20] ss:$36 sps:$4 sm:$0xff]  }
  0xe5   :  { %3767 = vmatpush3.bf16.msra.mxu0 %v4627_v33  ;;  %3547 = vmatpush3.bf16.msra.mxu1 %v4897_v44  ;;  %v4016_v33 = vld [vmem:[%s5691_s2 + $0xa4] ss:$36 sps:$4 sm:$0xff]  }
  0xe6   :  { %3768 = vmatprep.subr.bf16.mxu0 %v4632_v56  ;;  %3548 = vmatprep.subr.bf16.mxu1 %v4909_v20  ;;  %v1682_v20 = vld [vmem:[%s5691_s2 + $0xe8] sm:$0xff] }
  0xe7   :  { %2023 = vmatprep.mubr.bf16.mxu0 %v4010_v32  ;;  %2087 = vmatprep.mubr.bf16.mxu1 %v4013_v34  ;;  %v2958_v36 = vcombine.high %v1682_v20, %v1682_v20  ;;  %v4027_v34 = vld [vmem:[%s5691_s2 + $0x68] ss:$36 sps:$4 sm:$0xff]  }
  0xe9   :  { %3769 = vmatpush3.bf16.msra.mxu0 %v4632_v56  ;;  %3549 = vmatpush3.bf16.msra.mxu1 %v4927_v28  ;;  %v1683_v28 = vld [vmem:[%s5691_s2 + $0xf0] sm:$0xff] }
  0xea   :  { %3770 = vmatprep.subr.bf16.mxu0 %v4651_v46  ;;  %3550 = vmatprep.subr.bf16.mxu1 %v4939_v30  ;;  %v2960_v38 = vcombine.high %v1683_v28, %v1683_v28 }
  0xec   :  { %2024 = vmatmul.mubr.bf16.gmra.mrb[92].mxu0 %v4012_v35  ;;  %2088 = vmatmul.mubr.bf16.gmra.mrb[92].mxu1 %v4015_v58  ;;  %v4028_v35 = vld [vmem:[%s5692_s3] ss:$36 sps:$4 sm:$0xff]   ;;  %v4031_v58 = vld [vmem:[%s5691_s2 + $0xb0] ss:$36 sps:$4 sm:$0xff]  }
  0xed   :  { %3771 = vmatpush3.bf16.msra.mxu0 %v4651_v46  ;;  %3551 = vmatpush3.bf16.msra.mxu1 %v4957_v9  ;;  %v4021_v46 = vld [vmem:[%s5691_s2 + $0xa8] ss:$36 sps:$4 sm:$0xff]  }
  0xee   :  { %3772 = vmatprep.subr.bf16.mxu0 %v4666_v4  ;;  %3552 = vmatprep.subr.bf16.mxu1 %v4969_v13 }
  0xef   :  { %2031 = vmatprep.mubr.bf16.mxu0 %v4016_v33  ;;  %2095 = vmatprep.mubr.bf16.mxu1 %v4019_v45  ;;  %v4033_v33 = vld [vmem:[%s5692_s3 + $0x4c] ss:$36 sps:$4 sm:$0xff]  }
  0xf1   :  { %3773 = vmatpush3.bf16.msra.mxu0 %v4666_v4  ;;  %3553 = vmatpush3.bf16.msra.mxu1 %v4987_v21  ;;  %v2957_v21 = vcombine.low %v1682_v20, %v1682_v20 }
  0xf2   :  { %3774 = vmatprep.subr.bf16.mxu0 %v4684_v0  ;;  %3554 = vmatprep.subr.bf16.mxu1 %v4999_v25  ;;  %v2959_v25 = vcombine.low %v1683_v28, %v1683_v28 }
  0xf4   :  { %2032 = vmatmul.mubr.bf16.gmra.mrb[96].mxu0 %v4018_v49  ;;  %2096 = vmatmul.mubr.bf16.gmra.mrb[96].mxu1 %v4021_v46 }
  0xf5   :  { %3775 = vmatpush3.bf16.msra.mxu0 %v4684_v0  ;;  %3555 = vmatpush3.bf16.msra.mxu1 %v5011_v31 }
  0xf6   :  { %v3046_v47 = vpop.f32.mrb[0].mxu0  ;;  %3776 = vmatprep.subr.bf16.mxu0 %v4699_v12  ;;  %3556 = vmatprep.subr.bf16.mxu1 %v5023_v37 }
  0xf7   :  { %v3086_v56 = vpop.f32.mrb[0].mxu1  ;;  %v3047_v42 = vpop.f32.mrb[1].mxu0  ;;  %2039 = vmatprep.mubr.bf16.mxu0 %v2958_v36  ;;  %2103 = vmatprep.mubr.bf16.mxu1 %v2960_v38 }
  0xf8   :  { %v3048_v50 = vadd.f32 %v3047_v42, %v3046_v47  ;;  %v3087_v53 = vpop.f32.mrb[1].mxu1  ;;  %v3049_v54 = vpop.f32.mrb[2].mxu0 }
  0xf9   :  { %v3088_v10 = vadd.f32 %v3087_v53, %v3086_v56  ;;  %v3089_v59 = vpop.f32.mrb[2].mxu1  ;;  %v3050_v44 = vpop.f32.mrb[3].mxu0  ;;  %3777 = vmatpush3.bf16.msra.mxu0 %v4699_v12  ;;  %3557 = vmatpush3.bf16.msra.mxu1 %v5035_v40  ;;  %v4030_v12 = vld [vmem:[%s5692_s3 + $0x4] ss:$36 sps:$4 sm:$0xff]   ;;  %v4043_v53 = vld [vmem:[%s5692_s3 + $0xc] ss:$36 sps:$4 sm:$0xff]  }
  0xfa   :  { %v3051_v30 = vadd.f32 %v3050_v44, %v3049_v54  ;;  %v3090_v9 = vpop.f32.mrb[3].mxu1  ;;  %3778 = vmatprep.subr.bf16.mxu0 %v4708_v14  ;;  %3558 = vmatprep.subr.bf16.mxu1 %v5047_v43 }
  0xfb   :  { %v5303_v13 = vadd.f32 %v3088_v10, %v3048_v50  ;;  %v3091_v27 = vadd.f32 %v3090_v9, %v3089_v59  ;;  %v5752_v9 = vld [vmem:[#allocation3_spill] sm:$0xff] }
  0xfc   :  { %2040 = vmatmul.mubr.bf16.gmra.mrb[100].mxu0 %v2957_v21  ;;  %2104 = vmatmul.mubr.bf16.gmra.mrb[100].mxu1 %v2959_v25 }
  0xfd   :  { %v5305_v41 = vadd.f32 %v3091_v27, %v3051_v30  ;;  %3779 = vmatpush3.bf16.msra.mxu0 %v4708_v14  ;;  %3559 = vmatpush3.bf16.msra.mxu1 %v5062_v52  ;;  %v4127_v27 = vld [vmem:[%s5688_s4 + $0x120] sm:$0xff]  }
  0xfe   :  { %v3052_v4 = vpop.f32.mrb[4].mxu0  ;;  %3780 = vmatprep.subr.bf16.mxu0 %v4720_v18  ;;  %3560 = vmatprep.subr.bf16.mxu1 %v5074_v8 }
  0xff   :  { %v3092_v16 = vpop.f32.mrb[4].mxu1  ;;  %v3053_v51 = vpop.f32.mrb[5].mxu0  ;;  %3782 = vmatprep.mubr.bf16.mxu0 %v4026_v63  ;;  %2412 = vmatprep.mubr.bf16.mxu1 %v4030_v12  ;;  %v5755_v63 = vld [vmem:[#allocation6_spill] sm:$0xff]  ;;  %v4130_v12 = vld [vmem:[%s5688_s4 + $0x170] sm:$0xff]  }
 0x100   :  { %v3054_v24 = vadd.f32 %v3053_v51, %v3052_v4  ;;  %v3093_v19 = vpop.f32.mrb[5].mxu1  ;;  %v3055_v0 = vpop.f32.mrb[6].mxu0 }
 0x101   :  { %v3094_v31 = vadd.f32 %v3093_v19, %v3092_v16  ;;  %v3095_v37 = vpop.f32.mrb[6].mxu1  ;;  %v3056_v60 = vpop.f32.mrb[7].mxu0  ;;  %3781 = vmatpush3.bf16.msra.mxu0 %v4720_v18  ;;  %3561 = vmatpush3.bf16.msra.mxu1 %v5092_v26 }
 0x102   :  { %v3057_v61 = vadd.f32 %v3056_v60, %v3055_v0  ;;  %v3096_v62 = vpop.f32.mrb[7].mxu1  ;;  %3586 = vmatprep.subr.bf16.mxu0 %v4885_v2  ;;  %3626 = vmatprep.subr.bf16.mxu1 %v5104_v7 }
 0x103   :  { %v5321_v40 = vadd.f32 %v3094_v31, %v3054_v24  ;;  %v3097_v32 = vadd.f32 %v3096_v62, %v3095_v37  ;;  %v5754_v24 = vld [vmem:[#allocation5_spill] sm:$0xff]  ;;  %v4129_v37 = vld [vmem:[%s5688_s4 + $0x128] sm:$0xff]  }
 0x104   :  { %3783 = vmatmul.mubr.bf16.vlgmr.msra.gmra.mrb[104].mxu0 %v4027_v34  ;;  %2413 = vmatmul.mubr.bf16.vlgmr.msra.gmra.mrb[104].mxu1 %v4028_v35  ;;  %v4046_v34 = vld [vmem:[%s5692_s3 + $0x14] ss:$36 sps:$4 sm:$0xff]  }
 0x105   :  { %v5326_v43 = vadd.f32 %v3097_v32, %v3057_v61  ;;  %3587 = vmatpush3.bf16.msra.mxu0 %v4903_v6  ;;  %3627 = vmatpush3.bf16.msra.mxu1 %v5122_v39  ;;  %v4032_v6 = vld [vmem:[%s5691_s2 + $0xf8] ss:$0 sps:$4 sm:$0xff]   ;;  %v4035_v39 = vld [vmem:[%s5692_s3 + $0x48] ss:$36 sps:$4 sm:$0xff]  }
 0x106   :  { %v3058_v14 = vpop.f32.mrb[8].mxu0  ;;  %3588 = vmatprep.subr.bf16.mxu0 %v4915_v22  ;;  %3628 = vmatprep.subr.bf16.mxu1 %v5134_v17  ;;  %v4036_v17 = vld [vmem:[%s5692_s3 + $0x94] ss:$36 sps:$4 sm:$0xff]  }
 0x107   :  { %v3098_v52 = vpop.f32.mrb[8].mxu1  ;;  %v3059_v8 = vpop.f32.mrb[9].mxu0  ;;  %3786 = vmatprep.mubr.bf16.mxu0 %v4031_v58  ;;  %2420 = vmatprep.mubr.bf16.mxu1 %v4033_v33  ;;  %v5757_v58 = vld [vmem:[#allocation8_spill] sm:$0xff]  ;;  %v4132_v33 = vld [vmem:[%s5688_s4 + $0x178] sm:$0xff]  }
 0x108   :  { %v3060_v18 = vadd.f32 %v3059_v8, %v3058_v14  ;;  %v3099_v45 = vpop.f32.mrb[9].mxu1  ;;  %v3061_v26 = vpop.f32.mrb[10].mxu0 }
 0x109   :  { %v3100_v2 = vadd.f32 %v3099_v45, %v3098_v52  ;;  %v3101_v7 = vpop.f32.mrb[10].mxu1  ;;  %v3062_v47 = vpop.f32.mrb[11].mxu0  ;;  %3589 = vmatpush3.bf16.msra.mxu0 %v4933_v1  ;;  %3629 = vmatpush3.bf16.msra.mxu1 %v5152_v5  ;;  %v4131_v52 = vld [vmem:[%s5688_s4 + $0x130] sm:$0xff]  }
 0x10a   :  { %v3063_v56 = vadd.f32 %v3062_v47, %v3061_v26  ;;  %v3102_v42 = vpop.f32.mrb[11].mxu1  ;;  %3590 = vmatprep.subr.bf16.mxu0 %v4945_v3  ;;  %3630 = vmatprep.subr.bf16.mxu1 %v5164_v29  ;;  %v4041_v47 = vld [vmem:[%s5692_s3 + $0x8] ss:$36 sps:$4 sm:$0xff]  }
 0x10b   :  { %v5349_v49 = vadd.f32 %v3100_v2, %v3060_v18  ;;  %v3103_v50 = vadd.f32 %v3102_v42, %v3101_v7  ;;  %v5758_v42 = vld [vmem:[#allocation9_spill] sm:$0xff] }
 0x10c   :  { %3787 = vmatmul.mubr.bf16.gmra.mrb[108].mxu0 %v4032_v6  ;;  %2421 = vmatmul.mubr.bf16.gmra.mrb[108].mxu1 %v4035_v39 }
 0x10d   :  { %v5358_v22 = vadd.f32 %v3103_v50, %v3063_v56  ;;  %3591 = vmatpush3.bf16.msra.mxu0 %v4963_v11  ;;  %3631 = vmatpush3.bf16.msra.mxu1 %v5182_v55  ;;  %v4038_v11 = vld [vmem:[%s5692_s3 + $0x90] ss:$36 sps:$4 sm:$0xff]   ;;  %v2205_v55 = vld [vmem:[%s5692_s3 + $0xd8] sm:$0xff] }
 0x10e   :  { %v3064_v1 = vpop.f32.mrb[12].mxu0  ;;  %3592 = vmatprep.subr.bf16.mxu0 %v4975_v15  ;;  %3632 = vmatprep.subr.bf16.mxu1 %v5194_v48  ;;  %v5751_v15 = vld [vmem:[#allocation2_spill] sm:$0xff]  ;;  %v2990_v30 = vcombine.high %v2205_v55, %v2205_v55  ;;  %v2989_v51 = vcombine.low %v2205_v55, %v2205_v55  ;;  %v4044_v56 = vld [vmem:[%s5692_s3 + $0x10] ss:$36 sps:$4 sm:$0xff]  }
 0x10f   :  { %v3104_v54 = vpop.f32.mrb[12].mxu1  ;;  %v3065_v5 = vpop.f32.mrb[13].mxu0  ;;  %2428 = vmatprep.mubr.bf16.mxu1 %v4036_v17  ;;  %2476 = vmatprep.mubr.bf16.mxu0 %v4043_v53  ;;  %v4126_v48 = vld [vmem:[%s5688_s4 + $0x160] sm:$0xff]   ;;  %v4133_v17 = vld [vmem:[%s5688_s4 + $0x138] sm:$0xff]  }
 0x110   :  { %v3105_v3 = vpop.f32.mrb[13].mxu1  ;;  %v3066_v29 = vadd.f32 %v3065_v5, %v3064_v1  ;;  %v3067_v10 = vpop.f32.mrb[14].mxu0  ;;  %v5759_v5 = vld [vmem:[#allocation10_spill] sm:$0xff] }
 0x111   :  { %v3106_v46 = vadd.f32 %v3105_v3, %v3104_v54  ;;  %v3107_v59 = vpop.f32.mrb[14].mxu1  ;;  %v3068_v44 = vpop.f32.mrb[15].mxu0  ;;  %3593 = vmatpush3.bf16.msra.mxu0 %v4993_v23  ;;  %3633 = vmatpush3.bf16.msra.mxu1 %v5218_v57  ;;  %v5753_v23 = vld [vmem:[#allocation4_spill] sm:$0xff]  ;;  %v4128_v57 = vld [vmem:[%s5688_s4 + $0x168] sm:$0xff]   ;;  %v4134_v3 = vld [vmem:[%s5688_s4 + $0x200] sm:$0xff]  }
 0x112   :  { %v3108_v20 = vpop.f32.mrb[15].mxu1  ;;  %3594 = vmatprep.subr.bf16.mxu0 %v5751_v15  ;;  %3634 = vmatprep.subr.bf16.mxu1 %v4126_v48  ;;  %v4050_v10 = vld [vmem:[%s5692_s3 + $0x5c] ss:$36 sps:$4 sm:$0xff]   ;;  %v5760_v44 = vld [vmem:[#allocation11_spill] sm:$0xff] }
 0x113   :  { %v5379_v28 = vadd.f32 %v3106_v46, %v3066_v29  ;;  %v4047_v29 = vld [vmem:[%s5692_s3 + $0x54] ss:$36 sps:$4 sm:$0xff]  }
 0x114   :  { %2429 = vmatmul.mubr.bf16.gmra.mrb[112].mxu1 %v4038_v11  ;;  %v5761_v20 = vld [vmem:[#allocation12_spill] sm:$0xff] }
 0x115   :  { %3595 = vmatpush3.bf16.msra.mxu0 %v5752_v9  ;;  %3635 = vmatpush3.bf16.msra.mxu1 %v4127_v27 }
 0x116   :  { %v3126_v36 = vpop.f32.mrb[16].mxu0  ;;  %3596 = vmatprep.subr.bf16.mxu0 %v5753_v23  ;;  %3636 = vmatprep.subr.bf16.mxu1 %v4128_v57  ;;  %v4052_v23 = vld [vmem:[%s5692_s3 + $0x58] ss:$36 sps:$4 sm:$0xff]  }
 0x117   :  { %v3127_v38 = vpop.f32.mrb[17].mxu0  ;;  %v3166_v4 = vpop.f32.mrb[16].mxu1  ;;  %2436 = vmatprep.mubr.bf16.mxu1 %v2990_v30  ;;  %v4135_v30 = vld [vmem:[%s5688_s4 + $0x208] sm:$0xff]   ;;  %v5762_v57 = vld [vmem:[#allocation13_spill] sm:$0xff] }
 0x118   :  { %v3128_v21 = vadd.f32 %v3127_v38, %v3126_v36  ;;  %v3129_v25 = vpop.f32.mrb[18].mxu0  ;;  %v3167_v16 = vpop.f32.mrb[17].mxu1  ;;  %v4049_v36 = vld [vmem:[%s5692_s3 + $0x50] ss:$36 sps:$4 sm:$0xff]  }
 0x119   :  { %3597 = vmatpush3.bf16.msra.mxu0 %v5754_v24  ;;  %v3130_v19 = vpop.f32.mrb[19].mxu0  ;;  %v3168_v0 = vadd.f32 %v3167_v16, %v3166_v4  ;;  %v3169_v31 = vpop.f32.mrb[18].mxu1  ;;  %3637 = vmatpush3.bf16.msra.mxu1 %v4129_v37  ;;  %v5763_v24 = vld [vmem:[#allocation14_spill] sm:$0xff] }
 0x11a   :  { %v968_v60 = vadd.f32 %v3128_v21, %v5303_v13  ;;  %v3131_v61 = vadd.f32 %v3130_v19, %v3129_v25  ;;  %v3170_v62 = vpop.f32.mrb[19].mxu1  ;;  %3598 = vmatprep.subr.bf16.mxu0 %v5755_v63  ;;  %3638 = vmatprep.subr.bf16.mxu1 %v4130_v12  ;;  %v5756_v13 = vld [vmem:[#allocation7_spill] sm:$0xff]  ;;  %v4136_v19 = vld [vmem:[%s5688_s4 + $0x210] sm:$0xff]  }
 0x11b   :  { %v3171_v32 = vadd.f32 %v3170_v62, %v3169_v31  ;;  %v4056_v37 = vld [vmem:[%s5692_s3 + $0xa4] ss:$36 sps:$4 sm:$0xff]   ;;  %v5765_v63 = vld [vmem:[#allocation16_spill] sm:$0xff] }
 0x11c   :  { %v971_v35 = vadd.f32 %v3131_v61, %v5305_v41  ;;  %2437 = vmatmul.mubr.bf16.gmra.mrb[116].mxu1 %v2989_v51  ;;  %v5408_v14 = vadd.f32 %v3168_v0, %v968_v60  ;;  %v4053_v0 = vld [vmem:[%s5692_s3 + $0x9c] ss:$36 sps:$4 sm:$0xff]   ;;  %v5764_v61 = vld [vmem:[#allocation15_spill] sm:$0xff] }
 0x11d   :  { %3599 = vmatpush3.bf16.msra.mxu0 %v5756_v13  ;;  %3639 = vmatpush3.bf16.msra.mxu1 %v4131_v52  ;;  %v2206_v13 = vld [vmem:[%s5692_s3 + $0xe0] sm:$0xff] }
 0x11e   :  { %v3132_v8 = vpop.f32.mrb[20].mxu0  ;;  %3600 = vmatprep.subr.bf16.mxu0 %v5757_v58  ;;  %3640 = vmatprep.subr.bf16.mxu1 %v4132_v33  ;;  %v5418_v18 = vadd.f32 %v3171_v32, %v971_v35  ;;  %v4055_v35 = vld [vmem:[%s5692_s3 + $0x98] ss:$36 sps:$4 sm:$0xff]   ;;  %v4058_v33 = vld [vmem:[%s5692_s3 + $0xa0] ss:$36 sps:$4 sm:$0xff]  }
 0x11f   :  { %v3133_v41 = vpop.f32.mrb[21].mxu0  ;;  %v3172_v45 = vpop.f32.mrb[20].mxu1  ;;  %2540 = vmatprep.mubr.bf16.mxu1 %v4046_v34 }
 0x120   :  { %v3134_v26 = vadd.f32 %v3133_v41, %v3132_v8  ;;  %v3135_v2 = vpop.f32.mrb[22].mxu0  ;;  %v3173_v7 = vpop.f32.mrb[21].mxu1  ;;  %v2207_v41 = vld [vmem:[%s5692_s3 + $0xe8] sm:$0xff] }
 0x121   :  { %3601 = vmatpush3.bf16.msra.mxu0 %v5758_v42  ;;  %v3136_v50 = vpop.f32.mrb[23].mxu0  ;;  %v3174_v6 = vadd.f32 %v3173_v7, %v3172_v45  ;;  %v3175_v39 = vpop.f32.mrb[22].mxu1  ;;  %3641 = vmatpush3.bf16.msra.mxu1 %v4133_v17  ;;  %v5766_v45 = vld [vmem:[#allocation17_spill] sm:$0xff]  ;;  %v4139_v42 = vld [vmem:[%s5688_s4 + $0x220] sm:$0xff]  }
 0x122   :  { %v976_v53 = vadd.f32 %v3134_v26, %v5321_v40  ;;  %v3137_v1 = vadd.f32 %v3136_v50, %v3135_v2  ;;  %v3176_v54 = vpop.f32.mrb[23].mxu1  ;;  %3666 = vmatprep.subr.bf16.mxu0 %v5759_v5  ;;  %3790 = vmatprep.subr.bf16.mxu1 %v4134_v3  ;;  %v2992_v50 = vcombine.high %v2206_v13, %v2206_v13 }
 0x123   :  { %v3177_v46 = vadd.f32 %v3176_v54, %v3175_v39  ;;  %v2994_v39 = vcombine.high %v2207_v41, %v2207_v41  ;;  %v4142_v54 = vld [vmem:[%s5688_s4 + $0x228] sm:$0xff]  }
 0x124   :  { %v979_v40 = vadd.f32 %v3137_v1, %v5326_v43  ;;  %2477 = vmatmul.mubr.bf16.vlgmr.msra.gmra.mrb[112].mxu0 %v4041_v47  ;;  %2541 = vmatmul.mubr.bf16.vlgmr.msra.gmra.mrb[120].mxu1 %v4044_v56  ;;  %v5442_v59 = vadd.f32 %v3174_v6, %v976_v53  ;;  %v4138_v56 = vld [vmem:[%s5688_s4 + $0x1e0] sm:$0xff]   ;;  %v4141_v53 = vld [vmem:[%s5688_s4 + $0x1e8] sm:$0xff]  }
 0x125   :  { %3667 = vmatpush3.bf16.msra.mxu0 %v5760_v44  ;;  %3791 = vmatpush3.bf16.msra.mxu1 %v4134_v3 }
 0x126   :  { %v3138_v11 = vpop.f32.mrb[24].mxu0  ;;  %3668 = vmatprep.subr.bf16.mxu0 %v5761_v20  ;;  %2484 = vmatprep.mubr.bf16.mxu0 %v4047_v29  ;;  %v5446_v55 = vadd.f32 %v3177_v46, %v979_v40  ;;  %v2991_v46 = vcombine.low %v2206_v13, %v2206_v13  ;;  %v4143_v20 = vld [vmem:[%s5688_s4 + $0x1a8] sm:$0xff]   ;;  %v4070_v13 = vld [vmem:[%s5692_s3 + $0x60] ss:$36 sps:$4 sm:$0xff]  }
 0x127   :  { %v3139_v15 = vpop.f32.mrb[25].mxu0  ;;  %v3178_v48 = vpop.f32.mrb[24].mxu1  ;;  %3792 = vmatprep.subr.bf16.mxu1 %v4135_v30  ;;  %2548 = vmatprep.mubr.bf16.mxu1 %v4050_v10  ;;  %v2993_v10 = vcombine.low %v2207_v41, %v2207_v41 }
 0x128   :  { %v3140_v43 = vadd.f32 %v3139_v15, %v3138_v11  ;;  %v3141_v9 = vpop.f32.mrb[26].mxu0  ;;  %v3179_v27 = vpop.f32.mrb[25].mxu1 }
 0x129   :  { %3669 = vmatpush3.bf16.msra.mxu0 %v5762_v57  ;;  %v3142_v38 = vpop.f32.mrb[27].mxu0  ;;  %v3180_v4 = vadd.f32 %v3179_v27, %v3178_v48  ;;  %v3181_v21 = vpop.f32.mrb[26].mxu1  ;;  %3793 = vmatpush3.bf16.msra.mxu1 %v4135_v30  ;;  %v4146_v57 = vld [vmem:[%s5688_s4 + $0x1b0] sm:$0xff]  }
 0x12a   :  { %v984_v25 = vadd.f32 %v3140_v43, %v5349_v49  ;;  %v3143_v16 = vadd.f32 %v3142_v38, %v3141_v9  ;;  %v3182_v51 = vpop.f32.mrb[27].mxu1  ;;  %3670 = vmatprep.subr.bf16.mxu0 %v5763_v24  ;;  %3794 = vmatprep.subr.bf16.mxu1 %v4136_v19  ;;  %v4144_v43 = vld [vmem:[%s5688_s4 + $0x1f0] sm:$0xff]   ;;  %v4065_v9 = vld [vmem:[%s5692_s3 + $0x1c] ss:$36 sps:$4 sm:$0xff]   ;;  %v4067_v24 = vld [vmem:[%s5692_s3 + $0x68] ss:$36 sps:$4 sm:$0xff]  }
 0x12b   :  { %v3183_v31 = vadd.f32 %v3182_v51, %v3181_v21  ;;  %v4147_v38 = vld [vmem:[%s5688_s4 + $0x1f8] sm:$0xff]  }
 0x12c   :  { %v987_v49 = vadd.f32 %v3143_v16, %v5358_v22  ;;  %2485 = vmatmul.mubr.bf16.gmra.mrb[116].mxu0 %v4049_v36  ;;  %2549 = vmatmul.mubr.bf16.gmra.mrb[124].mxu1 %v4052_v23  ;;  %v5470_v60 = vadd.f32 %v3180_v4, %v984_v25  ;;  %v4137_v22 = vld [vmem:[%s5688_s4 + $0x218] sm:$0xff]  }
 0x12d   :  { %3671 = vmatpush3.bf16.msra.mxu0 %v5764_v61  ;;  %3795 = vmatpush3.bf16.msra.mxu1 %v4136_v19  ;;  %v4148_v4 = vld [vmem:[%s5688_s4 + $0x238] sm:$0xff]  }
 0x12e   :  { %v3144_v62 = vpop.f32.mrb[28].mxu0  ;;  %3672 = vmatprep.subr.bf16.mxu0 %v5765_v63  ;;  %2492 = vmatprep.mubr.bf16.mxu0 %v4053_v0  ;;  %v5474_v12 = vadd.f32 %v3183_v31, %v987_v49  ;;  %v4063_v51 = vld [vmem:[%s5692_s3 + $0x18] ss:$36 sps:$4 sm:$0xff]   ;;  %v4068_v49 = vld [vmem:[%s5692_s3 + $0x64] ss:$36 sps:$4 sm:$0xff]  }
 0x12f   :  { %v3145_v32 = vpop.f32.mrb[29].mxu0  ;;  %v3184_v34 = vpop.f32.mrb[28].mxu1  ;;  %3796 = vmatprep.subr.bf16.mxu1 %v4137_v22  ;;  %2556 = vmatprep.mubr.bf16.mxu1 %v4056_v37  ;;  %v4149_v37 = vld [vmem:[%s5688_s4 + $0x1b8] sm:$0xff]   ;;  %v4074_v63 = vld [vmem:[%s5692_s3 + $0xb0] ss:$36 sps:$4 sm:$0xff]  }
 0x130   :  { %v3146_v52 = vadd.f32 %v3145_v32, %v3144_v62  ;;  %v3147_v8 = vpop.f32.mrb[30].mxu0  ;;  %v3185_v58 = vpop.f32.mrb[29].mxu1 }
 0x131   :  { %3673 = vmatpush3.bf16.msra.mxu0 %v5766_v45  ;;  %v3148_v26 = vpop.f32.mrb[31].mxu0  ;;  %v3186_v2 = vadd.f32 %v3185_v58, %v3184_v34  ;;  %3797 = vmatpush3.bf16.msra.mxu1 %v4137_v22  ;;  %v3187_v7 = vpop.f32.mrb[30].mxu1  ;;  %v4075_v8 = vld [vmem:[%s5692_s3 + $0xf8] ss:$0 sps:$4 sm:$0xff]  }
 0x132   :  { %v992_v47 = vadd.f32 %v3146_v52, %v5379_v28  ;;  %3674 = vmatprep.subr.bf16.mxu0 %v4138_v56  ;;  %3798 = vmatprep.subr.bf16.mxu1 %v4139_v42  ;;  %v3188_v6 = vpop.f32.mrb[31].mxu1  ;;  %v4140_v28 = vld [vmem:[%s5688_s4 + $0x1a0] sm:$0xff]   ;;  %v2208_v26 = vld [vmem:[%s5692_s3 + $0xf0] sm:$0xff]  ;;  %v4073_v7 = vld [vmem:[%s5692_s3 + $0xa8] ss:$36 sps:$4 sm:$0xff]  }
 0x134   :  { %2493 = vmatmul.mubr.bf16.gmra.mrb[120].mxu0 %v4055_v35  ;;  %2557 = vmatmul.mubr.bf16.gmra.mrb[128].mxu1 %v4058_v33  ;;  %v1056_v17 = vadd.f32 %v3186_v2, %v992_v47 }
 0x135   :  { %3675 = vmatpush3.bf16.msra.mxu0 %v4140_v28  ;;  %3799 = vmatpush3.bf16.msra.mxu1 %v4139_v42 }
 0x136   :  { %3676 = vmatprep.subr.bf16.mxu0 %v4141_v53  ;;  %2500 = vmatprep.mubr.bf16.mxu0 %v2992_v50  ;;  %v2996_v50 = vcombine.high %v2208_v26, %v2208_v26 }
 0x137   :  { %v3736_v1 = vpop.f32.mrb[32].mxu0  ;;  %3800 = vmatprep.subr.bf16.mxu1 %v4142_v54  ;;  %2564 = vmatprep.mubr.bf16.mxu1 %v2994_v39  ;;  %v3218_v5 = vpop.f32.mrb[32].mxu1 }
 0x138   :  { %v5509_v3 = vadd.f32 %v3736_v1, %v5442_v59  ;;  %v1095_v29 = vpop.f32.mrb[33].mxu0  ;;  %v3219_v40 = vpop.f32.mrb[33].mxu1  ;;  %v2995_v1 = vcombine.low %v2208_v26, %v2208_v26 }
 0x139   :  { %v5512_v44 = vadd.f32 %v1095_v29, %v5408_v14  ;;  %v3737_v11 = vpop.f32.mrb[34].mxu0  ;;  %3677 = vmatpush3.bf16.msra.mxu0 %v4143_v20  ;;  %3801 = vmatpush3.bf16.msra.mxu1 %v4142_v54  ;;  %v5517_v15 = vadd.f32 %v3219_v40, %v3218_v5  ;;  %v3221_v48 = vpop.f32.mrb[34].mxu1  ;;  %v4145_v14 = vld [vmem:[%s5688_s4 + $0x230] sm:$0xff]  }
 0x13a   :  { %v5520_v59 = vadd.f32 %v3737_v11, %v5446_v55  ;;  %v1098_v30 = vpop.f32.mrb[35].mxu0  ;;  %3678 = vmatprep.subr.bf16.mxu0 %v4144_v43  ;;  %3802 = vmatprep.subr.bf16.mxu1 %v4145_v14  ;;  %v3222_v27 = vpop.f32.mrb[35].mxu1  ;;  %v4066_v55 = vld [vmem:[%s5692_s3 + $0x20] ss:$36 sps:$4 sm:$0xff]  }
 0x13b   :  { %v5532_v36 = vadd.f32 %v1098_v30, %v5418_v18  ;;  %v5537_v23 = vadd.f32 %v3222_v27, %v3221_v48 }
 0x13c   :  { %2501 = vmatmul.mubr.bf16.gmra.mrb[124].mxu0 %v2991_v46  ;;  %2565 = vmatmul.mubr.bf16.gmra.mrb[132].mxu1 %v2993_v10 }
 0x13d   :  { %3679 = vmatpush3.bf16.msra.mxu0 %v4146_v57  ;;  %3803 = vmatpush3.bf16.msra.mxu1 %v4145_v14 }
 0x13e   :  { %3680 = vmatprep.subr.bf16.mxu0 %v4147_v38  ;;  %2604 = vmatprep.mubr.bf16.mxu0 %v4065_v9 }
 0x13f   :  { %v3740_v18 = vpop.f32.mrb[36].mxu0  ;;  %3804 = vmatprep.subr.bf16.mxu1 %v4148_v4  ;;  %3806 = vmatprep.mubr.bf16.mxu1 %v4066_v55  ;;  %v3224_v21 = vpop.f32.mrb[36].mxu1 }
 0x140   :  { %v5548_v25 = vadd.f32 %v3740_v18, %v1056_v17  ;;  %v1111_v16 = vpop.f32.mrb[37].mxu0  ;;  %v3225_v19 = vpop.f32.mrb[37].mxu1 }
 0x141   :  { %v5557_v0 = vadd.f32 %v1111_v16, %v5470_v60  ;;  %v3741_v31 = vpop.f32.mrb[38].mxu0  ;;  %3681 = vmatpush3.bf16.msra.mxu0 %v4149_v37  ;;  %3805 = vmatpush3.bf16.msra.mxu1 %v4148_v4  ;;  %v3226_v61 = vadd.f32 %v3225_v19, %v3224_v21  ;;  %v3227_v62 = vpop.f32.mrb[38].mxu1 }
 0x142   :  { %v1114_v32 = vpop.f32.mrb[39].mxu0  ;;  %v3228_v60 = vpop.f32.mrb[39].mxu1 }
 0x143   :  { %v5569_v34 = vadd.f32 %v1114_v32, %v5474_v12  ;;  %v3229_v35 = vadd.f32 %v3228_v60, %v3227_v62  ;;  %v4071_v12 = vld [vmem:[%s5692_s3 + $0xac] ss:$36 sps:$4 sm:$0xff]  }
 0x144   :  { %2605 = vmatmul.mubr.bf16.vlgmr.msra.gmra.mrb[128].mxu0 %v4063_v51  ;;  %3807 = vmatmul.mubr.bf16.vlgmr.msra.gmra.mrb[136].mxu1 %v4067_v24 }
 0x145   :  { %2612 = vmatprep.mubr.bf16.mxu0 %v4068_v49  ;;  %3810 = vmatprep.mubr.bf16.mxu1 %v4074_v63 }
 0x147   :  { %v3230_v22 = vpop.f32.mrb[40].mxu1 }
 0x148   :  { %v3231_v52 = vpop.f32.mrb[41].mxu1 }
 0x149   :  { %v3232_v58 = vadd.f32 %v3231_v52, %v3230_v22  ;;  %v3233_v33 = vpop.f32.mrb[42].mxu1 }
 0x14a   :  { %v3234_v41 = vpop.f32.mrb[43].mxu1 }
 0x14b   :  { %v3235_v45 = vadd.f32 %v3234_v41, %v3233_v33 }
 0x14c   :  { %2613 = vmatmul.mubr.bf16.gmra.mrb[132].mxu0 %v4070_v13  ;;  %3811 = vmatmul.mubr.bf16.gmra.mrb[140].mxu1 %v4075_v8 }
 0x14d   :  { %2620 = vmatprep.mubr.bf16.mxu0 %v4071_v12 }
 0x14f   :  { %v3236_v2 = vpop.f32.mrb[44].mxu1 }
 0x150   :  { %v3237_v47 = vpop.f32.mrb[45].mxu1 }
 0x151   :  { %v5586_v56 = vadd.f32 %v3237_v47, %v3236_v2  ;;  %v3239_v42 = vpop.f32.mrb[46].mxu1 }
 0x152   :  { %v3240_v6 = vpop.f32.mrb[47].mxu1 }
 0x154   :  { %2621 = vmatmul.mubr.bf16.gmra.mrb[136].mxu0 %v4073_v7 }
 0x155   :  { %2628 = vmatprep.mubr.bf16.mxu0 %v2996_v50 }
 0x157   :  { %v3258_v39 = vpop.f32.mrb[40].mxu0  ;;  %v3298_v17 = vpop.f32.mrb[48].mxu1 }
 0x158   :  { %v3259_v28 = vpop.f32.mrb[41].mxu0  ;;  %v3299_v53 = vpop.f32.mrb[49].mxu1 }
 0x159   :  { %v3260_v54 = vadd.f32 %v3259_v28, %v3258_v39  ;;  %v3261_v5 = vpop.f32.mrb[42].mxu0  ;;  %v3300_v29 = vadd.f32 %v3299_v53, %v3298_v17  ;;  %v3301_v46 = vpop.f32.mrb[50].mxu1 }
 0x15a   :  { %v3262_v10 = vpop.f32.mrb[43].mxu0  ;;  %v3302_v40 = vpop.f32.mrb[51].mxu1 }
 0x15b   :  { %v1429_v11 = vadd.f32 %v3260_v54, %v5517_v15  ;;  %v3263_v20 = vadd.f32 %v3262_v10, %v3261_v5  ;;  %v3303_v48 = vadd.f32 %v3302_v40, %v3301_v46 }
 0x15c   :  { %2629 = vmatmul.mubr.bf16.gmra.mrb[140].mxu0 %v2995_v1 }
 0x15d   :  { %v1432_v30 = vadd.f32 %v3263_v20, %v5537_v23  ;;  %v1493_v43 = vadd.f32 %v3300_v29, %v1429_v11 }
 0x15f   :  { %v1496_v14 = vadd.f32 %v3303_v48, %v1432_v30  ;;  %v3264_v9 = vpop.f32.mrb[44].mxu0  ;;  %v3304_v27 = vpop.f32.mrb[52].mxu1 }
 0x160   :  { %v3265_v55 = vpop.f32.mrb[45].mxu0  ;;  %v3305_v57 = vpop.f32.mrb[53].mxu1 }
 0x161   :  { %v3266_v38 = vadd.f32 %v3265_v55, %v3264_v9  ;;  %v3267_v18 = vpop.f32.mrb[46].mxu0  ;;  %v3306_v4 = vadd.f32 %v3305_v57, %v3304_v27  ;;  %v3307_v21 = vpop.f32.mrb[54].mxu1 }
 0x162   :  { %v3268_v16 = vpop.f32.mrb[47].mxu0  ;;  %v3308_v51 = vpop.f32.mrb[55].mxu1 }
 0x163   :  { %v1437_v24 = vadd.f32 %v3266_v38, %v3226_v61  ;;  %v3269_v19 = vadd.f32 %v3268_v16, %v3267_v18  ;;  %v3309_v15 = vadd.f32 %v3308_v51, %v3307_v21 }
 0x165   :  { %v1440_v31 = vadd.f32 %v3269_v19, %v3229_v35  ;;  %v1501_v37 = vadd.f32 %v3306_v4, %v1437_v24 }
 0x167   :  { %v1504_v49 = vadd.f32 %v3309_v15, %v1440_v31  ;;  %v3270_v62 = vpop.f32.mrb[48].mxu0  ;;  %v3310_v23 = vpop.f32.mrb[56].mxu1 }
 0x168   :  { %v3271_v63 = vpop.f32.mrb[49].mxu0  ;;  %v3311_v32 = vpop.f32.mrb[57].mxu1 }
 0x169   :  { %v3272_v60 = vadd.f32 %v3271_v63, %v3270_v62  ;;  %v3273_v22 = vpop.f32.mrb[50].mxu0  ;;  %v3312_v13 = vadd.f32 %v3311_v32, %v3310_v23  ;;  %v3313_v52 = vpop.f32.mrb[58].mxu1 }
 0x16a   :  { %v3274_v8 = vpop.f32.mrb[51].mxu0  ;;  %v3314_v33 = vpop.f32.mrb[59].mxu1 }
 0x16b   :  { %v1445_v12 = vadd.f32 %v3272_v60, %v3232_v58  ;;  %v3275_v41 = vadd.f32 %v3274_v8, %v3273_v22  ;;  %v3315_v26 = vadd.f32 %v3314_v33, %v3313_v52 }
 0x16d   :  { %v1448_v2 = vadd.f32 %v3275_v41, %v3235_v45  ;;  %v1509_v61 = vadd.f32 %v3312_v13, %v1445_v12 }
 0x16f   :  { %v1512_v7 = vadd.f32 %v3315_v26, %v1448_v2  ;;  %v3276_v47 = vpop.f32.mrb[52].mxu0  ;;  %v3316_v35 = vpop.f32.mrb[60].mxu1 }
 0x170   :  { %v3277_v42 = vpop.f32.mrb[53].mxu0  ;;  %v3317_v50 = vpop.f32.mrb[61].mxu1 }
 0x171   :  { %v3278_v6 = vadd.f32 %v3277_v42, %v3276_v47  ;;  %v3279_v39 = vpop.f32.mrb[54].mxu0  ;;  %v3318_v17 = vadd.f32 %v3317_v50, %v3316_v35  ;;  %v3319_v28 = vpop.f32.mrb[62].mxu1 }
 0x172   :  { %v3280_v53 = vpop.f32.mrb[55].mxu0  ;;  %v3320_v1 = vpop.f32.mrb[63].mxu1 }
 0x173   :  { %v1453_v54 = vadd.f32 %v3278_v6, %v5586_v56 }
 0x175   :  { %v1517_v5 = vadd.f32 %v3318_v17, %v1453_v54 }
 0x177   :  { %v3338_v29 = vpop.f32.mrb[56].mxu0  ;;  %v3760_v58 = vpop.f32.mrb[64].mxu1 }
 0x178   :  { %v3339_v46 = vpop.f32.mrb[57].mxu0  ;;  %v1620_v10 = vpop.f32.mrb[65].mxu1 }
 0x179   :  { %v3340_v45 = vadd.f32 %v3339_v46, %v3338_v29  ;;  %v3341_v40 = vpop.f32.mrb[58].mxu0  ;;  %v3761_v11 = vpop.f32.mrb[66].mxu1 }
 0x17a   :  { %v3342_v20 = vpop.f32.mrb[59].mxu0  ;;  %v1623_v48 = vpop.f32.mrb[67].mxu1 }
 0x17b   :  { %v3343_v30 = vadd.f32 %v3342_v20, %v3341_v40  ;;  %v1557_v9 = vadd.f32 %v3340_v45, %v1493_v43 }
 0x17d   :  { %v5591_v27 = vadd.f32 %v1620_v10, %v1557_v9  ;;  %v1560_v55 = vadd.f32 %v3343_v30, %v1496_v14 }
 0x17f   :  { %v2700_v57 = vmax.f32 %v5512_v44, %v5591_v27  ;;  %v5595_v38 = vadd.f32 %v1623_v48, %v1560_v55  ;;  %v3344_v56 = vpop.f32.mrb[60].mxu0  ;;  %v3764_v18 = vpop.f32.mrb[68].mxu1 }
 0x180   :  { %v3345_v4 = vpop.f32.mrb[61].mxu0  ;;  %v1636_v21 = vpop.f32.mrb[69].mxu1 }
 0x181   :  { %v2701_v16 = vmax.f32 %v5532_v36, %v5595_v38  ;;  %v3346_v51 = vadd.f32 %v3345_v4, %v3344_v56  ;;  %v3347_v24 = vpop.f32.mrb[62].mxu0  ;;  %v3765_v19 = vpop.f32.mrb[70].mxu1 }
 0x182   :  { %v3348_v15 = vpop.f32.mrb[63].mxu0  ;;  %v1639_v43 = vpop.f32.mrb[71].mxu1 }
 0x183   :  { %v1565_v31 = vadd.f32 %v3346_v51, %v1501_v37  ;;  %v3349_v62 = vadd.f32 %v3348_v15, %v3347_v24 }
 0x185   :  { %v5599_v14 = vadd.f32 %v3760_v58, %v1565_v31  ;;  %v1568_v23 = vadd.f32 %v3349_v62, %v1504_v49 }
 0x187   :  { %v2702_v63 = vmax.f32 %v5509_v3, %v5599_v14  ;;  %v5603_v32 = vadd.f32 %v3761_v11, %v1568_v23  ;;  %v3350_v60 = vpop.f32.mrb[64].mxu0 }
 0x188   :  { %v3351_v22 = vpop.f32.mrb[65].mxu0 }
 0x189   :  { %v2703_v13 = vmax.f32 %v5520_v59, %v5603_v32  ;;  %v3352_v52 = vadd.f32 %v3351_v22, %v3350_v60  ;;  %v3353_v8 = vpop.f32.mrb[66].mxu0 }
 0x18a   :  { %v3354_v33 = vpop.f32.mrb[67].mxu0 }
 0x18b   :  { %v3355_v12 = vadd.f32 %v3354_v33, %v3353_v8  ;;  %v1573_v41 = vadd.f32 %v3352_v52, %v1509_v61 }
 0x18d   :  { %v5607_v37 = vadd.f32 %v1636_v21, %v1573_v41  ;;  %v1576_v26 = vadd.f32 %v3355_v12, %v1512_v7 }
 0x18f   :  { %v2704_v49 = vmax.f32 %v5557_v0, %v5607_v37  ;;  %v5611_v2 = vadd.f32 %v1639_v43, %v1576_v26  ;;  %v3356_v47 = vpop.f32.mrb[68].mxu0 }
 0x190   :  { %v3357_v35 = vpop.f32.mrb[69].mxu0 }
 0x191   :  { %v2705_v42 = vmax.f32 %v5569_v34, %v5611_v2  ;;  %v3358_v50 = vadd.f32 %v3357_v35, %v3356_v47  ;;  %v3359_v6 = vpop.f32.mrb[70].mxu0 }
 0x192   :  { %v3360_v39 = vpop.f32.mrb[71].mxu0 }
 0x193   :  { %v1581_v17 = vadd.f32 %v3358_v50, %v1517_v5 }
 0x195   :  { %v5615_v28 = vadd.f32 %v3764_v18, %v1581_v17 }
 0x197   :  { %v2706_v61 = vmax.f32 %v5548_v25, %v5615_v28  ;;  %v3390_v7 = vpop.f32.mrb[72].mxu0  ;;  %v3430_v53 = vpop.f32.mrb[72].mxu1 }
 0x198   :  { %v3391_v1 = vpop.f32.mrb[73].mxu0  ;;  %v3431_v54 = vpop.f32.mrb[73].mxu1 }
 0x199   :  { %v3392_v29 = vadd.f32 %v3391_v1, %v3390_v7  ;;  %v3432_v58 = vadd.f32 %v3431_v54, %v3430_v53  ;;  %v3393_v46 = vpop.f32.mrb[74].mxu0  ;;  %v3433_v10 = vpop.f32.mrb[74].mxu1 }
 0x19a   :  { %v3394_v45 = vpop.f32.mrb[75].mxu0  ;;  %v3434_v40 = vpop.f32.mrb[75].mxu1 }
 0x19b   :  { %v1954_v11 = vadd.f32 %v3432_v58, %v3392_v29  ;;  %v3395_v20 = vadd.f32 %v3394_v45, %v3393_v46  ;;  %v3435_v48 = vadd.f32 %v3434_v40, %v3433_v10 }
 0x19d   :  { %v1957_v30 = vadd.f32 %v3435_v48, %v3395_v20 }
 0x19f   :  { %v3396_v5 = vpop.f32.mrb[76].mxu0  ;;  %v3436_v9 = vpop.f32.mrb[76].mxu1 }
 0x1a0   :  { %v3397_v55 = vpop.f32.mrb[77].mxu0  ;;  %v3437_v56 = vpop.f32.mrb[77].mxu1 }
 0x1a1   :  { %v3398_v18 = vadd.f32 %v3397_v55, %v3396_v5  ;;  %v3438_v4 = vadd.f32 %v3437_v56, %v3436_v9  ;;  %v3399_v21 = vpop.f32.mrb[78].mxu0  ;;  %v3439_v51 = vpop.f32.mrb[78].mxu1 }
 0x1a2   :  { %v3400_v24 = vpop.f32.mrb[79].mxu0  ;;  %v3440_v19 = vpop.f32.mrb[79].mxu1 }
 0x1a3   :  { %v1962_v15 = vadd.f32 %v3438_v4, %v3398_v18  ;;  %v3401_v43 = vadd.f32 %v3400_v24, %v3399_v21  ;;  %v3441_v31 = vadd.f32 %v3440_v19, %v3439_v51 }
 0x1a5   :  { %v1965_v62 = vadd.f32 %v3441_v31, %v3401_v43 }
 0x1a7   :  { %v3402_v23 = vpop.f32.mrb[80].mxu0  ;;  %v3442_v60 = vpop.f32.mrb[80].mxu1 }
 0x1a8   :  { %v3403_v22 = vpop.f32.mrb[81].mxu0  ;;  %v3443_v52 = vpop.f32.mrb[81].mxu1 }
 0x1a9   :  { %v3404_v8 = vadd.f32 %v3403_v22, %v3402_v23  ;;  %v3444_v33 = vadd.f32 %v3443_v52, %v3442_v60  ;;  %v3405_v12 = vpop.f32.mrb[82].mxu0  ;;  %v3445_v41 = vpop.f32.mrb[82].mxu1 }
 0x1aa   :  { %v3406_v26 = vpop.f32.mrb[83].mxu0  ;;  %v3446_v47 = vpop.f32.mrb[83].mxu1 }
 0x1ab   :  { %v1970_v35 = vadd.f32 %v3444_v33, %v3404_v8  ;;  %v3407_v50 = vadd.f32 %v3406_v26, %v3405_v12  ;;  %v3447_v6 = vadd.f32 %v3446_v47, %v3445_v41 }
 0x1ad   :  { %v1973_v39 = vadd.f32 %v3447_v6, %v3407_v50 }
 0x1af   :  { %v3408_v17 = vpop.f32.mrb[84].mxu0  ;;  %v3448_v7 = vpop.f32.mrb[84].mxu1 }
 0x1b0   :  { %v3409_v53 = vpop.f32.mrb[85].mxu0  ;;  %v3449_v1 = vpop.f32.mrb[85].mxu1 }
 0x1b1   :  { %v3410_v54 = vadd.f32 %v3409_v53, %v3408_v17  ;;  %v3450_v29 = vadd.f32 %v3449_v1, %v3448_v7  ;;  %v3411_v58 = vpop.f32.mrb[86].mxu0  ;;  %v3451_v46 = vpop.f32.mrb[86].mxu1 }
 0x1b2   :  { %v3412_v10 = vpop.f32.mrb[87].mxu0  ;;  %v3452_v45 = vpop.f32.mrb[87].mxu1 }
 0x1b3   :  { %v1978_v40 = vadd.f32 %v3450_v29, %v3410_v54 }
 0x1b7   :  { %v3470_v20 = vpop.f32.mrb[88].mxu0  ;;  %v3510_v48 = vpop.f32.mrb[88].mxu1 }
 0x1b8   :  { %v3471_v5 = vpop.f32.mrb[89].mxu0  ;;  %v3511_v9 = vpop.f32.mrb[89].mxu1 }
 0x1b9   :  { %v3472_v55 = vadd.f32 %v3471_v5, %v3470_v20  ;;  %v3473_v56 = vpop.f32.mrb[90].mxu0  ;;  %v3512_v18 = vadd.f32 %v3511_v9, %v3510_v48  ;;  %v3513_v4 = vpop.f32.mrb[90].mxu1 }
 0x1ba   :  { %v3474_v21 = vpop.f32.mrb[91].mxu0  ;;  %v3514_v51 = vpop.f32.mrb[91].mxu1 }
 0x1bb   :  { %v2018_v24 = vadd.f32 %v3472_v55, %v1954_v11  ;;  %v3475_v19 = vadd.f32 %v3474_v21, %v3473_v56  ;;  %v3515_v43 = vadd.f32 %v3514_v51, %v3513_v4 }
 0x1bd   :  { %v2021_v31 = vadd.f32 %v3475_v19, %v1957_v30  ;;  %v2082_v23 = vadd.f32 %v3512_v18, %v2018_v24 }
 0x1bf   :  { %v3476_v60 = vpop.f32.mrb[92].mxu0  ;;  %v3516_v22 = vpop.f32.mrb[92].mxu1  ;;  %v2085_v52 = vadd.f32 %v3515_v43, %v2021_v31 }
 0x1c0   :  { %v3477_v8 = vpop.f32.mrb[93].mxu0  ;;  %v3517_v33 = vpop.f32.mrb[93].mxu1 }
 0x1c1   :  { %v3478_v12 = vadd.f32 %v3477_v8, %v3476_v60  ;;  %v3479_v41 = vpop.f32.mrb[94].mxu0  ;;  %v3518_v26 = vadd.f32 %v3517_v33, %v3516_v22  ;;  %v3519_v47 = vpop.f32.mrb[94].mxu1 }
 0x1c2   :  { %v3480_v50 = vpop.f32.mrb[95].mxu0  ;;  %v3520_v6 = vpop.f32.mrb[95].mxu1 }
 0x1c3   :  { %v2026_v17 = vadd.f32 %v3478_v12, %v1962_v15  ;;  %v3481_v7 = vadd.f32 %v3480_v50, %v3479_v41  ;;  %v3521_v53 = vadd.f32 %v3520_v6, %v3519_v47 }
 0x1c5   :  { %v2029_v1 = vadd.f32 %v3481_v7, %v1965_v62  ;;  %v2090_v11 = vadd.f32 %v3518_v26, %v2026_v17 }
 0x1c7   :  { %v3482_v54 = vpop.f32.mrb[96].mxu0  ;;  %v3522_v29 = vpop.f32.mrb[96].mxu1  ;;  %v2093_v30 = vadd.f32 %v3521_v53, %v2029_v1 }
 0x1c8   :  { %v3483_v58 = vpop.f32.mrb[97].mxu0  ;;  %v3523_v46 = vpop.f32.mrb[97].mxu1 }
 0x1c9   :  { %v3484_v10 = vadd.f32 %v3483_v58, %v3482_v54  ;;  %v3485_v45 = vpop.f32.mrb[98].mxu0  ;;  %v3524_v20 = vadd.f32 %v3523_v46, %v3522_v29  ;;  %v3525_v48 = vpop.f32.mrb[98].mxu1 }
 0x1ca   :  { %v3486_v5 = vpop.f32.mrb[99].mxu0  ;;  %v3526_v9 = vpop.f32.mrb[99].mxu1 }
 0x1cb   :  { %v2034_v55 = vadd.f32 %v3484_v10, %v1970_v35  ;;  %v3487_v56 = vadd.f32 %v3486_v5, %v3485_v45  ;;  %v3527_v18 = vadd.f32 %v3526_v9, %v3525_v48 }
 0x1cd   :  { %v2037_v4 = vadd.f32 %v3487_v56, %v1973_v39  ;;  %v2098_v15 = vadd.f32 %v3524_v20, %v2034_v55 }
 0x1cf   :  { %v3488_v21 = vpop.f32.mrb[100].mxu0  ;;  %v3528_v51 = vpop.f32.mrb[100].mxu1  ;;  %v2101_v62 = vadd.f32 %v3527_v18, %v2037_v4 }
 0x1d0   :  { %v3489_v24 = vpop.f32.mrb[101].mxu0  ;;  %v3529_v19 = vpop.f32.mrb[101].mxu1 }
 0x1d1   :  { %v3490_v43 = vadd.f32 %v3489_v24, %v3488_v21  ;;  %v3491_v31 = vpop.f32.mrb[102].mxu0  ;;  %v3530_v60 = vadd.f32 %v3529_v19, %v3528_v51  ;;  %v3531_v22 = vpop.f32.mrb[102].mxu1 }
 0x1d2   :  { %v3492_v8 = vpop.f32.mrb[103].mxu0  ;;  %v3532_v33 = vpop.f32.mrb[103].mxu1 }
 0x1d3   :  { %v2042_v12 = vadd.f32 %v3490_v43, %v1978_v40 }
 0x1d5   :  { %v2106_v41 = vadd.f32 %v3530_v60, %v2042_v12 }
 0x1d7   :  { %v3784_v26 = vpop.f32.mrb[104].mxu0  ;;  %v3562_v47 = vpop.f32.mrb[104].mxu1 }
 0x1d8   :  { %v5619_v35 = vadd.f32 %v3784_v26, %v2090_v11  ;;  %v2145_v50 = vpop.f32.mrb[105].mxu0  ;;  %v3563_v39 = vpop.f32.mrb[105].mxu1 }
 0x1d9   :  { %v5621_v6 = vadd.f32 %v2145_v50, %v2082_v23  ;;  %v3785_v17 = vpop.f32.mrb[106].mxu0  ;;  %v3564_v7 = vadd.f32 %v3563_v39, %v3562_v47  ;;  %v3565_v53 = vpop.f32.mrb[106].mxu1 }
 0x1da   :  { %v5623_v1 = vadd.f32 %v3785_v17, %v2093_v30  ;;  %v2148_v54 = vpop.f32.mrb[107].mxu0  ;;  %v3566_v29 = vpop.f32.mrb[107].mxu1 }
 0x1db   :  { %v5625_v58 = vadd.f32 %v2148_v54, %v2085_v52  ;;  %v3567_v46 = vadd.f32 %v3566_v29, %v3565_v53 }
 0x1df   :  { %v3788_v40 = vpop.f32.mrb[108].mxu0  ;;  %v3568_v10 = vpop.f32.mrb[108].mxu1 }
 0x1e0   :  { %v5627_v45 = vadd.f32 %v3788_v40, %v2106_v41  ;;  %v2161_v11 = vpop.f32.mrb[109].mxu0  ;;  %v3569_v20 = vpop.f32.mrb[109].mxu1 }
 0x1e1   :  { %v5629_v48 = vadd.f32 %v2161_v11, %v2098_v15  ;;  %v3789_v23 = vpop.f32.mrb[110].mxu0  ;;  %v3570_v5 = vadd.f32 %v3569_v20, %v3568_v10  ;;  %v3571_v9 = vpop.f32.mrb[110].mxu1 }
 0x1e2   :  { %v2164_v55 = vpop.f32.mrb[111].mxu0  ;;  %v3572_v56 = vpop.f32.mrb[111].mxu1 }
 0x1e3   :  { %v5631_v30 = vadd.f32 %v2164_v55, %v2101_v62  ;;  %v3573_v18 = vadd.f32 %v3572_v56, %v3571_v9 }
 0x1e7   :  { %v3574_v4 = vpop.f32.mrb[112].mxu1 }
 0x1e8   :  { %v3575_v52 = vpop.f32.mrb[113].mxu1 }
 0x1e9   :  { %v3576_v21 = vadd.f32 %v3575_v52, %v3574_v4  ;;  %v3577_v51 = vpop.f32.mrb[114].mxu1 }
 0x1ea   :  { %v3578_v24 = vpop.f32.mrb[115].mxu1 }
 0x1eb   :  { %v3579_v19 = vadd.f32 %v3578_v24, %v3577_v51 }
 0x1ef   :  { %v3580_v43 = vpop.f32.mrb[116].mxu1 }
 0x1f0   :  { %v3581_v31 = vpop.f32.mrb[117].mxu1 }
 0x1f1   :  { %v3582_v60 = vadd.f32 %v3581_v31, %v3580_v43  ;;  %v3583_v22 = vpop.f32.mrb[118].mxu1 }
 0x1f2   :  { %v3584_v15 = vpop.f32.mrb[119].mxu1 }
 0x1f7   :  { %v3602_v8 = vpop.f32.mrb[112].mxu0  ;;  %v3642_v33 = vpop.f32.mrb[120].mxu1 }
 0x1f8   :  { %v3603_v12 = vpop.f32.mrb[113].mxu0  ;;  %v3643_v41 = vpop.f32.mrb[121].mxu1 }
 0x1f9   :  { %v3604_v26 = vadd.f32 %v3603_v12, %v3602_v8  ;;  %v3605_v47 = vpop.f32.mrb[114].mxu0  ;;  %v3644_v62 = vadd.f32 %v3643_v41, %v3642_v33  ;;  %v3645_v50 = vpop.f32.mrb[122].mxu1 }
 0x1fa   :  { %v3606_v39 = vpop.f32.mrb[115].mxu0  ;;  %v3646_v17 = vpop.f32.mrb[123].mxu1 }
 0x1fb   :  { %v2479_v53 = vadd.f32 %v3604_v26, %v3564_v7  ;;  %v3607_v54 = vadd.f32 %v3606_v39, %v3605_v47  ;;  %v3647_v29 = vadd.f32 %v3646_v17, %v3645_v50 }
 0x1fd   :  { %v2482_v40 = vadd.f32 %v3607_v54, %v3567_v46  ;;  %v2543_v10 = vadd.f32 %v3644_v62, %v2479_v53 }
 0x1ff   :  { %v2546_v11 = vadd.f32 %v3647_v29, %v2482_v40  ;;  %v3608_v20 = vpop.f32.mrb[116].mxu0  ;;  %v3648_v23 = vpop.f32.mrb[124].mxu1 }
 0x200   :  { %v3609_v9 = vpop.f32.mrb[117].mxu0  ;;  %v3649_v55 = vpop.f32.mrb[125].mxu1 }
 0x201   :  { %v3610_v56 = vadd.f32 %v3609_v9, %v3608_v20  ;;  %v3611_v4 = vpop.f32.mrb[118].mxu0  ;;  %v3650_v52 = vadd.f32 %v3649_v55, %v3648_v23  ;;  %v3651_v51 = vpop.f32.mrb[126].mxu1 }
 0x202   :  { %v3612_v24 = vpop.f32.mrb[119].mxu0  ;;  %v3652_v43 = vpop.f32.mrb[127].mxu1 }
 0x203   :  { %v2487_v31 = vadd.f32 %v3610_v56, %v3570_v5  ;;  %v3613_v22 = vadd.f32 %v3612_v24, %v3611_v4  ;;  %v3653_v15 = vadd.f32 %v3652_v43, %v3651_v51 }
 0x205   :  { %v2490_v8 = vadd.f32 %v3613_v22, %v3573_v18  ;;  %v2551_v7 = vadd.f32 %v3650_v52, %v2487_v31 }
 0x207   :  { %v5633_v33 = vadd.f32 %v3653_v15, %v2490_v8  ;;  %v3614_v46 = vpop.f32.mrb[120].mxu0  ;;  %v3654_v12 = vpop.f32.mrb[128].mxu1 }
 0x208   :  { %v3615_v41 = vpop.f32.mrb[121].mxu0  ;;  %v3655_v26 = vpop.f32.mrb[129].mxu1 }
 0x209   :  { %v3616_v47 = vadd.f32 %v3615_v41, %v3614_v46  ;;  %v3617_v62 = vpop.f32.mrb[122].mxu0  ;;  %v3656_v50 = vadd.f32 %v3655_v26, %v3654_v12  ;;  %v3657_v39 = vpop.f32.mrb[130].mxu1 }
 0x20a   :  { %v3618_v17 = vpop.f32.mrb[123].mxu0  ;;  %v3658_v53 = vpop.f32.mrb[131].mxu1 }
 0x20b   :  { %v2495_v54 = vadd.f32 %v3616_v47, %v3576_v21  ;;  %v3619_v29 = vadd.f32 %v3618_v17, %v3617_v62  ;;  %v3659_v40 = vadd.f32 %v3658_v53, %v3657_v39 }
 0x20d   :  { %v2498_v5 = vadd.f32 %v3619_v29, %v3579_v19  ;;  %v5635_v20 = vadd.f32 %v3656_v50, %v2495_v54 }
 0x20f   :  { %v5637_v18 = vadd.f32 %v3659_v40, %v2498_v5  ;;  %v3620_v23 = vpop.f32.mrb[124].mxu0  ;;  %v3660_v9 = vpop.f32.mrb[132].mxu1  ;;  %v2998_v5 = vld [vmem:[%s5693_s5] ss:$0 sm:$0xff] }
 0x210   :  { %v3621_v55 = vpop.f32.mrb[125].mxu0  ;;  %v3661_v56 = vpop.f32.mrb[133].mxu1 }
 0x211   :  { %v3622_v4 = vadd.f32 %v3621_v55, %v3620_v23  ;;  %v3623_v52 = vpop.f32.mrb[126].mxu0  ;;  %v3662_v51 = vadd.f32 %v3661_v56, %v3660_v9  ;;  %v3663_v24 = vpop.f32.mrb[134].mxu1 }
 0x212   :  { %v3624_v43 = vpop.f32.mrb[127].mxu0  ;;  %v3664_v31 = vpop.f32.mrb[135].mxu1 }
 0x213   :  { %v2503_v22 = vadd.f32 %v3622_v4, %v3582_v60 }
 0x215   :  { %v5639_v15 = vadd.f32 %v3662_v51, %v2503_v22 }
 0x217   :  { %v3682_v21 = vpop.f32.mrb[128].mxu0  ;;  %v3808_v8 = vpop.f32.mrb[136].mxu1 }
 0x218   :  { %v3683_v19 = vpop.f32.mrb[129].mxu0  ;;  %v2670_v46 = vpop.f32.mrb[137].mxu1 }
 0x219   :  { %v3684_v12 = vadd.f32 %v3683_v19, %v3682_v21  ;;  %v3685_v41 = vpop.f32.mrb[130].mxu0  ;;  %v3809_v26 = vpop.f32.mrb[138].mxu1 }
 0x21a   :  { %v3686_v47 = vpop.f32.mrb[131].mxu0  ;;  %v2673_v62 = vpop.f32.mrb[139].mxu1 }
 0x21b   :  { %v3687_v50 = vadd.f32 %v3686_v47, %v3685_v41  ;;  %v2607_v39 = vadd.f32 %v3684_v12, %v2543_v10 }
 0x21d   :  { %v2671_v17 = vadd.f32 %v2670_v46, %v2607_v39  ;;  %v2610_v53 = vadd.f32 %v3687_v50, %v2546_v11 }
 0x21f   :  { %v2707_v54 = vmax.f32 %v5621_v6, %v2671_v17  ;;  %v2674_v29 = vadd.f32 %v2673_v62, %v2610_v53  ;;  %v3688_v40 = vpop.f32.mrb[132].mxu0  ;;  %v3812_v60 = vpop.f32.mrb[140].mxu1 }
 0x220   :  { %v3689_v23 = vpop.f32.mrb[133].mxu0  ;;  %v2686_v9 = vpop.f32.mrb[141].mxu1 }
 0x221   :  { %v2714_v55 = vmax.f32 %v2700_v57, %v2707_v54  ;;  %v2708_v56 = vmax.f32 %v5625_v58, %v2674_v29  ;;  %v3690_v10 = vadd.f32 %v3689_v23, %v3688_v40  ;;  %v3691_v4 = vpop.f32.mrb[134].mxu0  ;;  %v3813_v11 = vpop.f32.mrb[142].mxu1 }
 0x222   :  { %v3692_v52 = vpop.f32.mrb[135].mxu0  ;;  %v2689_v6 = vpop.f32.mrb[143].mxu1 }
 0x223   :  { %v2728_v51 = vadd.f32 %v2998_v5, %v2714_v55  ;;  %v2715_v24 = vmax.f32 %v2701_v16, %v2708_v56  ;;  %v2615_v43 = vadd.f32 %v3690_v10, %v2551_v7  ;;  %v3693_v31 = vadd.f32 %v3692_v52, %v3691_v4 }
 0x225   :  { %v2729_v22 = vadd.f32 %v2998_v5, %v2715_v24  ;;  %v2679_v21 = vadd.f32 %v3808_v8, %v2615_v43  ;;  %v2618_v19 = vadd.f32 %v3693_v31, %v5633_v33  ;;  %v2735_v44 = vmax.f32 %v2728_v51, 0.0 }
 0x227   :  { %v2736_v27 = vmax.f32 %v2729_v22, 0.0  ;;  %v2709_v57 = vmax.f32 %v5619_v35, %v2679_v21  ;;  %v2682_v58 = vadd.f32 %v3809_v26, %v2618_v19  ;;  %v3694_v46 = vpop.f32.mrb[136].mxu0 }
 0x228   :  { %v3695_v12 = vpop.f32.mrb[137].mxu0 }
 0x229   :  { %v3016_v41 = vpack.c.bf16 %v2736_v27, %v2735_v44  ;;  %v2716_v47 = vmax.f32 %v2702_v63, %v2709_v57  ;;  %v2710_v36 = vmax.f32 %v5623_v1, %v2682_v58  ;;  %v3696_v38 = vadd.f32 %v3695_v12, %v3694_v46  ;;  %v3697_v16 = vpop.f32.mrb[138].mxu0 }
 0x22a   :  { %v3698_v7 = vpop.f32.mrb[139].mxu0 }
 0x22b   :  { %3017 = vst [vmem:[%s5694_s6] sm:$0xff] %v3016_v41   ;;  %v2730_v33 = vadd.f32 %v2998_v5, %v2716_v47  ;;  %v2717_v35 = vmax.f32 %v2703_v13, %v2710_v36  ;;  %v3699_v8 = vadd.f32 %v3698_v7, %v3697_v16  ;;  %v2623_v26 = vadd.f32 %v3696_v38, %v5635_v20 }
 0x22d   :  { %v2731_v62 = vadd.f32 %v2998_v5, %v2717_v35  ;;  %v2687_v3 = vadd.f32 %v2686_v9, %v2623_v26  ;;  %v2626_v14 = vadd.f32 %v3699_v8, %v5637_v18  ;;  %v2737_v63 = vmax.f32 %v2730_v33, 0.0 }
 0x22f   :  { %v2738_v1 = vmax.f32 %v2731_v62, 0.0  ;;  %v2711_v50 = vmax.f32 %v5629_v48, %v2687_v3  ;;  %v2690_v39 = vadd.f32 %v2689_v6, %v2626_v14  ;;  %v3700_v17 = vpop.f32.mrb[140].mxu0 }
 0x230   :  { %v3701_v53 = vpop.f32.mrb[141].mxu0 }
 0x231   :  { %v3021_v54 = vpack.c.bf16 %v2738_v1, %v2737_v63  ;;  %v2718_v59 = vmax.f32 %v2704_v49, %v2711_v50  ;;  %v2712_v32 = vmax.f32 %v5631_v30, %v2690_v39  ;;  %v3702_v13 = vadd.f32 %v3701_v53, %v3700_v17  ;;  %v3703_v20 = vpop.f32.mrb[142].mxu0 }
 0x232   :  { %v3704_v29 = vpop.f32.mrb[143].mxu0 }
 0x233   :  { %3028 = vst [vmem:[%s5694_s6 + $0x8] sm:$0xff] %v3021_v54   ;;  %v2732_v18 = vadd.f32 %v2998_v5, %v2718_v59  ;;  %v2719_v48 = vmax.f32 %v2705_v42, %v2712_v32  ;;  %v2631_v40 = vadd.f32 %v3702_v13, %v5639_v15 }
 0x235   :  { %v2733_v23 = vadd.f32 %v2998_v5, %v2719_v48  ;;  %v2695_v9 = vadd.f32 %v3812_v60, %v2631_v40  ;;  %v2739_v0 = vmax.f32 %v2732_v18, 0.0 }
 0x237   :  { %v2740_v37 = vmax.f32 %v2733_v23, 0.0  ;;  %v2713_v49 = vmax.f32 %v5627_v45, %v2695_v9 }
 0x239   :  { %v3026_v30 = vpack.c.bf16 %v2740_v37, %v2739_v0  ;;  %v2720_v55 = vmax.f32 %v2706_v61, %v2713_v49 }
 0x23b   :  { %3029 = vst [vmem:[%s5694_s6 + $0x10] sm:$0xff] %v3026_v30   ;;  %v2734_v56 = vadd.f32 %v2998_v5, %v2720_v55 }
 0x23d   :  { %v2741_v34 = vmax.f32 %v2734_v56, 0.0 }
 0x23f   :  { %v3012_v2 = vpack.c.bf16 %v2741_v34, %v2741_v34 }
 0x241   :  { %2777 = vst [vmem:[%s5694_s6 + $0x18] sm:$0xf] %v3012_v2 }

// kernel: cnn_forward.7
= control target key start
LH: loop header
LB: loop body
LE: loop exit
PB: predicated region body
PF: predicated region fallthrough
CT: control target
= control target key end

     0   :  { %v298_v0 = vmov 0.0   ;;  %vm299_vm0 = vmmov 0   ;;  %vm61_vm1 = vcmask 523264   ;;  %s378_s1 = inlined_call_operand.vmem [shape: bf16[64,128], index: 1, kind: input, shape index: {}]   ;;  %s379_s3 = inlined_call_operand.vmem [shape: bf16[128,128], index: 3, kind: input, shape index: {}]   ;;  %s380_s0 = inlined_call_operand.vmem [shape: bf16[8,64], index: 0, kind: input, shape index: {}]   ;;  %s381_s2 = inlined_call_operand.vmem [shape: f32[1,128], index: 2, kind: input, shape index: {}]   ;;  %s382_s4 = inlined_call_operand.vmem [shape: f32[1,128], index: 4, kind: input, shape index: {}]   ;;  %s383_s5 = inlined_call_operand.vmem [shape: f32[8,128], index: 5, kind: output, shape index: {}]  }
   0x1   :  { %252 = vmatprep.subr.bf16.mxu0 %v298_v0  ;;  %v286_v1 = vld [vmem:[%s378_s1] sm:$0xff]   ;;  %260 = vmatprep.mubr.msk.bf16.mxu0 %vm299_vm0, %v298_v0  ;;  %v287_v2 = vld [vmem:[%s378_s1 + $0x8] sm:$0xff]   ;;  %v288_v4 = vld [vmem:[%s378_s1 + $0x10] sm:$0xff]  }
   0x2   :  { %264 = vmatprep.subr.bf16.mxu1 %v298_v0  ;;  %280 = vmatprep.mubr.msk.bf16.mxu1 %vm299_vm0, %v298_v0  ;;  %v290_v3 = vld [vmem:[%s379_s3] sm:$0xff]   ;;  %v291_v5 = vld [vmem:[%s379_s3 + $0x8] sm:$0xff]   ;;  %v289_v6 = vld [vmem:[%s378_s1 + $0x18] sm:$0xff]  }
   0x3   :  { %253 = vmatpush3.bf16.msra.mxu0 %v286_v1  ;;  %265 = vmatpush3.bf16.msra.mxu1 %v290_v3  ;;  %v292_v7 = vld [vmem:[%s379_s3 + $0x10] sm:$0xff]   ;;  %v21_v8 = vld [vmem:[%s380_s0] sm:$0xf]  ;;  %v293_v9 = vld [vmem:[%s379_s3 + $0x18] sm:$0xff]  }
   0x4   :  { %254 = vmatprep.subr.bf16.mxu0 %v298_v0  ;;  %266 = vmatprep.subr.bf16.mxu1 %v298_v0  ;;  %v294_v10 = vld [vmem:[%s379_s3 + $0x20] sm:$0xff]   ;;  %v295_v11 = vld [vmem:[%s379_s3 + $0x28] sm:$0xff]   ;;  %v296_v12 = vld [vmem:[%s379_s3 + $0x30] sm:$0xff]  }
   0x5   :  { %v297_v13 = vld [vmem:[%s379_s3 + $0x38] sm:$0xff]   ;;  %v223_v14 = vld [vmem:[%s381_s2] ss:$0 sm:$0xff] }
   0x6   :  { %v229_v22 = vld [vmem:[%s382_s4] ss:$0 sm:$0xff] }
   0x7   :  { %255 = vmatpush3.bf16.msra.mxu0 %v287_v2  ;;  %267 = vmatpush3.bf16.msra.mxu1 %v291_v5 }
   0x8   :  { %256 = vmatprep.subr.bf16.mxu0 %v298_v0  ;;  %268 = vmatprep.subr.bf16.mxu1 %v298_v0 }
   0xb   :  { %257 = vmatpush3.bf16.msra.mxu0 %v288_v4  ;;  %269 = vmatpush3.bf16.msra.mxu1 %v292_v7 }
   0xc   :  { %258 = vmatprep.subr.bf16.mxu0 %v298_v0  ;;  %270 = vmatprep.subr.bf16.mxu1 %v298_v0 }
   0xf   :  { %259 = vmatpush3.bf16.msra.mxu0 %v289_v6  ;;  %271 = vmatpush3.bf16.msra.mxu1 %v293_v9 }
  0x10   :  { %272 = vmatprep.subr.bf16.mxu1 %v298_v0 }
  0x12   :  { %261 = vmatmul.mubr.msk.bf16.vlgmr.msra.gmra.mrb[0].mxu0 %vm61_vm1, %v21_v8 }
  0x13   :  { %273 = vmatpush3.bf16.msra.mxu1 %v294_v10 }
  0x14   :  { %274 = vmatprep.subr.bf16.mxu1 %v298_v0 }
  0x17   :  { %275 = vmatpush3.bf16.msra.mxu1 %v295_v11 }
  0x18   :  { %276 = vmatprep.subr.bf16.mxu1 %v298_v0 }
  0x1b   :  { %277 = vmatpush3.bf16.msra.mxu1 %v296_v12 }
  0x1c   :  { %278 = vmatprep.subr.bf16.mxu1 %v298_v0 }
  0x1f   :  { %279 = vmatpush3.bf16.msra.mxu1 %v297_v13 }
  0xe5   :  { %v99_v15 = vpop.f32.mrb[0].mxu0 }
  0xe6   :  { %v100_v16 = vadd.f32 %v223_v14, %v99_v15  ;;  %v262_v17 = vpop.f32.mrb[1].mxu0 }
  0xe7   :  { %v102_v18 = vpop.f32.mrb[2].mxu0 }
  0xe8   :  { %v105_v19 = vmax.f32 %v100_v16, 0.0  ;;  %v263_v20 = vpop.f32.mrb[3].mxu0 }
  0xea   :  { %v106_v21 = vpack.c.bf16 %v105_v19, %v105_v19 }
  0xec   :  { %281 = vmatmul.mubr.bf16.vlgmr.msra.gmra.mrb[0].mxu1 %v106_v21 }
 0x1bf   :  { %v212_v23 = vpop.f32.mrb[0].mxu1 }
 0x1c0   :  { %v213_v24 = vadd.f32 %v229_v22, %v212_v23  ;;  %v282_v25 = vpop.f32.mrb[1].mxu1 }
 0x1c1   :  { %v215_v26 = vpop.f32.mrb[2].mxu1 }
 0x1c2   :  { %218 = vst [vmem:[%s383_s5] sm:$0xff] %v213_v24  ;;  %v283_v27 = vpop.f32.mrb[3].mxu1 }

// kernel: cnn_forward.6
= control target key start
LH: loop header
LB: loop body
LE: loop exit
PB: predicated region body
PF: predicated region fallthrough
CT: control target
= control target key end

     0   :  { %vm2266_vm0 = vmmov 0   ;;  %s3104_s4 = inlined_call_operand.vmem [shape: bf16[1152,128], index: 4, kind: input, shape index: {}]   ;;  %s3105_s0 = inlined_call_operand.vmem [shape: bf16[8,1152], index: 0, kind: input, shape index: {}]   ;;  %s3106_s1 = inlined_call_operand.vmem [shape: bf16[8,1152], index: 1, kind: input, shape index: {}]   ;;  %s3107_s2 = inlined_call_operand.vmem [shape: bf16[8,1152], index: 2, kind: input, shape index: {}]   ;;  %s3108_s3 = inlined_call_operand.vmem [shape: bf16[8,1152], index: 3, kind: input, shape index: {}]   ;;  %s3109_s5 = inlined_call_operand.vmem [shape: f32[1,128], index: 5, kind: input, shape index: {}]   ;;  %s3110_s6 = inlined_call_operand.vmem [shape: bf16[8,128], index: 6, kind: output, shape index: {}]  }
   0x1   :  { %v2305_v0 = vld [vmem:[%s3104_s4 + $0x40] sm:$0xff]   ;;  %v2328_v4 = vld [vmem:[%s3104_s4 + $0x48] sm:$0xff]   ;;  %v2352_v8 = vld [vmem:[%s3104_s4 + $0x50] sm:$0xff]  }
   0x2   :  { %v2310_v1 = vld [vmem:[%s3104_s4 + $0xc0] sm:$0xff]   ;;  %1675 = vmatprep.subr.bf16.mxu0 %v2305_v0  ;;  %v2334_v5 = vld [vmem:[%s3104_s4 + $0xc8] sm:$0xff]   ;;  %v2358_v9 = vld [vmem:[%s3104_s4 + $0xd0] sm:$0xff]  }
   0x3   :  { %v2316_v2 = vld [vmem:[%s3104_s4] sm:$0xff]   ;;  %1697 = vmatprep.subr.bf16.mxu1 %v2310_v1  ;;  %v2340_v6 = vld [vmem:[%s3104_s4 + $0x8] sm:$0xff]   ;;  %v2364_v10 = vld [vmem:[%s3104_s4 + $0x10] sm:$0xff]  }
   0x4   :  { %v2322_v3 = vld [vmem:[%s3104_s4 + $0x80] sm:$0xff]   ;;  %1676 = vmatpush3.bf16.msra.mxu0 %v2316_v2  ;;  %v2346_v7 = vld [vmem:[%s3104_s4 + $0x88] sm:$0xff]   ;;  %v2370_v11 = vld [vmem:[%s3104_s4 + $0x90] sm:$0xff]  }
   0x5   :  { %1698 = vmatpush3.bf16.msra.mxu1 %v2322_v3  ;;  %1677 = vmatprep.subr.bf16.mxu0 %v2328_v4  ;;  %v2376_v12 = vld [vmem:[%s3104_s4 + $0x58] sm:$0xff]   ;;  %v2400_v16 = vld [vmem:[%s3104_s4 + $0x60] sm:$0xff]   ;;  %v2424_v20 = vld [vmem:[%s3104_s4 + $0x68] sm:$0xff]  }
   0x6   :  { %1699 = vmatprep.subr.bf16.mxu1 %v2334_v5  ;;  %v2382_v13 = vld [vmem:[%s3104_s4 + $0xd8] sm:$0xff]   ;;  %3160 = vst [vmem:[#allocation2_spill] sm:$0xff] %v2400_v16  ;;  %v2406_v17 = vld [vmem:[%s3104_s4 + $0xe0] sm:$0xff]   ;;  %3162 = vst [vmem:[#allocation4_spill] sm:$0xff] %v2424_v20 }
   0x7   :  { %v2388_v14 = vld [vmem:[%s3104_s4 + $0x18] sm:$0xff]   ;;  %v2412_v18 = vld [vmem:[%s3104_s4 + $0x20] sm:$0xff]   ;;  %v2430_v21 = vld [vmem:[%s3104_s4 + $0xe8] sm:$0xff]  }
   0x8   :  { %1678 = vmatpush3.bf16.msra.mxu0 %v2340_v6  ;;  %v2394_v15 = vld [vmem:[%s3104_s4 + $0x98] sm:$0xff]   ;;  %3161 = vst [vmem:[#allocation3_spill] sm:$0xff] %v2412_v18  ;;  %v2418_v19 = vld [vmem:[%s3104_s4 + $0xa0] sm:$0xff]   ;;  %v2436_v22 = vld [vmem:[%s3104_s4 + $0x28] sm:$0xff]  }
   0x9   :  { %1700 = vmatpush3.bf16.msra.mxu1 %v2346_v7  ;;  %1679 = vmatprep.subr.bf16.mxu0 %v2352_v8  ;;  %3163 = vst [vmem:[#allocation5_spill] sm:$0xff] %v2436_v22  ;;  %v2442_v23 = vld [vmem:[%s3104_s4 + $0xa8] sm:$0xff]   ;;  %v2448_v24 = vld [vmem:[%s3104_s4 + $0x70] sm:$0xff]   ;;  %v2472_v28 = vld [vmem:[%s3104_s4 + $0x78] sm:$0xff]  }
   0xa   :  { %1701 = vmatprep.subr.bf16.mxu1 %v2358_v9  ;;  %3164 = vst [vmem:[#allocation6_spill] sm:$0xff] %v2448_v24  ;;  %v2454_v25 = vld [vmem:[%s3104_s4 + $0xf0] sm:$0xff]   ;;  %3166 = vst [vmem:[#allocation8_spill] sm:$0xff] %v2472_v28  ;;  %v2478_v29 = vld [vmem:[%s3104_s4 + $0xf8] sm:$0xff]  }
   0xb   :  { %v2460_v26 = vld [vmem:[%s3104_s4 + $0x30] sm:$0xff]   ;;  %v2484_v30 = vld [vmem:[%s3104_s4 + $0x38] sm:$0xff]   ;;  %v168_v32 = vld [vmem:[%s3105_s0] sm:$0xff] }
   0xc   :  { %1680 = vmatpush3.bf16.msra.mxu0 %v2364_v10  ;;  %3165 = vst [vmem:[#allocation7_spill] sm:$0xff] %v2460_v26  ;;  %v2466_v27 = vld [vmem:[%s3104_s4 + $0xb0] sm:$0xff]   ;;  %v2490_v31 = vld [vmem:[%s3104_s4 + $0xb8] sm:$0xff]   ;;  %v169_v33 = vld [vmem:[%s3105_s0 + $0x8] sm:$0xff]  ;;  %v1566_v34 = vcombine.low %v168_v32, %v168_v32  ;;  %v1567_v35 = vcombine.high %v168_v32, %v168_v32 }
   0xd   :  { %1702 = vmatpush3.bf16.msra.mxu1 %v2370_v11  ;;  %1681 = vmatprep.subr.bf16.mxu0 %v2376_v12  ;;  %v1568_v36 = vcombine.low %v169_v33, %v169_v33  ;;  %v1569_v37 = vcombine.high %v169_v33, %v169_v33  ;;  %v2503_v38 = vld [vmem:[%s3104_s4 + $0x140] sm:$0xff]   ;;  %v2525_v42 = vld [vmem:[%s3104_s4 + $0x148] sm:$0xff]   ;;  %v2549_v46 = vld [vmem:[%s3104_s4 + $0x150] sm:$0xff]  }
   0xe   :  { %1703 = vmatprep.subr.bf16.mxu1 %v2382_v13  ;;  %v2508_v39 = vld [vmem:[%s3104_s4 + $0x1c0] sm:$0xff]   ;;  %669 = vmatprep.mubr.bf16.mxu0 %v1567_v35  ;;  %v2532_v43 = vld [vmem:[%s3104_s4 + $0x1c8] sm:$0xff]   ;;  %v2556_v47 = vld [vmem:[%s3104_s4 + $0x1d0] sm:$0xff]  }
   0xf   :  { %709 = vmatprep.mubr.bf16.mxu1 %v1569_v37  ;;  %v2513_v40 = vld [vmem:[%s3104_s4 + $0x100] sm:$0xff]   ;;  %v2538_v44 = vld [vmem:[%s3104_s4 + $0x108] sm:$0xff]   ;;  %v2562_v48 = vld [vmem:[%s3104_s4 + $0x110] sm:$0xff]  }
  0x10   :  { %1682 = vmatpush3.bf16.msra.mxu0 %v2388_v14  ;;  %v2518_v41 = vld [vmem:[%s3104_s4 + $0x180] sm:$0xff]   ;;  %v2544_v45 = vld [vmem:[%s3104_s4 + $0x188] sm:$0xff]   ;;  %v2568_v49 = vld [vmem:[%s3104_s4 + $0x190] sm:$0xff]  }
  0x11   :  { %1704 = vmatpush3.bf16.msra.mxu1 %v2394_v15  ;;  %1683 = vmatprep.subr.bf16.mxu0 %v2400_v16  ;;  %v2573_v50 = vld [vmem:[%s3104_s4 + $0x158] sm:$0xff]   ;;  %v2597_v54 = vld [vmem:[%s3104_s4 + $0x160] sm:$0xff]   ;;  %v2621_v58 = vld [vmem:[%s3104_s4 + $0x168] sm:$0xff]  }
  0x12   :  { %1705 = vmatprep.subr.bf16.mxu1 %v2406_v17  ;;  %v2580_v51 = vld [vmem:[%s3104_s4 + $0x1d8] sm:$0xff]   ;;  %v2604_v55 = vld [vmem:[%s3104_s4 + $0x1e0] sm:$0xff]   ;;  %v2628_v59 = vld [vmem:[%s3104_s4 + $0x1e8] sm:$0xff]  }
  0x13   :  { %v2586_v52 = vld [vmem:[%s3104_s4 + $0x118] sm:$0xff]   ;;  %3168 = vst [vmem:[#allocation10_spill] sm:$0xff] %v2604_v55  ;;  %v2610_v56 = vld [vmem:[%s3104_s4 + $0x120] sm:$0xff]   ;;  %3170 = vst [vmem:[#allocation12_spill] sm:$0xff] %v2628_v59 }
  0x14   :  { %1684 = vmatpush3.bf16.msra.mxu0 %v2412_v18  ;;  %v2592_v53 = vld [vmem:[%s3104_s4 + $0x198] sm:$0xff]   ;;  %v2616_v57 = vld [vmem:[%s3104_s4 + $0x1a0] sm:$0xff]   ;;  %v2634_v60 = vld [vmem:[%s3104_s4 + $0x128] sm:$0xff]  }
  0x15   :  { %1706 = vmatpush3.bf16.msra.mxu1 %v2418_v19  ;;  %1685 = vmatprep.subr.bf16.mxu0 %v2424_v20  ;;  %3167 = vst [vmem:[#allocation9_spill] sm:$0xff] %v2592_v53  ;;  %3169 = vst [vmem:[#allocation11_spill] sm:$0xff] %v2616_v57  ;;  %v2640_v61 = vld [vmem:[%s3104_s4 + $0x1a8] sm:$0xff]   ;;  %v2645_v62 = vld [vmem:[%s3104_s4 + $0x170] sm:$0xff]  }
  0x16   :  { %1707 = vmatprep.subr.bf16.mxu1 %v2430_v21  ;;  %3171 = vst [vmem:[#allocation13_spill] sm:$0xff] %v2640_v61  ;;  %v2652_v63 = vld [vmem:[%s3104_s4 + $0x1f0] sm:$0xff]   ;;  %v2676_v35 = vld [vmem:[%s3104_s4 + $0x1f8] sm:$0xff]  }
  0x17   :  { %3172 = vst [vmem:[#allocation14_spill] sm:$0xff] %v2652_v63  ;;  %v2658_v32 = vld [vmem:[%s3104_s4 + $0x130] sm:$0xff]   ;;  %3174 = vst [vmem:[#allocation16_spill] sm:$0xff] %v2676_v35  ;;  %v2688_v37 = vld [vmem:[%s3104_s4 + $0x1b8] sm:$0xff]  }
  0x18   :  { %1686 = vmatpush3.bf16.msra.mxu0 %v2436_v22  ;;  %v2664_v33 = vld [vmem:[%s3104_s4 + $0x1b0] sm:$0xff]   ;;  %3176 = vst [vmem:[#allocation18_spill] sm:$0xff] %v2688_v37 }
  0x19   :  { %1708 = vmatpush3.bf16.msra.mxu1 %v2442_v23  ;;  %1687 = vmatprep.subr.bf16.mxu0 %v2448_v24  ;;  %3173 = vst [vmem:[#allocation15_spill] sm:$0xff] %v2664_v33 }
  0x1a   :  { %1709 = vmatprep.subr.bf16.mxu1 %v2454_v25 }
  0x1c   :  { %1688 = vmatpush3.bf16.msra.mxu0 %v2460_v26 }
  0x1d   :  { %1710 = vmatpush3.bf16.msra.mxu1 %v2466_v27  ;;  %1689 = vmatprep.subr.bf16.mxu0 %v2472_v28 }
  0x1e   :  { %1711 = vmatprep.subr.bf16.mxu1 %v2478_v29 }
  0x20   :  { %1690 = vmatpush3.bf16.msra.mxu0 %v2484_v30 }
  0x21   :  { %1712 = vmatpush3.bf16.msra.mxu1 %v2490_v31  ;;  %1719 = vmatprep.subr.bf16.mxu0 %v2503_v38 }
  0x22   :  { %1741 = vmatprep.subr.bf16.mxu1 %v2508_v39 }
  0x23   :  { %670 = vmatmul.mubr.bf16.vlgmr.msra.gmra.mrb[0].mxu0 %v1566_v34  ;;  %v2669_v34 = vld [vmem:[%s3104_s4 + $0x178] sm:$0xff]  }
  0x24   :  { %710 = vmatmul.mubr.bf16.vlgmr.msra.gmra.mrb[0].mxu1 %v1568_v36  ;;  %1720 = vmatpush3.bf16.msra.mxu0 %v2513_v40  ;;  %v2682_v36 = vld [vmem:[%s3104_s4 + $0x138] sm:$0xff]  }
  0x25   :  { %1742 = vmatpush3.bf16.msra.mxu1 %v2518_v41  ;;  %1721 = vmatprep.subr.bf16.mxu0 %v2525_v42  ;;  %3175 = vst [vmem:[#allocation17_spill] sm:$0xff] %v2682_v36 }
  0x26   :  { %1743 = vmatprep.subr.bf16.mxu1 %v2532_v43 }
  0x28   :  { %1722 = vmatpush3.bf16.msra.mxu0 %v2538_v44 }
  0x29   :  { %1744 = vmatpush3.bf16.msra.mxu1 %v2544_v45  ;;  %1723 = vmatprep.subr.bf16.mxu0 %v2549_v46 }
  0x2a   :  { %1745 = vmatprep.subr.bf16.mxu1 %v2556_v47 }
  0x2c   :  { %1724 = vmatpush3.bf16.msra.mxu0 %v2562_v48 }
  0x2d   :  { %1746 = vmatpush3.bf16.msra.mxu1 %v2568_v49  ;;  %1725 = vmatprep.subr.bf16.mxu0 %v2573_v50 }
  0x2e   :  { %1747 = vmatprep.subr.bf16.mxu1 %v2580_v51 }
  0x30   :  { %1726 = vmatpush3.bf16.msra.mxu0 %v2586_v52 }
  0x31   :  { %1748 = vmatpush3.bf16.msra.mxu1 %v2592_v53  ;;  %1727 = vmatprep.subr.bf16.mxu0 %v2597_v54  ;;  %v3139_v53 = vmov 0.0  }
  0x32   :  { %1749 = vmatprep.subr.bf16.mxu1 %v2604_v55  ;;  %v2701_v55 = vld [vmem:[%s3104_s4 + $0x200] sm:$0xff]  }
  0x33   :  { %3177 = vst [vmem:[#allocation19_spill] sm:$0xff] %v2701_v55 }
  0x34   :  { %1728 = vmatpush3.bf16.msra.mxu0 %v2610_v56 }
  0x35   :  { %1750 = vmatpush3.bf16.msra.mxu1 %v2616_v57  ;;  %1729 = vmatprep.subr.bf16.mxu0 %v2621_v58 }
  0x36   :  { %1751 = vmatprep.subr.bf16.mxu1 %v2628_v59  ;;  %v171_v59 = vld [vmem:[%s3105_s0 + $0x18] sm:$0xff] }
  0x37   :  { %v1573_v57 = vcombine.high %v171_v59, %v171_v59 }
  0x38   :  { %1730 = vmatpush3.bf16.msra.mxu0 %v2634_v60 }
  0x39   :  { %1752 = vmatpush3.bf16.msra.mxu1 %v2640_v61  ;;  %1731 = vmatprep.subr.bf16.mxu0 %v2645_v62 }
  0x3a   :  { %1753 = vmatprep.subr.bf16.mxu1 %v2652_v63  ;;  %789 = vmatprep.mubr.bf16.mxu1 %v1573_v57  ;;  %v2721_v57 = vld [vmem:[%s3104_s4 + $0x210] sm:$0xff]  }
  0x3b   :  { %3179 = vst [vmem:[#allocation21_spill] sm:$0xff] %v2721_v57 }
  0x3c   :  { %1732 = vmatpush3.bf16.msra.mxu0 %v2658_v32 }
  0x3d   :  { %1754 = vmatpush3.bf16.msra.mxu1 %v2664_v33  ;;  %1733 = vmatprep.subr.bf16.mxu0 %v2669_v34  ;;  %v170_v33 = vld [vmem:[%s3105_s0 + $0x10] sm:$0xff] }
  0x3e   :  { %1755 = vmatprep.subr.bf16.mxu1 %v2676_v35  ;;  %v1570_v63 = vcombine.low %v170_v33, %v170_v33  ;;  %v1571_v61 = vcombine.high %v170_v33, %v170_v33  ;;  %v1572_v35 = vcombine.low %v171_v59, %v171_v59  ;;  %v2710_v59 = vld [vmem:[%s3104_s4 + $0x208] sm:$0xff]   ;;  %v2733_v33 = vld [vmem:[%s3104_s4 + $0x218] sm:$0xff]  }
  0x3f   :  { %3178 = vst [vmem:[#allocation20_spill] sm:$0xff] %v2710_v59  ;;  %3180 = vst [vmem:[#allocation22_spill] sm:$0xff] %v2733_v33 }
  0x40   :  { %1734 = vmatpush3.bf16.msra.mxu0 %v2682_v36  ;;  %749 = vmatprep.mubr.bf16.mxu0 %v1571_v61  ;;  %v837_v61 = vld [vmem:[%s3106_s1] sm:$0xff] }
  0x41   :  { %1756 = vmatpush3.bf16.msra.mxu1 %v2688_v37  ;;  %2063 = vmatprep.subr.bf16.mxu0 %v3139_v53 }
  0x42   :  { %1772 = vmatprep.subr.bf16.mxu1 %v2305_v0 }
  0x43   :  { %750 = vmatmul.mubr.bf16.vlgmr.msra.gmra.mrb[4].mxu0 %v1570_v63  ;;  %v1648_v63 = vcombine.high %v837_v61, %v837_v61 }
  0x44   :  { %790 = vmatmul.mubr.bf16.vlgmr.msra.gmra.mrb[4].mxu1 %v1572_v35  ;;  %2064 = vmatpush3.bf16.msra.mxu0 %v2701_v55  ;;  %v2742_v35 = vld [vmem:[%s3104_s4 + $0x220] sm:$0xff]  }
  0x45   :  { %1773 = vmatpush3.bf16.msra.mxu1 %v2316_v2  ;;  %2065 = vmatprep.subr.bf16.mxu0 %v3139_v53  ;;  %3181 = vst [vmem:[#allocation23_spill] sm:$0xff] %v2742_v35 }
  0x46   :  { %1774 = vmatprep.subr.bf16.mxu1 %v2328_v4  ;;  %2079 = vmatprep.mubr.msk.bf16.mxu0 %vm2266_vm0, %v3139_v53 }
  0x47   :  { %906 = vmatprep.mubr.bf16.mxu1 %v1648_v63  ;;  %v2751_v63 = vld [vmem:[%s3104_s4 + $0x228] sm:$0xff]  }
  0x48   :  { %2066 = vmatpush3.bf16.msra.mxu0 %v2710_v59  ;;  %3182 = vst [vmem:[#allocation24_spill] sm:$0xff] %v2751_v63 }
  0x49   :  { %1775 = vmatpush3.bf16.msra.mxu1 %v2340_v6  ;;  %2067 = vmatprep.subr.bf16.mxu0 %v3139_v53 }
  0x4a   :  { %1776 = vmatprep.subr.bf16.mxu1 %v2352_v8 }
  0x4c   :  { %2068 = vmatpush3.bf16.msra.mxu0 %v2721_v57 }
  0x4d   :  { %1777 = vmatpush3.bf16.msra.mxu1 %v2364_v10  ;;  %2069 = vmatprep.subr.bf16.mxu0 %v3139_v53 }
  0x4e   :  { %1778 = vmatprep.subr.bf16.mxu1 %v2376_v12 }
  0x50   :  { %2070 = vmatpush3.bf16.msra.mxu0 %v2733_v33 }
  0x51   :  { %1779 = vmatpush3.bf16.msra.mxu1 %v2388_v14  ;;  %2071 = vmatprep.subr.bf16.mxu0 %v3139_v53 }
  0x52   :  { %1780 = vmatprep.subr.bf16.mxu1 %v2400_v16  ;;  %v2760_v16 = vld [vmem:[%s3104_s4 + $0x230] sm:$0xff]  }
  0x53   :  { %3183 = vst [vmem:[#allocation25_spill] sm:$0xff] %v2760_v16 }
  0x54   :  { %2072 = vmatpush3.bf16.msra.mxu0 %v2742_v35 }
  0x55   :  { %1781 = vmatpush3.bf16.msra.mxu1 %v2412_v18  ;;  %2073 = vmatprep.subr.bf16.mxu0 %v3139_v53  ;;  %v1647_v18 = vcombine.low %v837_v61, %v837_v61 }
  0x56   :  { %1782 = vmatprep.subr.bf16.mxu1 %v2424_v20  ;;  %v2769_v20 = vld [vmem:[%s3104_s4 + $0x238] sm:$0xff]  }
  0x58   :  { %2074 = vmatpush3.bf16.msra.mxu0 %v2751_v63 }
  0x59   :  { %1783 = vmatpush3.bf16.msra.mxu1 %v2436_v22  ;;  %2075 = vmatprep.subr.bf16.mxu0 %v3139_v53  ;;  %v2225_v22 = vld [vmem:[%s3105_s0 + $0x20] ss:$0 sps:$4 sm:$0xff]  }
  0x5a   :  { %1784 = vmatprep.subr.bf16.mxu1 %v2448_v24  ;;  %v838_v24 = vld [vmem:[%s3106_s1 + $0x8] sm:$0xff] }
  0x5c   :  { %2076 = vmatpush3.bf16.msra.mxu0 %v2760_v16 }
  0x5d   :  { %1785 = vmatpush3.bf16.msra.mxu1 %v2460_v26  ;;  %2077 = vmatprep.subr.bf16.mxu0 %v3139_v53  ;;  %v839_v26 = vld [vmem:[%s3106_s1 + $0x10] sm:$0xff]  ;;  %v1650_v53 = vcombine.high %v838_v24, %v838_v24 }
  0x5e   :  { %1786 = vmatprep.subr.bf16.mxu1 %v2472_v28  ;;  %v1652_v28 = vcombine.high %v839_v26, %v839_v26 }
  0x60   :  { %2078 = vmatpush3.bf16.msra.mxu0 %v2769_v20 }
  0x61   :  { %1787 = vmatpush3.bf16.msra.mxu1 %v2484_v30  ;;  %1794 = vmatprep.subr.bf16.mxu0 %v2310_v1 }
  0x62   :  { %1816 = vmatprep.subr.bf16.mxu1 %v2503_v38 }
  0x63   :  { %2080 = vmatmul.mubr.bf16.vlgmr.msra.gmra.mrb[8].mxu0 %v2225_v22  ;;  %v1651_v22 = vcombine.low %v839_v26, %v839_v26  ;;  %v3186_v26 = vld [vmem:[#allocation10_spill] sm:$0xff] }
  0x64   :  { %907 = vmatmul.mubr.bf16.vlgmr.msra.gmra.mrb[8].mxu1 %v1647_v18  ;;  %1795 = vmatpush3.bf16.msra.mxu0 %v2322_v3  ;;  %v1649_v18 = vcombine.low %v838_v24, %v838_v24  ;;  %v3185_v24 = vld [vmem:[#allocation9_spill] sm:$0xff] }
  0x65   :  { %1817 = vmatpush3.bf16.msra.mxu1 %v2513_v40  ;;  %1796 = vmatprep.subr.bf16.mxu0 %v2334_v5 }
  0x66   :  { %1818 = vmatprep.subr.bf16.mxu1 %v2525_v42  ;;  %946 = vmatprep.mubr.bf16.mxu0 %v1650_v53  ;;  %v3184_v53 = vmov 0.0  }
  0x67   :  { %986 = vmatprep.mubr.bf16.mxu1 %v1652_v28  ;;  %v840_v28 = vld [vmem:[%s3106_s1 + $0x18] sm:$0xff] }
  0x68   :  { %1797 = vmatpush3.bf16.msra.mxu0 %v2346_v7  ;;  %v1654_v61 = vcombine.high %v840_v28, %v840_v28 }
  0x69   :  { %1819 = vmatpush3.bf16.msra.mxu1 %v2538_v44  ;;  %1798 = vmatprep.subr.bf16.mxu0 %v2358_v9 }
  0x6a   :  { %1820 = vmatprep.subr.bf16.mxu1 %v2549_v46 }
  0x6c   :  { %1799 = vmatpush3.bf16.msra.mxu0 %v2370_v11 }
  0x6d   :  { %1821 = vmatpush3.bf16.msra.mxu1 %v2562_v48  ;;  %1800 = vmatprep.subr.bf16.mxu0 %v2382_v13 }
  0x6e   :  { %1822 = vmatprep.subr.bf16.mxu1 %v2573_v50 }
  0x70   :  { %1801 = vmatpush3.bf16.msra.mxu0 %v2394_v15 }
  0x71   :  { %1823 = vmatpush3.bf16.msra.mxu1 %v2586_v52  ;;  %1802 = vmatprep.subr.bf16.mxu0 %v2406_v17 }
  0x72   :  { %1824 = vmatprep.subr.bf16.mxu1 %v2597_v54 }
  0x74   :  { %1803 = vmatpush3.bf16.msra.mxu0 %v2418_v19 }
  0x75   :  { %1825 = vmatpush3.bf16.msra.mxu1 %v2610_v56  ;;  %1804 = vmatprep.subr.bf16.mxu0 %v2430_v21 }
  0x76   :  { %1826 = vmatprep.subr.bf16.mxu1 %v2621_v58 }
  0x78   :  { %1805 = vmatpush3.bf16.msra.mxu0 %v2442_v23 }
  0x79   :  { %1827 = vmatpush3.bf16.msra.mxu1 %v2634_v60  ;;  %1806 = vmatprep.subr.bf16.mxu0 %v2454_v25 }
  0x7a   :  { %1828 = vmatprep.subr.bf16.mxu1 %v2645_v62 }
  0x7c   :  { %1807 = vmatpush3.bf16.msra.mxu0 %v2466_v27 }
  0x7d   :  { %1829 = vmatpush3.bf16.msra.mxu1 %v2658_v32  ;;  %1808 = vmatprep.subr.bf16.mxu0 %v2478_v29 }
  0x7e   :  { %1830 = vmatprep.subr.bf16.mxu1 %v2669_v34 }
  0x80   :  { %1809 = vmatpush3.bf16.msra.mxu0 %v2490_v31 }
  0x81   :  { %1831 = vmatpush3.bf16.msra.mxu1 %v2682_v36  ;;  %1838 = vmatprep.subr.bf16.mxu0 %v2508_v39  ;;  %v1075_v36 = vld [vmem:[%s3107_s2 + $0x8] sm:$0xff] }
  0x82   :  { %2083 = vmatprep.subr.bf16.mxu1 %v3184_v53 }
  0x83   :  { %947 = vmatmul.mubr.bf16.vlgmr.msra.gmra.mrb[12].mxu0 %v1649_v18  ;;  %v3187_v18 = vld [vmem:[#allocation11_spill] sm:$0xff] }
  0x84   :  { %987 = vmatmul.mubr.bf16.vlgmr.msra.gmra.mrb[12].mxu1 %v1651_v22  ;;  %1839 = vmatpush3.bf16.msra.mxu0 %v2518_v41  ;;  %v3188_v22 = vld [vmem:[#allocation12_spill] sm:$0xff] }
  0x85   :  { %2084 = vmatpush3.bf16.msra.mxu1 %v2701_v55  ;;  %1840 = vmatprep.subr.bf16.mxu0 %v2532_v43  ;;  %v2234_v55 = vld [vmem:[%s3106_s1 + $0x20] ss:$0 sps:$4 sm:$0xff]  }
  0x86   :  { %2085 = vmatprep.subr.bf16.mxu1 %v3184_v53  ;;  %1026 = vmatprep.mubr.bf16.mxu0 %v1654_v61  ;;  %v3189_v61 = vld [vmem:[#allocation13_spill] sm:$0xff] }
  0x87   :  { %2099 = vmatprep.mubr.msk.bf16.mxu1 %vm2266_vm0, %v3184_v53 }
  0x88   :  { %1841 = vmatpush3.bf16.msra.mxu0 %v2544_v45 }
  0x89   :  { %2086 = vmatpush3.bf16.msra.mxu1 %v2710_v59  ;;  %1842 = vmatprep.subr.bf16.mxu0 %v2556_v47  ;;  %v3192_v59 = vld [vmem:[#allocation16_spill] sm:$0xff] }
  0x8a   :  { %2087 = vmatprep.subr.bf16.mxu1 %v3184_v53 }
  0x8c   :  { %1843 = vmatpush3.bf16.msra.mxu0 %v2568_v49 }
  0x8d   :  { %2088 = vmatpush3.bf16.msra.mxu1 %v2721_v57  ;;  %1844 = vmatprep.subr.bf16.mxu0 %v2580_v51  ;;  %v3190_v57 = vld [vmem:[#allocation14_spill] sm:$0xff] }
  0x8e   :  { %2089 = vmatprep.subr.bf16.mxu1 %v3184_v53 }
  0x90   :  { %1845 = vmatpush3.bf16.msra.mxu0 %v3185_v24 }
  0x91   :  { %2090 = vmatpush3.bf16.msra.mxu1 %v2733_v33  ;;  %1846 = vmatprep.subr.bf16.mxu0 %v3186_v26  ;;  %v3191_v33 = vld [vmem:[#allocation15_spill] sm:$0xff] }
  0x92   :  { %2091 = vmatprep.subr.bf16.mxu1 %v3184_v53 }
  0x94   :  { %1847 = vmatpush3.bf16.msra.mxu0 %v3187_v18 }
  0x95   :  { %2092 = vmatpush3.bf16.msra.mxu1 %v2742_v35  ;;  %1848 = vmatprep.subr.bf16.mxu0 %v3188_v22  ;;  %v1653_v35 = vcombine.low %v840_v28, %v840_v28 }
  0x96   :  { %2093 = vmatprep.subr.bf16.mxu1 %v3184_v53 }
  0x98   :  { %1849 = vmatpush3.bf16.msra.mxu0 %v3189_v61 }
  0x99   :  { %2094 = vmatpush3.bf16.msra.mxu1 %v2751_v63  ;;  %1850 = vmatprep.subr.bf16.mxu0 %v3190_v57  ;;  %v1074_v63 = vld [vmem:[%s3107_s2] sm:$0xff] }
  0x9a   :  { %2095 = vmatprep.subr.bf16.mxu1 %v3184_v53  ;;  %v1657_v28 = vcombine.high %v1074_v63, %v1074_v63 }
  0x9c   :  { %1851 = vmatpush3.bf16.msra.mxu0 %v3191_v33 }
  0x9d   :  { %2096 = vmatpush3.bf16.msra.mxu1 %v2760_v16  ;;  %1852 = vmatprep.subr.bf16.mxu0 %v3192_v59  ;;  %v1659_v16 = vcombine.high %v1075_v36, %v1075_v36 }
  0x9e   :  { %2097 = vmatprep.subr.bf16.mxu1 %v3184_v53 }
  0xa0   :  { %1853 = vmatpush3.bf16.msra.mxu0 %v2688_v37 }
  0xa1   :  { %2098 = vmatpush3.bf16.msra.mxu1 %v2769_v20  ;;  %1869 = vmatprep.subr.bf16.mxu0 %v2305_v0  ;;  %v3193_v0 = vld [vmem:[#allocation2_spill] sm:$0xff] }
  0xa2   :  { %1891 = vmatprep.subr.bf16.mxu1 %v2310_v1  ;;  %v3194_v1 = vld [vmem:[#allocation3_spill] sm:$0xff] }
  0xa3   :  { %1027 = vmatmul.mubr.bf16.vlgmr.msra.gmra.mrb[16].mxu0 %v1653_v35  ;;  %v2933_v35 = vld [vmem:[%s3108_s3] sm:$0xff] }
  0xa4   :  { %2100 = vmatmul.mubr.bf16.vlgmr.msra.gmra.mrb[16].mxu1 %v2234_v55  ;;  %1870 = vmatpush3.bf16.msra.mxu0 %v2316_v2  ;;  %v3195_v2 = vld [vmem:[#allocation4_spill] sm:$0xff] }
  0xa5   :  { %1892 = vmatpush3.bf16.msra.mxu1 %v2322_v3  ;;  %1871 = vmatprep.subr.bf16.mxu0 %v2328_v4  ;;  %v3196_v3 = vld [vmem:[#allocation5_spill] sm:$0xff] }
  0xa6   :  { %1893 = vmatprep.subr.bf16.mxu1 %v2334_v5  ;;  %1143 = vmatprep.mubr.bf16.mxu0 %v1657_v28  ;;  %v3197_v5 = vld [vmem:[#allocation6_spill] sm:$0xff] }
  0xa7   :  { %1183 = vmatprep.mubr.bf16.mxu1 %v1659_v16  ;;  %v1077_v16 = vld [vmem:[%s3107_s2 + $0x18] sm:$0xff]  ;;  %v2253_v28 = vld [vmem:[%s3104_s4 + $0x40] sm:$0xff]  }
  0xa8   :  { %1872 = vmatpush3.bf16.msra.mxu0 %v2340_v6 }
  0xa9   :  { %1894 = vmatpush3.bf16.msra.mxu1 %v2346_v7  ;;  %1873 = vmatprep.subr.bf16.mxu0 %v2352_v8  ;;  %v3198_v7 = vld [vmem:[#allocation7_spill] sm:$0xff] }
  0xaa   :  { %1895 = vmatprep.subr.bf16.mxu1 %v2358_v9  ;;  %v3199_v9 = vld [vmem:[#allocation8_spill] sm:$0xff] }
  0xac   :  { %1874 = vmatpush3.bf16.msra.mxu0 %v2364_v10 }
  0xad   :  { %1896 = vmatpush3.bf16.msra.mxu1 %v2370_v11  ;;  %1875 = vmatprep.subr.bf16.mxu0 %v2376_v12  ;;  %v1656_v11 = vcombine.low %v1074_v63, %v1074_v63  ;;  %v3200_v63 = vld [vmem:[#allocation17_spill] sm:$0xff] }
  0xae   :  { %1897 = vmatprep.subr.bf16.mxu1 %v2382_v13  ;;  %v1658_v13 = vcombine.low %v1075_v36, %v1075_v36  ;;  %v1662_v36 = vcombine.low %v1077_v16, %v1077_v16 }
  0xb0   :  { %1876 = vmatpush3.bf16.msra.mxu0 %v2388_v14 }
  0xb1   :  { %1898 = vmatpush3.bf16.msra.mxu1 %v2394_v15  ;;  %1877 = vmatprep.subr.bf16.mxu0 %v3193_v0  ;;  %v1076_v15 = vld [vmem:[%s3107_s2 + $0x10] sm:$0xff] }
  0xb2   :  { %1899 = vmatprep.subr.bf16.mxu1 %v2406_v17  ;;  %v1661_v17 = vcombine.high %v1076_v15, %v1076_v15  ;;  %v1660_v55 = vcombine.low %v1076_v15, %v1076_v15  ;;  %v2254_v15 = vld [vmem:[%s3104_s4] sm:$0xff]  }
  0xb4   :  { %1878 = vmatpush3.bf16.msra.mxu0 %v3194_v1 }
  0xb5   :  { %1900 = vmatpush3.bf16.msra.mxu1 %v2418_v19  ;;  %1879 = vmatprep.subr.bf16.mxu0 %v3195_v2  ;;  %v1663_v19 = vcombine.high %v1077_v16, %v1077_v16  ;;  %v3202_v16 = vld [vmem:[#allocation20_spill] sm:$0xff] }
  0xb6   :  { %1901 = vmatprep.subr.bf16.mxu1 %v2430_v21 }
  0xb8   :  { %1880 = vmatpush3.bf16.msra.mxu0 %v3196_v3 }
  0xb9   :  { %1902 = vmatpush3.bf16.msra.mxu1 %v2442_v23  ;;  %1881 = vmatprep.subr.bf16.mxu0 %v3197_v5 }
  0xba   :  { %1903 = vmatprep.subr.bf16.mxu1 %v2454_v25 }
  0xbc   :  { %1882 = vmatpush3.bf16.msra.mxu0 %v3198_v7 }
  0xbd   :  { %1904 = vmatpush3.bf16.msra.mxu1 %v2466_v27  ;;  %1883 = vmatprep.subr.bf16.mxu0 %v3199_v9 }
  0xbe   :  { %1905 = vmatprep.subr.bf16.mxu1 %v2478_v29 }
  0xc0   :  { %1884 = vmatpush3.bf16.msra.mxu0 %v2484_v30 }
  0xc1   :  { %1906 = vmatpush3.bf16.msra.mxu1 %v2490_v31  ;;  %1913 = vmatprep.subr.bf16.mxu0 %v2503_v38 }
  0xc2   :  { %1935 = vmatprep.subr.bf16.mxu1 %v2508_v39 }
  0xc3   :  { %1144 = vmatmul.mubr.bf16.vlgmr.msra.gmra.mrb[20].mxu0 %v1656_v11  ;;  %v1666_v11 = vcombine.high %v2933_v35, %v2933_v35 }
  0xc4   :  { %1184 = vmatmul.mubr.bf16.vlgmr.msra.gmra.mrb[20].mxu1 %v1658_v13  ;;  %1914 = vmatpush3.bf16.msra.mxu0 %v2513_v40  ;;  %v3201_v13 = vld [vmem:[#allocation19_spill] sm:$0xff] }
  0xc5   :  { %1936 = vmatpush3.bf16.msra.mxu1 %v2518_v41  ;;  %1915 = vmatprep.subr.bf16.mxu0 %v2525_v42 }
  0xc6   :  { %1937 = vmatprep.subr.bf16.mxu1 %v2532_v43  ;;  %1223 = vmatprep.mubr.bf16.mxu0 %v1661_v17  ;;  %v3203_v17 = vld [vmem:[#allocation21_spill] sm:$0xff] }
  0xc7   :  { %1263 = vmatprep.mubr.bf16.mxu1 %v1663_v19 }
  0xc8   :  { %1916 = vmatpush3.bf16.msra.mxu0 %v2538_v44 }
  0xc9   :  { %1938 = vmatpush3.bf16.msra.mxu1 %v2544_v45  ;;  %1917 = vmatprep.subr.bf16.mxu0 %v2549_v46 }
  0xca   :  { %1939 = vmatprep.subr.bf16.mxu1 %v2556_v47 }
  0xcc   :  { %1918 = vmatpush3.bf16.msra.mxu0 %v2562_v48 }
  0xcd   :  { %1940 = vmatpush3.bf16.msra.mxu1 %v2568_v49  ;;  %1919 = vmatprep.subr.bf16.mxu0 %v2573_v50 }
  0xce   :  { %1941 = vmatprep.subr.bf16.mxu1 %v2580_v51 }
  0xd0   :  { %1920 = vmatpush3.bf16.msra.mxu0 %v2586_v52 }
  0xd1   :  { %1942 = vmatpush3.bf16.msra.mxu1 %v3185_v24  ;;  %1921 = vmatprep.subr.bf16.mxu0 %v2597_v54 }
  0xd2   :  { %1943 = vmatprep.subr.bf16.mxu1 %v3186_v26 }
  0xd4   :  { %1922 = vmatpush3.bf16.msra.mxu0 %v2610_v56 }
  0xd5   :  { %1944 = vmatpush3.bf16.msra.mxu1 %v3187_v18  ;;  %1923 = vmatprep.subr.bf16.mxu0 %v2621_v58 }
  0xd6   :  { %1945 = vmatprep.subr.bf16.mxu1 %v3188_v22 }
  0xd8   :  { %1924 = vmatpush3.bf16.msra.mxu0 %v2634_v60 }
  0xd9   :  { %1946 = vmatpush3.bf16.msra.mxu1 %v3189_v61  ;;  %1925 = vmatprep.subr.bf16.mxu0 %v2645_v62 }
  0xda   :  { %1947 = vmatprep.subr.bf16.mxu1 %v3190_v57 }
  0xdc   :  { %1926 = vmatpush3.bf16.msra.mxu0 %v2658_v32 }
  0xdd   :  { %1948 = vmatpush3.bf16.msra.mxu1 %v3191_v33  ;;  %1927 = vmatprep.subr.bf16.mxu0 %v2669_v34 }
  0xde   :  { %1949 = vmatprep.subr.bf16.mxu1 %v3192_v59 }
  0xe0   :  { %1928 = vmatpush3.bf16.msra.mxu0 %v3200_v63 }
  0xe1   :  { %1950 = vmatpush3.bf16.msra.mxu1 %v2688_v37  ;;  %2103 = vmatprep.subr.bf16.mxu0 %v3184_v53 }
  0xe2   :  { %1966 = vmatprep.subr.bf16.mxu1 %v2253_v28 }
  0xe3   :  { %1224 = vmatmul.mubr.bf16.vlgmr.msra.gmra.mrb[24].mxu0 %v1660_v55 }
  0xe4   :  { %1264 = vmatmul.mubr.bf16.vlgmr.msra.gmra.mrb[24].mxu1 %v1662_v36  ;;  %2104 = vmatpush3.bf16.msra.mxu0 %v3201_v13 }
  0xe5   :  { %1967 = vmatpush3.bf16.msra.mxu1 %v2254_v15  ;;  %2105 = vmatprep.subr.bf16.mxu0 %v3184_v53 }
  0xe6   :  { %1968 = vmatprep.subr.bf16.mxu1 %v2328_v4  ;;  %2119 = vmatprep.mubr.msk.bf16.mxu0 %vm2266_vm0, %v3184_v53  ;;  %v3204_v4 = vld [vmem:[#allocation22_spill] sm:$0xff] }
  0xe7   :  { %1380 = vmatprep.mubr.bf16.mxu1 %v1666_v11  ;;  %v3206_v11 = vld [vmem:[#allocation24_spill] sm:$0xff] }
  0xe8   :  { %2106 = vmatpush3.bf16.msra.mxu0 %v3202_v16 }
  0xe9   :  { %1969 = vmatpush3.bf16.msra.mxu1 %v2340_v6  ;;  %2107 = vmatprep.subr.bf16.mxu0 %v3184_v53  ;;  %v3205_v6 = vld [vmem:[#allocation23_spill] sm:$0xff] }
  0xea   :  { %1970 = vmatprep.subr.bf16.mxu1 %v2352_v8 }
  0xec   :  { %2108 = vmatpush3.bf16.msra.mxu0 %v3203_v17 }
  0xed   :  { %1971 = vmatpush3.bf16.msra.mxu1 %v2364_v10  ;;  %2109 = vmatprep.subr.bf16.mxu0 %v3184_v53 }
  0xee   :  { %1972 = vmatprep.subr.bf16.mxu1 %v2376_v12 }
  0xf0   :  { %2110 = vmatpush3.bf16.msra.mxu0 %v3204_v4 }
  0xf1   :  { %1973 = vmatpush3.bf16.msra.mxu1 %v2388_v14  ;;  %2111 = vmatprep.subr.bf16.mxu0 %v3184_v53 }
  0xf2   :  { %1974 = vmatprep.subr.bf16.mxu1 %v3193_v0 }
  0xf4   :  { %2112 = vmatpush3.bf16.msra.mxu0 %v3205_v6 }
  0xf5   :  { %1975 = vmatpush3.bf16.msra.mxu1 %v3194_v1  ;;  %2113 = vmatprep.subr.bf16.mxu0 %v3184_v53  ;;  %v3207_v1 = vld [vmem:[#allocation25_spill] sm:$0xff] }
  0xf6   :  { %v1691_v8 = vpop.f32.mrb[0].mxu0  ;;  %1976 = vmatprep.subr.bf16.mxu1 %v3195_v2  ;;  %v2243_v2 = vld [vmem:[%s3107_s2 + $0x20] ss:$0 sps:$4 sm:$0xff]  }
  0xf7   :  { %v1713_v19 = vpop.f32.mrb[0].mxu1  ;;  %v1692_v10 = vpop.f32.mrb[1].mxu0 }
  0xf8   :  { %v1714_v12 = vpop.f32.mrb[1].mxu1  ;;  %v1693_v55 = vadd.f32 %v1692_v10, %v1691_v8  ;;  %v1694_v28 = vpop.f32.mrb[2].mxu0  ;;  %2114 = vmatpush3.bf16.msra.mxu0 %v3206_v11  ;;  %v2985_v8 = vld [vmem:[%s3108_s3 + $0x8] sm:$0xff]  ;;  %v2261_v10 = vld [vmem:[%s3104_s4 + $0xd8] sm:$0xff]  }
  0xf9   :  { %v1715_v36 = vadd.f32 %v1714_v12, %v1713_v19  ;;  %v1716_v14 = vpop.f32.mrb[2].mxu1  ;;  %v1695_v15 = vpop.f32.mrb[3].mxu0  ;;  %1977 = vmatpush3.bf16.msra.mxu1 %v3196_v3  ;;  %2115 = vmatprep.subr.bf16.mxu0 %v3184_v53  ;;  %v1665_v3 = vcombine.low %v2933_v35, %v2933_v35  ;;  %v2256_v19 = vld [vmem:[%s3104_s4 + $0x80] sm:$0xff]  }
  0xfa   :  { %v1717_v0 = vpop.f32.mrb[3].mxu1  ;;  %1978 = vmatprep.subr.bf16.mxu1 %v3197_v5  ;;  %v2990_v5 = vld [vmem:[%s3108_s3 + $0x10] sm:$0xff] }
  0xfb   :  { %v2969_v37 = vadd.f32 %v1715_v36, %v1693_v55  ;;  %v1670_v35 = vcombine.high %v2990_v5, %v2990_v5 }
  0xfc   :  { %2116 = vmatpush3.bf16.msra.mxu0 %v3207_v1 }
  0xfd   :  { %1979 = vmatpush3.bf16.msra.mxu1 %v3198_v7  ;;  %2117 = vmatprep.subr.bf16.mxu0 %v3184_v53  ;;  %v2255_v7 = vld [vmem:[%s3104_s4 + $0xc0] sm:$0xff]  }
  0xfe   :  { %1980 = vmatprep.subr.bf16.mxu1 %v3199_v9  ;;  %v1668_v9 = vcombine.high %v2985_v8, %v2985_v8 }
 0x100   :  { %2118 = vmatpush3.bf16.msra.mxu0 %v2769_v20 }
 0x101   :  { %1981 = vmatpush3.bf16.msra.mxu1 %v2484_v30  ;;  %1988 = vmatprep.subr.bf16.mxu0 %v2255_v7  ;;  %v2257_v30 = vld [vmem:[%s3104_s4 + $0xc8] sm:$0xff]  }
 0x102   :  { %2010 = vmatprep.subr.bf16.mxu1 %v2503_v38  ;;  %v2258_v38 = vld [vmem:[%s3104_s4 + $0x88] sm:$0xff]  }
 0x103   :  { %2120 = vmatmul.mubr.bf16.vlgmr.msra.gmra.mrb[28].mxu0 %v2243_v2 }
 0x104   :  { %1381 = vmatmul.mubr.bf16.vlgmr.msra.gmra.mrb[28].mxu1 %v1665_v3  ;;  %1989 = vmatpush3.bf16.msra.mxu0 %v2256_v19 }
 0x105   :  { %2011 = vmatpush3.bf16.msra.mxu1 %v2513_v40  ;;  %1990 = vmatprep.subr.bf16.mxu0 %v2257_v30  ;;  %v2259_v40 = vld [vmem:[%s3104_s4 + $0xd0] sm:$0xff]  }
 0x106   :  { %2012 = vmatprep.subr.bf16.mxu1 %v2525_v42  ;;  %1420 = vmatprep.mubr.bf16.mxu0 %v1668_v9  ;;  %v2260_v42 = vld [vmem:[%s3104_s4 + $0x90] sm:$0xff]  }
 0x107   :  { %1460 = vmatprep.mubr.bf16.mxu1 %v1670_v35 }
 0x108   :  { %1991 = vmatpush3.bf16.msra.mxu0 %v2258_v38 }
 0x109   :  { %2013 = vmatpush3.bf16.msra.mxu1 %v2538_v44  ;;  %1992 = vmatprep.subr.bf16.mxu0 %v2259_v40  ;;  %v2262_v44 = vld [vmem:[%s3104_s4 + $0x98] sm:$0xff]  }
 0x10a   :  { %2014 = vmatprep.subr.bf16.mxu1 %v2549_v46  ;;  %v2263_v46 = vld [vmem:[%s3104_s4 + $0xe0] sm:$0xff]  }
 0x10c   :  { %1993 = vmatpush3.bf16.msra.mxu0 %v2260_v42 }
 0x10d   :  { %2015 = vmatpush3.bf16.msra.mxu1 %v2562_v48  ;;  %1994 = vmatprep.subr.bf16.mxu0 %v2261_v10  ;;  %v2264_v48 = vld [vmem:[%s3104_s4 + $0xa0] sm:$0xff]  }
 0x10e   :  { %2016 = vmatprep.subr.bf16.mxu1 %v2573_v50 }
 0x110   :  { %1995 = vmatpush3.bf16.msra.mxu0 %v2262_v44 }
 0x111   :  { %2017 = vmatpush3.bf16.msra.mxu1 %v2586_v52  ;;  %1996 = vmatprep.subr.bf16.mxu0 %v2263_v46 }
 0x112   :  { %2018 = vmatprep.subr.bf16.mxu1 %v2597_v54 }
 0x114   :  { %1997 = vmatpush3.bf16.msra.mxu0 %v2264_v48 }
 0x115   :  { %2019 = vmatpush3.bf16.msra.mxu1 %v2610_v56  ;;  %1998 = vmatprep.subr.bf16.mxu0 %v2430_v21 }
 0x116   :  { %2020 = vmatprep.subr.bf16.mxu1 %v2621_v58  ;;  %v1735_v50 = vpop.f32.mrb[4].mxu0 }
 0x117   :  { %v1757_v52 = vpop.f32.mrb[4].mxu1  ;;  %v1736_v12 = vpop.f32.mrb[5].mxu0 }
 0x118   :  { %v1758_v55 = vpop.f32.mrb[5].mxu1  ;;  %v1737_v36 = vadd.f32 %v1736_v12, %v1735_v50  ;;  %v1738_v28 = vpop.f32.mrb[6].mxu0  ;;  %1999 = vmatpush3.bf16.msra.mxu0 %v2442_v23  ;;  %v1667_v23 = vcombine.low %v2985_v8, %v2985_v8 }
 0x119   :  { %v1759_v54 = vadd.f32 %v1758_v55, %v1757_v52  ;;  %2021 = vmatpush3.bf16.msra.mxu1 %v2634_v60  ;;  %v1760_v14 = vpop.f32.mrb[6].mxu1  ;;  %v1739_v15 = vpop.f32.mrb[7].mxu0  ;;  %2000 = vmatprep.subr.bf16.mxu0 %v2454_v25  ;;  %v1669_v25 = vcombine.low %v2990_v5, %v2990_v5  ;;  %v1314_v60 = vld [vmem:[%s3108_s3 + $0x18] sm:$0xff] }
 0x11a   :  { %v1761_v56 = vpop.f32.mrb[7].mxu1  ;;  %2022 = vmatprep.subr.bf16.mxu1 %v2645_v62  ;;  %v752_v21 = vadd.f32 %v1737_v36, %v2969_v37  ;;  %v3208_v37 = vld [vmem:[#allocation18_spill] sm:$0xff] }
 0x11c   :  { %2001 = vmatpush3.bf16.msra.mxu0 %v2466_v27  ;;  %v792_v58 = vadd.f32 %v1759_v54, %v752_v21  ;;  %v1672_v27 = vcombine.high %v1314_v60, %v1314_v60 }
 0x11d   :  { %2023 = vmatpush3.bf16.msra.mxu1 %v2658_v32  ;;  %2002 = vmatprep.subr.bf16.mxu0 %v2478_v29  ;;  %v1671_v32 = vcombine.low %v1314_v60, %v1314_v60 }
 0x11e   :  { %2024 = vmatprep.subr.bf16.mxu1 %v2669_v34  ;;  %v2252_v34 = vld [vmem:[%s3108_s3 + $0x20] ss:$0 sps:$4 sm:$0xff]  }
 0x120   :  { %2003 = vmatpush3.bf16.msra.mxu0 %v2490_v31 }
 0x121   :  { %2025 = vmatpush3.bf16.msra.mxu1 %v3200_v63  ;;  %2032 = vmatprep.subr.bf16.mxu0 %v2508_v39 }
 0x122   :  { %2123 = vmatprep.subr.bf16.mxu1 %v3184_v53 }
 0x123   :  { %1421 = vmatmul.mubr.bf16.vlgmr.msra.gmra.mrb[32].mxu0 %v1667_v23 }
 0x124   :  { %1461 = vmatmul.mubr.bf16.vlgmr.msra.gmra.mrb[32].mxu1 %v1669_v25  ;;  %2033 = vmatpush3.bf16.msra.mxu0 %v2518_v41 }
 0x125   :  { %2124 = vmatpush3.bf16.msra.mxu1 %v3201_v13  ;;  %2034 = vmatprep.subr.bf16.mxu0 %v2532_v43 }
 0x126   :  { %2125 = vmatprep.subr.bf16.mxu1 %v3184_v53  ;;  %1500 = vmatprep.mubr.bf16.mxu0 %v1672_v27 }
 0x127   :  { %2139 = vmatprep.mubr.msk.bf16.mxu1 %vm2266_vm0, %v3184_v53 }
 0x128   :  { %2035 = vmatpush3.bf16.msra.mxu0 %v2544_v45 }
 0x129   :  { %2126 = vmatpush3.bf16.msra.mxu1 %v3202_v16  ;;  %2036 = vmatprep.subr.bf16.mxu0 %v2556_v47 }
 0x12a   :  { %2127 = vmatprep.subr.bf16.mxu1 %v3184_v53 }
 0x12c   :  { %2037 = vmatpush3.bf16.msra.mxu0 %v2568_v49 }
 0x12d   :  { %2128 = vmatpush3.bf16.msra.mxu1 %v3203_v17  ;;  %2038 = vmatprep.subr.bf16.mxu0 %v2580_v51 }
 0x12e   :  { %2129 = vmatprep.subr.bf16.mxu1 %v3184_v53 }
 0x130   :  { %2039 = vmatpush3.bf16.msra.mxu0 %v3185_v24 }
 0x131   :  { %2130 = vmatpush3.bf16.msra.mxu1 %v3204_v4  ;;  %2040 = vmatprep.subr.bf16.mxu0 %v3186_v26 }
 0x132   :  { %2131 = vmatprep.subr.bf16.mxu1 %v3184_v53 }
 0x134   :  { %2041 = vmatpush3.bf16.msra.mxu0 %v3187_v18 }
 0x135   :  { %2132 = vmatpush3.bf16.msra.mxu1 %v3205_v6  ;;  %2042 = vmatprep.subr.bf16.mxu0 %v3188_v22 }
 0x136   :  { %2133 = vmatprep.subr.bf16.mxu1 %v3184_v53  ;;  %v831_v29 = vpop.f32.mrb[8].mxu0 }
 0x137   :  { %v1788_v31 = vpop.f32.mrb[8].mxu1  ;;  %v3082_v39 = vadd.f32 %v831_v29, %v792_v58  ;;  %v2081_v41 = vpop.f32.mrb[9].mxu0 }
 0x138   :  { %v1789_v43 = vpop.f32.mrb[9].mxu1  ;;  %v834_v45 = vpop.f32.mrb[10].mxu0  ;;  %2043 = vmatpush3.bf16.msra.mxu0 %v3189_v61 }
 0x139   :  { %v1790_v47 = vadd.f32 %v1789_v43, %v1788_v31  ;;  %2134 = vmatpush3.bf16.msra.mxu1 %v3206_v11  ;;  %v1791_v49 = vpop.f32.mrb[10].mxu1  ;;  %v2082_v51 = vpop.f32.mrb[11].mxu0  ;;  %2044 = vmatprep.subr.bf16.mxu0 %v3190_v57 }
 0x13a   :  { %v1792_v62 = vpop.f32.mrb[11].mxu1  ;;  %2135 = vmatprep.subr.bf16.mxu1 %v3184_v53 }
 0x13c   :  { %2045 = vmatpush3.bf16.msra.mxu0 %v3191_v33 }
 0x13d   :  { %2136 = vmatpush3.bf16.msra.mxu1 %v3207_v1  ;;  %2046 = vmatprep.subr.bf16.mxu0 %v3192_v59 }
 0x13e   :  { %2137 = vmatprep.subr.bf16.mxu1 %v3184_v53 }
 0x140   :  { %2047 = vmatpush3.bf16.msra.mxu0 %v3208_v37 }
 0x141   :  { %2138 = vmatpush3.bf16.msra.mxu1 %v2769_v20 }
 0x143   :  { %1501 = vmatmul.mubr.bf16.vlgmr.msra.gmra.mrb[36].mxu0 %v1671_v32 }
 0x144   :  { %2140 = vmatmul.mubr.bf16.vlgmr.msra.gmra.mrb[36].mxu1 %v2252_v34 }
 0x156   :  { %v1810_v57 = vpop.f32.mrb[12].mxu0 }
 0x157   :  { %v1832_v24 = vpop.f32.mrb[12].mxu1  ;;  %v1811_v33 = vpop.f32.mrb[13].mxu0 }
 0x158   :  { %v1833_v26 = vpop.f32.mrb[13].mxu1  ;;  %v1812_v18 = vadd.f32 %v1811_v33, %v1810_v57  ;;  %v1813_v22 = vpop.f32.mrb[14].mxu0 }
 0x159   :  { %v1834_v59 = vadd.f32 %v1833_v26, %v1832_v24  ;;  %v1835_v61 = vpop.f32.mrb[14].mxu1  ;;  %v1814_v53 = vpop.f32.mrb[15].mxu0 }
 0x15a   :  { %v1836_v63 = vpop.f32.mrb[15].mxu1  ;;  %v949_v13 = vadd.f32 %v1812_v18, %v1790_v47 }
 0x15c   :  { %v989_v16 = vadd.f32 %v1834_v59, %v949_v13 }
 0x176   :  { %v1854_v17 = vpop.f32.mrb[16].mxu0 }
 0x177   :  { %v1068_v4 = vpop.f32.mrb[16].mxu1  ;;  %v1855_v6 = vpop.f32.mrb[17].mxu0 }
 0x178   :  { %v2101_v11 = vpop.f32.mrb[17].mxu1  ;;  %v1856_v0 = vadd.f32 %v1855_v6, %v1854_v17  ;;  %v1857_v20 = vpop.f32.mrb[18].mxu0 }
 0x179   :  { %v1071_v1 = vpop.f32.mrb[18].mxu1  ;;  %v1858_v2 = vpop.f32.mrb[19].mxu0  ;;  %v1674_v20 = vld [vmem:[%s3109_s5] ss:$0 sm:$0xff] }
 0x17a   :  { %v2102_v3 = vpop.f32.mrb[19].mxu1  ;;  %v1029_v8 = vadd.f32 %v1856_v0, %v989_v16 }
 0x17c   :  { %v1069_v5 = vadd.f32 %v1068_v4, %v1029_v8 }
 0x17e   :  { %v1548_v7 = vmax.f32 %v3082_v39, %v1069_v5 }
 0x196   :  { %v1885_v9 = vpop.f32.mrb[20].mxu0 }
 0x197   :  { %v1907_v35 = vpop.f32.mrb[20].mxu1  ;;  %v1886_v19 = vpop.f32.mrb[21].mxu0 }
 0x198   :  { %v1908_v30 = vpop.f32.mrb[21].mxu1  ;;  %v1887_v38 = vadd.f32 %v1886_v19, %v1885_v9  ;;  %v1888_v42 = vpop.f32.mrb[22].mxu0 }
 0x199   :  { %v1909_v40 = vadd.f32 %v1908_v30, %v1907_v35  ;;  %v1910_v10 = vpop.f32.mrb[22].mxu1  ;;  %v1889_v44 = vpop.f32.mrb[23].mxu0 }
 0x19a   :  { %v1911_v46 = vpop.f32.mrb[23].mxu1 }
 0x19b   :  { %v1186_v48 = vadd.f32 %v1909_v40, %v1887_v38 }
 0x1b6   :  { %v1929_v50 = vpop.f32.mrb[24].mxu0 }
 0x1b7   :  { %v1951_v52 = vpop.f32.mrb[24].mxu1  ;;  %v1930_v12 = vpop.f32.mrb[25].mxu0 }
 0x1b8   :  { %v1952_v55 = vpop.f32.mrb[25].mxu1  ;;  %v1931_v36 = vadd.f32 %v1930_v12, %v1929_v50  ;;  %v1932_v28 = vpop.f32.mrb[26].mxu0 }
 0x1b9   :  { %v1953_v54 = vadd.f32 %v1952_v55, %v1951_v52  ;;  %v1954_v14 = vpop.f32.mrb[26].mxu1  ;;  %v1933_v15 = vpop.f32.mrb[27].mxu0 }
 0x1ba   :  { %v1955_v56 = vpop.f32.mrb[27].mxu1  ;;  %v1226_v21 = vadd.f32 %v1931_v36, %v1186_v48 }
 0x1bc   :  { %v1266_v58 = vadd.f32 %v1953_v54, %v1226_v21 }
 0x1d6   :  { %v1305_v23 = vpop.f32.mrb[28].mxu0 }
 0x1d7   :  { %v1982_v25 = vpop.f32.mrb[28].mxu1  ;;  %v1306_v60 = vadd.f32 %v1305_v23, %v1266_v58  ;;  %v2121_v27 = vpop.f32.mrb[29].mxu0 }
 0x1d8   :  { %v1983_v29 = vpop.f32.mrb[29].mxu1  ;;  %v1308_v31 = vpop.f32.mrb[30].mxu0 }
 0x1d9   :  { %v1984_v39 = vadd.f32 %v1983_v29, %v1982_v25  ;;  %v1985_v41 = vpop.f32.mrb[30].mxu1  ;;  %v2122_v43 = vpop.f32.mrb[31].mxu0 }
 0x1da   :  { %v1986_v45 = vpop.f32.mrb[31].mxu1 }
 0x1f6   :  { %v2004_v47 = vpop.f32.mrb[32].mxu0 }
 0x1f7   :  { %v2026_v49 = vpop.f32.mrb[32].mxu1  ;;  %v2005_v51 = vpop.f32.mrb[33].mxu0 }
 0x1f8   :  { %v2027_v62 = vpop.f32.mrb[33].mxu1  ;;  %v2006_v32 = vadd.f32 %v2005_v51, %v2004_v47  ;;  %v2007_v34 = vpop.f32.mrb[34].mxu0 }
 0x1f9   :  { %v2028_v37 = vadd.f32 %v2027_v62, %v2026_v49  ;;  %v2029_v57 = vpop.f32.mrb[34].mxu1  ;;  %v2008_v24 = vpop.f32.mrb[35].mxu0 }
 0x1fa   :  { %v2030_v33 = vpop.f32.mrb[35].mxu1  ;;  %v1423_v26 = vadd.f32 %v2006_v32, %v1984_v39 }
 0x1fc   :  { %v1463_v18 = vadd.f32 %v2028_v37, %v1423_v26 }
 0x216   :  { %v2048_v22 = vpop.f32.mrb[36].mxu0 }
 0x217   :  { %v1542_v59 = vpop.f32.mrb[36].mxu1  ;;  %v2049_v61 = vpop.f32.mrb[37].mxu0 }
 0x218   :  { %v2141_v53 = vpop.f32.mrb[37].mxu1  ;;  %v2050_v63 = vadd.f32 %v2049_v61, %v2048_v22  ;;  %v2051_v13 = vpop.f32.mrb[38].mxu0 }
 0x219   :  { %v1545_v16 = vpop.f32.mrb[38].mxu1  ;;  %v2052_v17 = vpop.f32.mrb[39].mxu0 }
 0x21a   :  { %v2142_v4 = vpop.f32.mrb[39].mxu1  ;;  %v1503_v6 = vadd.f32 %v2050_v63, %v1463_v18 }
 0x21c   :  { %v1543_v11 = vadd.f32 %v1542_v59, %v1503_v6 }
 0x21e   :  { %v1549_v0 = vmax.f32 %v1306_v60, %v1543_v11 }
 0x220   :  { %v1550_v1 = vmax.f32 %v1548_v7, %v1549_v0 }
 0x222   :  { %v1558_v2 = vadd.f32 %v1674_v20, %v1550_v1 }
 0x224   :  { %v1559_v3 = vmax.f32 %v1558_v2, 0.0 }
 0x226   :  { %v1560_v8 = vpack.c.bf16 %v1559_v3, %v1559_v3 }
 0x228   :  { %1561 = vst [vmem:[%s3110_s6] sm:$0xf] %v1560_v8 }

</bundles_post_ra>
